<compile_context>
chip_gen: v6e
topology: v6e:2x2x1
jax: 0.10.0
libtpu: 0.0.40
codegen_flags: <defaults>
</compile_context>

<pallas_src>
import functools

import jax
import jax.numpy as jnp
from jax import lax
from jax.experimental import pallas as pl
from jax.experimental.pallas import tpu as pltpu


# ----------------------------- Pallas kernel --------------------------------
def gru_rnnet_kernel(x_ref, wih_ref, whh_ref, bg_ref, bhn_ref,
                     wlin_ref, blin_ref, out_ref,
                     h_scratch, gi_scratch,
                     *, seq_len, t_chunk, unroll, has_tail):
    """One grid step == one chunk of t_chunk GRU timesteps.

    x_ref     : (t_chunk*B_pad, E)     time-major rows (row = t_local*B_pad + b)
    wih_ref   : (E, 3*H_pad)           input->gate weights (transposed) [r|z|n], zero-padded
    whh_ref   : (H_pad, 3*H_pad)       hidden->gate weights (transposed), zero-padded
    bg_ref    : (1, 3*H_pad)           fused bias: b_ih + [b_hr | b_hz | 0]
    bhn_ref   : (1, H_pad)             b_hn (must stay inside r * (...))
    wlin_ref  : (H_pad, 128)           final linear weight, transposed, lane-padded
    blin_ref  : (1, 128)               final linear bias, lane-padded
    out_ref   : (B_pad, 128)           sigmoid(linear(h_last)), lane-dense store
    h_scratch : (B_pad, H_pad) f32     recurrent hidden state, persists across grid steps
    gi_scratch: (t_chunk*B_pad, 3*H_pad) f32 per-chunk input projection
    """
    c = pl.program_id(0)
    last = pl.num_programs(0) - 1
    b_pad, h_pad = h_scratch.shape

    @pl.when(c == 0)
    def _():
        h_scratch[...] = jnp.zeros_like(h_scratch)

    # Hoisted input projection: ONE MXU matmul covers all t_chunk timesteps of the chunk
    # (fused gate bias added here, once per chunk, not once per step).
    gi_scratch[...] = (
        jnp.dot(x_ref[...], wih_ref[...], preferred_element_type=jnp.float32)
        + bg_ref[...])

    whh = whh_ref[...]                                          # resident, hoisted
    # Hoist the (1,Hp)->(Bp,Hp) broadcast out of the unrolled loop (no CSE of broadcasts).
    b_hn_b = jnp.broadcast_to(bhn_ref[...], (b_pad, h_pad))

    def run_chunk(masked):
        def step(t, h):
            row0 = pl.multiple_of(t * b_pad, b_pad)
            gi = gi_scratch[pl.ds(row0, b_pad), :]                        # (Bp, 3Hp) f32
            # only thing on the serial critical path: (Bp,Hp)x(Hp,3Hp) matmul (bf16 MXU
            # when weight_dtype=bf16; f32 accumulate either way)
            gh = jnp.dot(h.astype(whh.dtype), whh,
                         preferred_element_type=jnp.float32)              # (Bp, 3Hp)
            # gate slices are whole-vreg (multiples of 128 lanes)
            r = jax.nn.sigmoid(gi[:, 0:h_pad] + gh[:, 0:h_pad])
            z = jax.nn.sigmoid(gi[:, h_pad:2 * h_pad] + gh[:, h_pad:2 * h_pad])
            n = jnp.tanh(gi[:, 2 * h_pad:3 * h_pad]
                         + r * (gh[:, 2 * h_pad:3 * h_pad] + b_hn_b))
            h_new = n + z * (h - n)                    # == (1-z)*n + z*h, one VPU op fewer
            if masked:                                 # only the last chunk pays this
                valid = (c * t_chunk + t) < seq_len
                h_new = jnp.where(valid, h_new, h)
            return h_new

        h_scratch[...] = lax.fori_loop(0, t_chunk, step, h_scratch[...], unroll=unroll)

    if has_tail:
        @pl.when(c != last)
        def _():
            run_chunk(False)

        @pl.when(c == last)
        def _():
            run_chunk(True)
    else:
        run_chunk(False)

    @pl.when(c == last)
    def _():
        logits = (jnp.dot(h_scratch[...], wlin_ref[...],
                          preferred_element_type=jnp.float32) + blin_ref[...])
        out_ref[...] = jax.nn.sigmoid(logits)


# --------------------------- weight preparation -------------------------------
def _prep_params(params, hidden, hidden_pad, embed, out_pad, weight_dtype):
    """Transpose / gate-block / zero-pad the PyTorch-layout GRU parameters."""
    f32 = jnp.float32
    w_ih = params["w_ih"].astype(f32)    # (3H, E)   gate order [r, z, n]
    w_hh = params["w_hh"].astype(f32)    # (3H, H)
    b_ih = params["b_ih"].astype(f32)    # (3H,)
    b_hh = params["b_hh"].astype(f32)    # (3H,)
    w_lin = params["w_lin"].astype(f32)  # (1, H)
    b_lin = params["b_lin"].astype(f32)  # (1,)

    H, Hp = hidden, hidden_pad
    dh = Hp - H

    def gate_blocks_t(w, k_pad):
        # (3H, K) -> (K_pad, 3*Hp), transposed, zero-padded per gate block.
        k = w.shape[1]
        wr, wz, wn = w[0:H], w[H:2 * H], w[2 * H:3 * H]
        one = lambda g: jnp.pad(g.T, ((0, k_pad - k), (0, dh)))
        return jnp.concatenate([one(wr), one(wz), one(wn)], axis=1)

    wih_t = gate_blocks_t(w_ih, embed).astype(weight_dtype)     # (E, 3*Hp)
    whh_t = gate_blocks_t(w_hh, Hp).astype(weight_dtype)        # (Hp, 3*Hp)

    padv = lambda v: jnp.pad(v, (0, dh))
    bir, biz, binn = b_ih[0:H], b_ih[H:2 * H], b_ih[2 * H:3 * H]
    bhr, bhz, bhn = b_hh[0:H], b_hh[H:2 * H], b_hh[2 * H:3 * H]
    # Fold b_ih (all gates) + b_hh's r/z parts into the chunk-level gi bias;
    # b_hn must stay separate because r multiplies (W_hn h + b_hn).
    b_gates = jnp.concatenate([padv(bir + bhr), padv(biz + bhz), padv(binn)])[None, :]
    b_hn_p = padv(bhn)[None, :]                                  # (1, Hp)

    wlin_t = jnp.zeros((Hp, out_pad), f32).at[:H, 0].set(w_lin[0])
    blin_p = jnp.zeros((1, out_pad), f32).at[0, 0].set(b_lin[0])
    return wih_t, whh_t, b_gates, b_hn_p, wlin_t, blin_p


def _vmem_capacity_bytes():
    """Per-TensorCore VMEM capacity; conservative v7x fallback if query unavailable."""
    try:
        return int(pltpu.get_tpu_info().vmem_capacity_bytes)
    except Exception:
        return 64 * 1024 * 1024


# ------------------------------ wrapper --------------------------------------
def gru_rnnet_forward(tokens, params, *, t_chunk=None, unroll=None,
                      weight_dtype=jnp.float32):
    """tokens: (B, S) int token ids (extra unit axes tolerated). Returns (B, 1) float32."""
    # PyTorch forward does x.squeeze(); replicate it but never drop the batch axis.
    drop = tuple(i for i, d in enumerate(tokens.shape) if d == 1 and i != 0)
    if drop:
        tokens = jnp.squeeze(tokens, axis=drop)
    B, S = tokens.shape

    emb_table = params["embedding"].astype(jnp.float32)
    E = emb_table.shape[1]
    H = params["w_hh"].shape[1]

    LANE, SUB = 128, 8
    Hp = pl.cdiv(H, LANE) * LANE          # lane-aligned hidden (128 for H=32)
    Bp = pl.cdiv(B, SUB) * SUB            # sublane-aligned batch (8 for B=2)
    OUT_PAD = LANE                        # lane-dense output block
    wb = 2 if weight_dtype == jnp.bfloat16 else 4

    # Per-generation VMEM budget (v5e/v6e: 128 MiB, v7x: 64 MiB per TensorCore).
    cap = _vmem_capacity_bytes()
    if t_chunk is None:
        fixed = ((E * 3 * Hp + Hp * 3 * Hp) * wb                    # single-buffered weights
                 + (3 * Hp + Hp + Hp * OUT_PAD + OUT_PAD) * 4       # biases + head (f32)
                 + Bp * Hp * 4 + Bp * OUT_PAD * 4)                  # h_scratch + output
        per_t = Bp * (3 * Hp * 4 + 2 * E * wb)                      # gi (f32) + 2x x-chunk
        t_chunk = int((int(0.6 * cap) - fixed) // max(per_t, 1))
        t_chunk = max(8, min(t_chunk, 64, max(S, 1)))
    # keep the x block's sublane dim tile-aligned (16 rows for bf16, 8 for f32)
    min_rows = 16 if weight_dtype == jnp.bfloat16 else 8
    while (t_chunk * Bp) % min_rows:
        t_chunk += 1
    if unroll is None:
        unroll = min(t_chunk, 8)          # cap unrolling -> no vreg-spill blowup

    n_chunks = pl.cdiv(S, t_chunk)
    Sp = n_chunks * t_chunk
    has_tail = (S % t_chunk) != 0

    # Embedding gather directly in time-major order (transpose the tiny index matrix,
    # NOT the gathered embeddings) -> no extra S*B*E HBM pass before the kernel.
    x = jnp.take(emb_table, tokens.T, axis=0).astype(weight_dtype)   # (S, B, E)
    x = jnp.pad(x, ((0, Sp - S), (0, Bp - B), (0, 0)))
    x2d = x.reshape(Sp * Bp, E)                                       # row = t * Bp + b

    wih_t, whh_t, b_gates, b_hn, wlin_t, blin = _prep_params(
        params, H, Hp, E, OUT_PAD, weight_dtype)

    rows = t_chunk * Bp
    const = lambda c: (0, 0)              # resident weights / output: constant block index
    resident = dict(pipeline_mode=pl.Buffered(1))   # single buffer: block never changes
    kernel = functools.partial(gru_rnnet_kernel, seq_len=S, t_chunk=t_chunk,
                               unroll=unroll, has_tail=has_tail)

    out = pl.pallas_call(
        kernel,
        out_shape=jax.ShapeDtypeStruct((Bp, OUT_PAD), jnp.float32),
        grid_spec=pltpu.PrefetchScalarGridSpec(
            num_scalar_prefetch=0,
            grid=(n_chunks,),
            in_specs=[
                pl.BlockSpec((rows, E), lambda c: (c, 0)),              # x chunk (streamed)
                pl.BlockSpec((E, 3 * Hp), const, **resident),           # W_ih^T
                pl.BlockSpec((Hp, 3 * Hp), const, **resident),          # W_hh^T
                pl.BlockSpec((1, 3 * Hp), const, **resident),           # fused gate bias
                pl.BlockSpec((1, Hp), const, **resident),               # b_hn
                pl.BlockSpec((Hp, OUT_PAD), const, **resident),         # W_lin^T
                pl.BlockSpec((1, OUT_PAD), const, **resident),          # b_lin
            ],
            out_specs=pl.BlockSpec((Bp, OUT_PAD), const),
            scratch_shapes=[
                pltpu.VMEM((Bp, Hp), jnp.float32),                      # hidden state
                pltpu.VMEM((rows, 3 * Hp), jnp.float32),                # per-chunk gi
            ],
        ),
        compiler_params=pltpu.CompilerParams(
            dimension_semantics=("arbitrary",),   # time recurrence is strictly sequential
            vmem_limit_bytes=int(0.85 * cap),     # ~109 MiB on v5e/v6e, ~54 MiB on v7x
        ),
    )(x2d, wih_t, whh_t, b_gates, b_hn, wlin_t, blin)

    return out[:B, :1]


# --------------------------- pure-JAX reference -------------------------------
def gru_rnnet_reference(tokens, params):
    drop = tuple(i for i, d in enumerate(tokens.shape) if d == 1 and i != 0)
    if drop:
        tokens = jnp.squeeze(tokens, axis=drop)
    emb = jnp.take(params["embedding"].astype(jnp.float32), tokens, axis=0)  # (B, S, E)
    B, S, _ = emb.shape
    H = params["w_hh"].shape[1]
    h = jnp.zeros((B, H), jnp.float32)
    for t in range(S):
        x_t = emb[:, t, :]
        gi = x_t @ params["w_ih"].T + params["b_ih"]
        gh = h @ params["w_hh"].T + params["b_hh"]
        i_r, i_z, i_n = gi[:, :H], gi[:, H:2 * H], gi[:, 2 * H:]
        h_r, h_z, h_n = gh[:, :H], gh[:, H:2 * H], gh[:, 2 * H:]
        r = jax.nn.sigmoid(i_r + h_r)
        z = jax.nn.sigmoid(i_z + h_z)
        n = jnp.tanh(i_n + r * h_n)
        h = (1.0 - z) * n + z * h
    logits = h @ params["w_lin"].T + params["b_lin"]
    return jax.nn.sigmoid(logits)


# ------------------------------- params --------------------------------------
def init_params(key, voc_size, embed_size, hidden_size):
    ks = jax.random.split(key, 7)
    k = 1.0 / jnp.sqrt(hidden_size)
    u = lambda kk, shape: jax.random.uniform(kk, shape, jnp.float32, -k, k)
    return {
        # nn.Embedding default init: N(0, 1)
        "embedding": jax.random.normal(ks[0], (voc_size, embed_size), jnp.float32),
        # nn.GRU defaults: U(-1/sqrt(H), 1/sqrt(H)); gate order [r, z, n]
        "w_ih": u(ks[1], (3 * hidden_size, embed_size)),
        "w_hh": u(ks[2], (3 * hidden_size, hidden_size)),
        "b_ih": u(ks[3], (3 * hidden_size,)),
        "b_hh": u(ks[4], (3 * hidden_size,)),
        # nn.Linear(hidden, 1)
        "w_lin": u(ks[5], (1, hidden_size)),
        "b_lin": u(ks[6], (1,)),
    }


if __name__ == "__main__":
    voc_size, embed_size, seq_len, hidden_size = 50, 16, 8, 32
    batch = 2

    key = jax.random.PRNGKey(0)
    k_tok, k_par = jax.random.split(key)
    tokens = jax.random.randint(k_tok, (batch, seq_len), 0, voc_size, jnp.int32)
    params = init_params(k_par, voc_size, embed_size, hidden_size)

    ref = gru_rnnet_reference(tokens, params)

    # 1) f32 path with t_chunk deliberately NOT dividing seq_len: exercises the
    #    multi-chunk hidden-state carry AND the masked tail chunk; matches the f32
    #    reference to tight tolerance.
    out = jax.block_until_ready(gru_rnnet_forward(tokens, params, t_chunk=6))
    assert out.shape == (batch, 1) and out.dtype == jnp.float32
    assert jnp.allclose(out, ref, atol=1e-5, rtol=1e-5), (out, ref)

    # 2) bf16-weight MXU path with the auto (VMEM-budgeted) t_chunk; relaxed tolerance is
    #    the expected precision change of bf16 weights, not a kernel bug.
    out_bf16 = jax.block_until_ready(
        gru_rnnet_forward(tokens, params, weight_dtype=jnp.bfloat16))
    assert out_bf16.shape == (batch, 1) and out_bf16.dtype == jnp.float32
    assert jnp.allclose(out_bf16, ref, atol=2e-2, rtol=2e-2), (out_bf16, ref)

    print("KERNEL_OK")
</pallas_src>

<mosaic_0001>
module attributes {stable_mosaic.version = 11 : i64} {
  func.func @gru_rnnet_kernel(%arg0: i32, %arg1: memref<48x16xf32, #tpu.memory_space<vmem>>, %arg2: memref<16x384xf32, #tpu.memory_space<vmem>>, %arg3: memref<128x384xf32, #tpu.memory_space<vmem>>, %arg4: memref<1x384xf32, #tpu.memory_space<vmem>>, %arg5: memref<1x128xf32, #tpu.memory_space<vmem>>, %arg6: memref<128x128xf32, #tpu.memory_space<vmem>>, %arg7: memref<1x128xf32, #tpu.memory_space<vmem>>, %arg8: memref<8x128xf32, #tpu.memory_space<vmem>>, %arg9: memref<8x128xf32, #tpu.memory_space<vmem>>, %arg10: memref<48x384xf32, #tpu.memory_space<vmem>>) attributes {dimension_semantics = [#tpu.dimension_semantics<arbitrary>], iteration_bounds = array<i64: 2>, scalar_prefetch = 0 : i64, scratch_operands = 2 : i64, tpu.core_type = #tpu.core_type<tc>, window_params = [{transform_indices = @transform_0, window_bounds = array<i64: 48, 16>}, {pipeline_mode = #tpu.pipeline_mode<synchronous>, transform_indices = @transform_1, window_bounds = array<i64: 16, 384>}, {pipeline_mode = #tpu.pipeline_mode<synchronous>, transform_indices = @transform_2, window_bounds = array<i64: 128, 384>}, {pipeline_mode = #tpu.pipeline_mode<synchronous>, transform_indices = @transform_3, window_bounds = array<i64: 1, 384>}, {pipeline_mode = #tpu.pipeline_mode<synchronous>, transform_indices = @transform_4, window_bounds = array<i64: 1, 128>}, {pipeline_mode = #tpu.pipeline_mode<synchronous>, transform_indices = @transform_5, window_bounds = array<i64: 128, 128>}, {pipeline_mode = #tpu.pipeline_mode<synchronous>, transform_indices = @transform_6, window_bounds = array<i64: 1, 128>}, {pipeline_mode = #tpu.pipeline_mode<synchronous>, transform_indices = @transform_7, window_bounds = array<i64: 8, 128>}]} {
    %c0_i32 = arith.constant 0 : i32
    %0 = arith.cmpi eq, %arg0, %c0_i32 : i32
    %1 = arith.extui %0 : i1 to i32
    %c0_i32_0 = arith.constant 0 : i32
    %2 = arith.cmpi ne, %1, %c0_i32_0 : i32
    scf.if %2 {
      %cst_17 = arith.constant 0.000000e+00 : f32
      %23 = vector.broadcast %cst_17 : f32 to vector<8x128xf32>
      %c0_18 = arith.constant 0 : index
      %c0_19 = arith.constant 0 : index
      %24 = vector.load %arg9[%c0_18, %c0_19] : memref<8x128xf32, #tpu.memory_space<vmem>>, vector<8x128xf32>
      tpu.vector_store %arg9[%c0_18, %c0_19], %23 {strides = array<i32>} : memref<8x128xf32, #tpu.memory_space<vmem>>, vector<8x128xf32>,
    } else {
    }
    %c0 = arith.constant 0 : index
    %c0_1 = arith.constant 0 : index
    %3 = vector.load %arg1[%c0, %c0_1] : memref<48x16xf32, #tpu.memory_space<vmem>>, vector<48x16xf32>
    %c0_2 = arith.constant 0 : index
    %c0_3 = arith.constant 0 : index
    %4 = vector.load %arg2[%c0_2, %c0_3] : memref<16x384xf32, #tpu.memory_space<vmem>>, vector<16x384xf32>
    %cst = arith.constant dense<0.000000e+00> : vector<48x384xf32>
    %5 = tpu.matmul %3, %4, %cst {dimension_numbers = #tpu.dot_dimension_numbers<[1], [0], [0], [1], [0, 0, 1, 1], [], []>} : vector<48x16xf32>, vector<16x384xf32>, vector<48x384xf32> -> vector<48x384xf32>
    %c0_4 = arith.constant 0 : index
    %c0_5 = arith.constant 0 : index
    %6 = vector.load %arg4[%c0_4, %c0_5] : memref<1x384xf32, #tpu.memory_space<vmem>>, vector<1x384xf32>
    %7 = vector.broadcast %6 : vector<1x384xf32> to vector<48x384xf32>
    %8 = arith.addf %5, %7 : vector<48x384xf32>
    %c0_6 = arith.constant 0 : index
    %c0_7 = arith.constant 0 : index
    %9 = vector.load %arg10[%c0_6, %c0_7] : memref<48x384xf32, #tpu.memory_space<vmem>>, vector<48x384xf32>
    tpu.vector_store %arg10[%c0_6, %c0_7], %8 {strides = array<i32>} : memref<48x384xf32, #tpu.memory_space<vmem>>, vector<48x384xf32>,
    %c0_8 = arith.constant 0 : index
    %c0_9 = arith.constant 0 : index
    %10 = vector.load %arg3[%c0_8, %c0_9] : memref<128x384xf32, #tpu.memory_space<vmem>>, vector<128x384xf32>
    %c0_10 = arith.constant 0 : index
    %c0_11 = arith.constant 0 : index
    %11 = vector.load %arg5[%c0_10, %c0_11] : memref<1x128xf32, #tpu.memory_space<vmem>>, vector<1x128xf32>
    %12 = vector.shape_cast %11 : vector<1x128xf32> to vector<1x128xf32>
    %13 = vector.broadcast %12 : vector<1x128xf32> to vector<8x128xf32>
    %c1_i32 = arith.constant 1 : i32
    %14 = arith.cmpi ne, %arg0, %c1_i32 : i32
    %15 = arith.extui %14 : i1 to i32
    %c0_i32_12 = arith.constant 0 : i32
    %16 = arith.cmpi ne, %15, %c0_i32_12 : i32
    scf.if %16 {
      %c0_17 = arith.constant 0 : index
      %c0_18 = arith.constant 0 : index
      %23 = vector.load %arg9[%c0_17, %c0_18] : memref<8x128xf32, #tpu.memory_space<vmem>>, vector<8x128xf32>
      %c0_i32_19 = arith.constant 0 : i32
      %c8_i32 = arith.constant 8 : i32
      %24 = arith.muli %c0_i32_19, %c8_i32 : i32
      %25 = tpu.assume_multiple %24, 8 : i32
      %26 = arith.index_cast %25 : i32 to index
      %c0_20 = arith.constant 0 : index
      %27 = vector.load %arg10[%26, %c0_20] : memref<48x384xf32, #tpu.memory_space<vmem>>, vector<8x384xf32>
      %cst_21 = arith.constant dense<0.000000e+00> : vector<8x384xf32>
      %28 = tpu.matmul %23, %10, %cst_21 {dimension_numbers = #tpu.dot_dimension_numbers<[1], [0], [0], [1], [0, 0, 1, 1], [], []>} : vector<8x128xf32>, vector<128x384xf32>, vector<8x384xf32> -> vector<8x384xf32>
      %29 = vector.extract_strided_slice %27 {offsets = [0, 0], sizes = [8, 128], strides = [1, 1]} : vector<8x384xf32> to vector<8x128xf32>
      %30 = vector.extract_strided_slice %28 {offsets = [0, 0], sizes = [8, 128], strides = [1, 1]} : vector<8x384xf32> to vector<8x128xf32>
      %31 = arith.addf %29, %30 : vector<8x128xf32>
      %32 = arith.negf %31 : vector<8x128xf32>
      %33 = math.exp %32 : vector<8x128xf32>
      %cst_22 = arith.constant 1.000000e+00 : f32
      %34 = vector.broadcast %cst_22 : f32 to vector<8x128xf32>
      %35 = arith.addf %34, %33 : vector<8x128xf32>
      %36 = arith.divf %34, %35 : vector<8x128xf32>
      %37 = vector.extract_strided_slice %27 {offsets = [0, 128], sizes = [8, 128], strides = [1, 1]} : vector<8x384xf32> to vector<8x128xf32>
      %38 = vector.extract_strided_slice %28 {offsets = [0, 128], sizes = [8, 128], strides = [1, 1]} : vector<8x384xf32> to vector<8x128xf32>
      %39 = arith.addf %37, %38 : vector<8x128xf32>
      %40 = arith.negf %39 : vector<8x128xf32>
      %41 = math.exp %40 : vector<8x128xf32>
      %cst_23 = arith.constant 1.000000e+00 : f32
      %42 = vector.broadcast %cst_23 : f32 to vector<8x128xf32>
      %43 = arith.addf %42, %41 : vector<8x128xf32>
      %44 = arith.divf %42, %43 : vector<8x128xf32>
      %45 = vector.extract_strided_slice %27 {offsets = [0, 256], sizes = [8, 128], strides = [1, 1]} : vector<8x384xf32> to vector<8x128xf32>
      %46 = vector.extract_strided_slice %28 {offsets = [0, 256], sizes = [8, 128], strides = [1, 1]} : vector<8x384xf32> to vector<8x128xf32>
      %47 = arith.addf %46, %13 : vector<8x128xf32>
      %48 = arith.mulf %36, %47 : vector<8x128xf32>
      %49 = arith.addf %45, %48 : vector<8x128xf32>
      %50 = math.tanh %49 : vector<8x128xf32>
      %51 = arith.subf %23, %50 : vector<8x128xf32>
      %52 = arith.mulf %44, %51 : vector<8x128xf32>
      %53 = arith.addf %50, %52 : vector<8x128xf32>
      %c1_i32_24 = arith.constant 1 : i32
      %c8_i32_25 = arith.constant 8 : i32
      %54 = arith.muli %c1_i32_24, %c8_i32_25 : i32
      %55 = tpu.assume_multiple %54, 8 : i32
      %56 = arith.index_cast %55 : i32 to index
      %c0_26 = arith.constant 0 : index
      %57 = vector.load %arg10[%56, %c0_26] : memref<48x384xf32, #tpu.memory_space<vmem>>, vector<8x384xf32>
      %cst_27 = arith.constant dense<0.000000e+00> : vector<8x384xf32>
      %58 = tpu.matmul %53, %10, %cst_27 {dimension_numbers = #tpu.dot_dimension_numbers<[1], [0], [0], [1], [0, 0, 1, 1], [], []>} : vector<8x128xf32>, vector<128x384xf32>, vector<8x384xf32> -> vector<8x384xf32>
      %59 = vector.extract_strided_slice %57 {offsets = [0, 0], sizes = [8, 128], strides = [1, 1]} : vector<8x384xf32> to vector<8x128xf32>
      %60 = vector.extract_strided_slice %58 {offsets = [0, 0], sizes = [8, 128], strides = [1, 1]} : vector<8x384xf32> to vector<8x128xf32>
      %61 = arith.addf %59, %60 : vector<8x128xf32>
      %62 = arith.negf %61 : vector<8x128xf32>
      %63 = math.exp %62 : vector<8x128xf32>
      %cst_28 = arith.constant 1.000000e+00 : f32
      %64 = vector.broadcast %cst_28 : f32 to vector<8x128xf32>
      %65 = arith.addf %64, %63 : vector<8x128xf32>
      %66 = arith.divf %64, %65 : vector<8x128xf32>
      %67 = vector.extract_strided_slice %57 {offsets = [0, 128], sizes = [8, 128], strides = [1, 1]} : vector<8x384xf32> to vector<8x128xf32>
      %68 = vector.extract_strided_slice %58 {offsets = [0, 128], sizes = [8, 128], strides = [1, 1]} : vector<8x384xf32> to vector<8x128xf32>
      %69 = arith.addf %67, %68 : vector<8x128xf32>
      %70 = arith.negf %69 : vector<8x128xf32>
      %71 = math.exp %70 : vector<8x128xf32>
      %cst_29 = arith.constant 1.000000e+00 : f32
      %72 = vector.broadcast %cst_29 : f32 to vector<8x128xf32>
      %73 = arith.addf %72, %71 : vector<8x128xf32>
      %74 = arith.divf %72, %73 : vector<8x128xf32>
      %75 = vector.extract_strided_slice %57 {offsets = [0, 256], sizes = [8, 128], strides = [1, 1]} : vector<8x384xf32> to vector<8x128xf32>
      %76 = vector.extract_strided_slice %58 {offsets = [0, 256], sizes = [8, 128], strides = [1, 1]} : vector<8x384xf32> to vector<8x128xf32>
      %77 = arith.addf %76, %13 : vector<8x128xf32>
      %78 = arith.mulf %66, %77 : vector<8x128xf32>
      %79 = arith.addf %75, %78 : vector<8x128xf32>
      %80 = math.tanh %79 : vector<8x128xf32>
      %81 = arith.subf %53, %80 : vector<8x128xf32>
      %82 = arith.mulf %74, %81 : vector<8x128xf32>
      %83 = arith.addf %80, %82 : vector<8x128xf32>
      %c2_i32 = arith.constant 2 : i32
      %c8_i32_30 = arith.constant 8 : i32
      %84 = arith.muli %c2_i32, %c8_i32_30 : i32
      %85 = tpu.assume_multiple %84, 8 : i32
      %86 = arith.index_cast %85 : i32 to index
      %c0_31 = arith.constant 0 : index
      %87 = vector.load %arg10[%86, %c0_31] : memref<48x384xf32, #tpu.memory_space<vmem>>, vector<8x384xf32>
      %cst_32 = arith.constant dense<0.000000e+00> : vector<8x384xf32>
      %88 = tpu.matmul %83, %10, %cst_32 {dimension_numbers = #tpu.dot_dimension_numbers<[1], [0], [0], [1], [0, 0, 1, 1], [], []>} : vector<8x128xf32>, vector<128x384xf32>, vector<8x384xf32> -> vector<8x384xf32>
      %89 = vector.extract_strided_slice %87 {offsets = [0, 0], sizes = [8, 128], strides = [1, 1]} : vector<8x384xf32> to vector<8x128xf32>
      %90 = vector.extract_strided_slice %88 {offsets = [0, 0], sizes = [8, 128], strides = [1, 1]} : vector<8x384xf32> to vector<8x128xf32>
      %91 = arith.addf %89, %90 : vector<8x128xf32>
      %92 = arith.negf %91 : vector<8x128xf32>
      %93 = math.exp %92 : vector<8x128xf32>
      %cst_33 = arith.constant 1.000000e+00 : f32
      %94 = vector.broadcast %cst_33 : f32 to vector<8x128xf32>
      %95 = arith.addf %94, %93 : vector<8x128xf32>
      %96 = arith.divf %94, %95 : vector<8x128xf32>
      %97 = vector.extract_strided_slice %87 {offsets = [0, 128], sizes = [8, 128], strides = [1, 1]} : vector<8x384xf32> to vector<8x128xf32>
      %98 = vector.extract_strided_slice %88 {offsets = [0, 128], sizes = [8, 128], strides = [1, 1]} : vector<8x384xf32> to vector<8x128xf32>
      %99 = arith.addf %97, %98 : vector<8x128xf32>
      %100 = arith.negf %99 : vector<8x128xf32>
      %101 = math.exp %100 : vector<8x128xf32>
      %cst_34 = arith.constant 1.000000e+00 : f32
      %102 = vector.broadcast %cst_34 : f32 to vector<8x128xf32>
      %103 = arith.addf %102, %101 : vector<8x128xf32>
      %104 = arith.divf %102, %103 : vector<8x128xf32>
      %105 = vector.extract_strided_slice %87 {offsets = [0, 256], sizes = [8, 128], strides = [1, 1]} : vector<8x384xf32> to vector<8x128xf32>
      %106 = vector.extract_strided_slice %88 {offsets = [0, 256], sizes = [8, 128], strides = [1, 1]} : vector<8x384xf32> to vector<8x128xf32>
      %107 = arith.addf %106, %13 : vector<8x128xf32>
      %108 = arith.mulf %96, %107 : vector<8x128xf32>
      %109 = arith.addf %105, %108 : vector<8x128xf32>
      %110 = math.tanh %109 : vector<8x128xf32>
      %111 = arith.subf %83, %110 : vector<8x128xf32>
      %112 = arith.mulf %104, %111 : vector<8x128xf32>
      %113 = arith.addf %110, %112 : vector<8x128xf32>
      %c3_i32 = arith.constant 3 : i32
      %c8_i32_35 = arith.constant 8 : i32
      %114 = arith.muli %c3_i32, %c8_i32_35 : i32
      %115 = tpu.assume_multiple %114, 8 : i32
      %116 = arith.index_cast %115 : i32 to index
      %c0_36 = arith.constant 0 : index
      %117 = vector.load %arg10[%116, %c0_36] : memref<48x384xf32, #tpu.memory_space<vmem>>, vector<8x384xf32>
      %cst_37 = arith.constant dense<0.000000e+00> : vector<8x384xf32>
      %118 = tpu.matmul %113, %10, %cst_37 {dimension_numbers = #tpu.dot_dimension_numbers<[1], [0], [0], [1], [0, 0, 1, 1], [], []>} : vector<8x128xf32>, vector<128x384xf32>, vector<8x384xf32> -> vector<8x384xf32>
      %119 = vector.extract_strided_slice %117 {offsets = [0, 0], sizes = [8, 128], strides = [1, 1]} : vector<8x384xf32> to vector<8x128xf32>
      %120 = vector.extract_strided_slice %118 {offsets = [0, 0], sizes = [8, 128], strides = [1, 1]} : vector<8x384xf32> to vector<8x128xf32>
      %121 = arith.addf %119, %120 : vector<8x128xf32>
      %122 = arith.negf %121 : vector<8x128xf32>
      %123 = math.exp %122 : vector<8x128xf32>
      %cst_38 = arith.constant 1.000000e+00 : f32
      %124 = vector.broadcast %cst_38 : f32 to vector<8x128xf32>
      %125 = arith.addf %124, %123 : vector<8x128xf32>
      %126 = arith.divf %124, %125 : vector<8x128xf32>
      %127 = vector.extract_strided_slice %117 {offsets = [0, 128], sizes = [8, 128], strides = [1, 1]} : vector<8x384xf32> to vector<8x128xf32>
      %128 = vector.extract_strided_slice %118 {offsets = [0, 128], sizes = [8, 128], strides = [1, 1]} : vector<8x384xf32> to vector<8x128xf32>
      %129 = arith.addf %127, %128 : vector<8x128xf32>
      %130 = arith.negf %129 : vector<8x128xf32>
      %131 = math.exp %130 : vector<8x128xf32>
      %cst_39 = arith.constant 1.000000e+00 : f32
      %132 = vector.broadcast %cst_39 : f32 to vector<8x128xf32>
      %133 = arith.addf %132, %131 : vector<8x128xf32>
      %134 = arith.divf %132, %133 : vector<8x128xf32>
      %135 = vector.extract_strided_slice %117 {offsets = [0, 256], sizes = [8, 128], strides = [1, 1]} : vector<8x384xf32> to vector<8x128xf32>
      %136 = vector.extract_strided_slice %118 {offsets = [0, 256], sizes = [8, 128], strides = [1, 1]} : vector<8x384xf32> to vector<8x128xf32>
      %137 = arith.addf %136, %13 : vector<8x128xf32>
      %138 = arith.mulf %126, %137 : vector<8x128xf32>
      %139 = arith.addf %135, %138 : vector<8x128xf32>
      %140 = math.tanh %139 : vector<8x128xf32>
      %141 = arith.subf %113, %140 : vector<8x128xf32>
      %142 = arith.mulf %134, %141 : vector<8x128xf32>
      %143 = arith.addf %140, %142 : vector<8x128xf32>
      %c4_i32 = arith.constant 4 : i32
      %c8_i32_40 = arith.constant 8 : i32
      %144 = arith.muli %c4_i32, %c8_i32_40 : i32
      %145 = tpu.assume_multiple %144, 8 : i32
      %146 = arith.index_cast %145 : i32 to index
      %c0_41 = arith.constant 0 : index
      %147 = vector.load %arg10[%146, %c0_41] : memref<48x384xf32, #tpu.memory_space<vmem>>, vector<8x384xf32>
      %cst_42 = arith.constant dense<0.000000e+00> : vector<8x384xf32>
      %148 = tpu.matmul %143, %10, %cst_42 {dimension_numbers = #tpu.dot_dimension_numbers<[1], [0], [0], [1], [0, 0, 1, 1], [], []>} : vector<8x128xf32>, vector<128x384xf32>, vector<8x384xf32> -> vector<8x384xf32>
      %149 = vector.extract_strided_slice %147 {offsets = [0, 0], sizes = [8, 128], strides = [1, 1]} : vector<8x384xf32> to vector<8x128xf32>
      %150 = vector.extract_strided_slice %148 {offsets = [0, 0], sizes = [8, 128], strides = [1, 1]} : vector<8x384xf32> to vector<8x128xf32>
      %151 = arith.addf %149, %150 : vector<8x128xf32>
      %152 = arith.negf %151 : vector<8x128xf32>
      %153 = math.exp %152 : vector<8x128xf32>
      %cst_43 = arith.constant 1.000000e+00 : f32
      %154 = vector.broadcast %cst_43 : f32 to vector<8x128xf32>
      %155 = arith.addf %154, %153 : vector<8x128xf32>
      %156 = arith.divf %154, %155 : vector<8x128xf32>
      %157 = vector.extract_strided_slice %147 {offsets = [0, 128], sizes = [8, 128], strides = [1, 1]} : vector<8x384xf32> to vector<8x128xf32>
      %158 = vector.extract_strided_slice %148 {offsets = [0, 128], sizes = [8, 128], strides = [1, 1]} : vector<8x384xf32> to vector<8x128xf32>
      %159 = arith.addf %157, %158 : vector<8x128xf32>
      %160 = arith.negf %159 : vector<8x128xf32>
      %161 = math.exp %160 : vector<8x128xf32>
      %cst_44 = arith.constant 1.000000e+00 : f32
      %162 = vector.broadcast %cst_44 : f32 to vector<8x128xf32>
      %163 = arith.addf %162, %161 : vector<8x128xf32>
      %164 = arith.divf %162, %163 : vector<8x128xf32>
      %165 = vector.extract_strided_slice %147 {offsets = [0, 256], sizes = [8, 128], strides = [1, 1]} : vector<8x384xf32> to vector<8x128xf32>
      %166 = vector.extract_strided_slice %148 {offsets = [0, 256], sizes = [8, 128], strides = [1, 1]} : vector<8x384xf32> to vector<8x128xf32>
      %167 = arith.addf %166, %13 : vector<8x128xf32>
      %168 = arith.mulf %156, %167 : vector<8x128xf32>
      %169 = arith.addf %165, %168 : vector<8x128xf32>
      %170 = math.tanh %169 : vector<8x128xf32>
      %171 = arith.subf %143, %170 : vector<8x128xf32>
      %172 = arith.mulf %164, %171 : vector<8x128xf32>
      %173 = arith.addf %170, %172 : vector<8x128xf32>
      %c5_i32 = arith.constant 5 : i32
      %c8_i32_45 = arith.constant 8 : i32
      %174 = arith.muli %c5_i32, %c8_i32_45 : i32
      %175 = tpu.assume_multiple %174, 8 : i32
      %176 = arith.index_cast %175 : i32 to index
      %c0_46 = arith.constant 0 : index
      %177 = vector.load %arg10[%176, %c0_46] : memref<48x384xf32, #tpu.memory_space<vmem>>, vector<8x384xf32>
      %cst_47 = arith.constant dense<0.000000e+00> : vector<8x384xf32>
      %178 = tpu.matmul %173, %10, %cst_47 {dimension_numbers = #tpu.dot_dimension_numbers<[1], [0], [0], [1], [0, 0, 1, 1], [], []>} : vector<8x128xf32>, vector<128x384xf32>, vector<8x384xf32> -> vector<8x384xf32>
      %179 = vector.extract_strided_slice %177 {offsets = [0, 0], sizes = [8, 128], strides = [1, 1]} : vector<8x384xf32> to vector<8x128xf32>
      %180 = vector.extract_strided_slice %178 {offsets = [0, 0], sizes = [8, 128], strides = [1, 1]} : vector<8x384xf32> to vector<8x128xf32>
      %181 = arith.addf %179, %180 : vector<8x128xf32>
      %182 = arith.negf %181 : vector<8x128xf32>
      %183 = math.exp %182 : vector<8x128xf32>
      %cst_48 = arith.constant 1.000000e+00 : f32
      %184 = vector.broadcast %cst_48 : f32 to vector<8x128xf32>
      %185 = arith.addf %184, %183 : vector<8x128xf32>
      %186 = arith.divf %184, %185 : vector<8x128xf32>
      %187 = vector.extract_strided_slice %177 {offsets = [0, 128], sizes = [8, 128], strides = [1, 1]} : vector<8x384xf32> to vector<8x128xf32>
      %188 = vector.extract_strided_slice %178 {offsets = [0, 128], sizes = [8, 128], strides = [1, 1]} : vector<8x384xf32> to vector<8x128xf32>
      %189 = arith.addf %187, %188 : vector<8x128xf32>
      %190 = arith.negf %189 : vector<8x128xf32>
      %191 = math.exp %190 : vector<8x128xf32>
      %cst_49 = arith.constant 1.000000e+00 : f32
      %192 = vector.broadcast %cst_49 : f32 to vector<8x128xf32>
      %193 = arith.addf %192, %191 : vector<8x128xf32>
      %194 = arith.divf %192, %193 : vector<8x128xf32>
      %195 = vector.extract_strided_slice %177 {offsets = [0, 256], sizes = [8, 128], strides = [1, 1]} : vector<8x384xf32> to vector<8x128xf32>
      %196 = vector.extract_strided_slice %178 {offsets = [0, 256], sizes = [8, 128], strides = [1, 1]} : vector<8x384xf32> to vector<8x128xf32>
      %197 = arith.addf %196, %13 : vector<8x128xf32>
      %198 = arith.mulf %186, %197 : vector<8x128xf32>
      %199 = arith.addf %195, %198 : vector<8x128xf32>
      %200 = math.tanh %199 : vector<8x128xf32>
      %201 = arith.subf %173, %200 : vector<8x128xf32>
      %202 = arith.mulf %194, %201 : vector<8x128xf32>
      %203 = arith.addf %200, %202 : vector<8x128xf32>
      %c6_i32 = arith.constant 6 : i32
      %c0_50 = arith.constant 0 : index
      %c0_51 = arith.constant 0 : index
      %204 = vector.load %arg9[%c0_50, %c0_51] : memref<8x128xf32, #tpu.memory_space<vmem>>, vector<8x128xf32>
      tpu.vector_store %arg9[%c0_50, %c0_51], %203 {strides = array<i32>} : memref<8x128xf32, #tpu.memory_space<vmem>>, vector<8x128xf32>,
    } else {
    }
    %c1_i32_13 = arith.constant 1 : i32
    %17 = arith.cmpi eq, %arg0, %c1_i32_13 : i32
    %18 = arith.extui %17 : i1 to i32
    %c0_i32_14 = arith.constant 0 : i32
    %19 = arith.cmpi ne, %18, %c0_i32_14 : i32
    scf.if %19 {
      %c0_17 = arith.constant 0 : index
      %c0_18 = arith.constant 0 : index
      %23 = vector.load %arg9[%c0_17, %c0_18] : memref<8x128xf32, #tpu.memory_space<vmem>>, vector<8x128xf32>
      %c0_i32_19 = arith.constant 0 : i32
      %c8_i32 = arith.constant 8 : i32
      %24 = arith.muli %c0_i32_19, %c8_i32 : i32
      %25 = tpu.assume_multiple %24, 8 : i32
      %26 = arith.index_cast %25 : i32 to index
      %c0_20 = arith.constant 0 : index
      %27 = vector.load %arg10[%26, %c0_20] : memref<48x384xf32, #tpu.memory_space<vmem>>, vector<8x384xf32>
      %cst_21 = arith.constant dense<0.000000e+00> : vector<8x384xf32>
      %28 = tpu.matmul %23, %10, %cst_21 {dimension_numbers = #tpu.dot_dimension_numbers<[1], [0], [0], [1], [0, 0, 1, 1], [], []>} : vector<8x128xf32>, vector<128x384xf32>, vector<8x384xf32> -> vector<8x384xf32>
      %29 = vector.extract_strided_slice %27 {offsets = [0, 0], sizes = [8, 128], strides = [1, 1]} : vector<8x384xf32> to vector<8x128xf32>
      %30 = vector.extract_strided_slice %28 {offsets = [0, 0], sizes = [8, 128], strides = [1, 1]} : vector<8x384xf32> to vector<8x128xf32>
      %31 = arith.addf %29, %30 : vector<8x128xf32>
      %32 = arith.negf %31 : vector<8x128xf32>
      %33 = math.exp %32 : vector<8x128xf32>
      %cst_22 = arith.constant 1.000000e+00 : f32
      %34 = vector.broadcast %cst_22 : f32 to vector<8x128xf32>
      %35 = arith.addf %34, %33 : vector<8x128xf32>
      %36 = arith.divf %34, %35 : vector<8x128xf32>
      %37 = vector.extract_strided_slice %27 {offsets = [0, 128], sizes = [8, 128], strides = [1, 1]} : vector<8x384xf32> to vector<8x128xf32>
      %38 = vector.extract_strided_slice %28 {offsets = [0, 128], sizes = [8, 128], strides = [1, 1]} : vector<8x384xf32> to vector<8x128xf32>
      %39 = arith.addf %37, %38 : vector<8x128xf32>
      %40 = arith.negf %39 : vector<8x128xf32>
      %41 = math.exp %40 : vector<8x128xf32>
      %cst_23 = arith.constant 1.000000e+00 : f32
      %42 = vector.broadcast %cst_23 : f32 to vector<8x128xf32>
      %43 = arith.addf %42, %41 : vector<8x128xf32>
      %44 = arith.divf %42, %43 : vector<8x128xf32>
      %45 = vector.extract_strided_slice %27 {offsets = [0, 256], sizes = [8, 128], strides = [1, 1]} : vector<8x384xf32> to vector<8x128xf32>
      %46 = vector.extract_strided_slice %28 {offsets = [0, 256], sizes = [8, 128], strides = [1, 1]} : vector<8x384xf32> to vector<8x128xf32>
      %47 = arith.addf %46, %13 : vector<8x128xf32>
      %48 = arith.mulf %36, %47 : vector<8x128xf32>
      %49 = arith.addf %45, %48 : vector<8x128xf32>
      %50 = math.tanh %49 : vector<8x128xf32>
      %51 = arith.subf %23, %50 : vector<8x128xf32>
      %52 = arith.mulf %44, %51 : vector<8x128xf32>
      %53 = arith.addf %50, %52 : vector<8x128xf32>
      %c6_i32 = arith.constant 6 : i32
      %54 = arith.muli %arg0, %c6_i32 : i32
      %55 = arith.addi %54, %c0_i32_19 : i32
      %c8_i32_24 = arith.constant 8 : i32
      %56 = arith.cmpi slt, %55, %c8_i32_24 : i32
      %57 = arith.select %56, %53, %23 : vector<8x128xf32>
      %c1_i32_25 = arith.constant 1 : i32
      %c8_i32_26 = arith.constant 8 : i32
      %58 = arith.muli %c1_i32_25, %c8_i32_26 : i32
      %59 = tpu.assume_multiple %58, 8 : i32
      %60 = arith.index_cast %59 : i32 to index
      %c0_27 = arith.constant 0 : index
      %61 = vector.load %arg10[%60, %c0_27] : memref<48x384xf32, #tpu.memory_space<vmem>>, vector<8x384xf32>
      %cst_28 = arith.constant dense<0.000000e+00> : vector<8x384xf32>
      %62 = tpu.matmul %57, %10, %cst_28 {dimension_numbers = #tpu.dot_dimension_numbers<[1], [0], [0], [1], [0, 0, 1, 1], [], []>} : vector<8x128xf32>, vector<128x384xf32>, vector<8x384xf32> -> vector<8x384xf32>
      %63 = vector.extract_strided_slice %61 {offsets = [0, 0], sizes = [8, 128], strides = [1, 1]} : vector<8x384xf32> to vector<8x128xf32>
      %64 = vector.extract_strided_slice %62 {offsets = [0, 0], sizes = [8, 128], strides = [1, 1]} : vector<8x384xf32> to vector<8x128xf32>
      %65 = arith.addf %63, %64 : vector<8x128xf32>
      %66 = arith.negf %65 : vector<8x128xf32>
      %67 = math.exp %66 : vector<8x128xf32>
      %cst_29 = arith.constant 1.000000e+00 : f32
      %68 = vector.broadcast %cst_29 : f32 to vector<8x128xf32>
      %69 = arith.addf %68, %67 : vector<8x128xf32>
      %70 = arith.divf %68, %69 : vector<8x128xf32>
      %71 = vector.extract_strided_slice %61 {offsets = [0, 128], sizes = [8, 128], strides = [1, 1]} : vector<8x384xf32> to vector<8x128xf32>
      %72 = vector.extract_strided_slice %62 {offsets = [0, 128], sizes = [8, 128], strides = [1, 1]} : vector<8x384xf32> to vector<8x128xf32>
      %73 = arith.addf %71, %72 : vector<8x128xf32>
      %74 = arith.negf %73 : vector<8x128xf32>
      %75 = math.exp %74 : vector<8x128xf32>
      %cst_30 = arith.constant 1.000000e+00 : f32
      %76 = vector.broadcast %cst_30 : f32 to vector<8x128xf32>
      %77 = arith.addf %76, %75 : vector<8x128xf32>
      %78 = arith.divf %76, %77 : vector<8x128xf32>
      %79 = vector.extract_strided_slice %61 {offsets = [0, 256], sizes = [8, 128], strides = [1, 1]} : vector<8x384xf32> to vector<8x128xf32>
      %80 = vector.extract_strided_slice %62 {offsets = [0, 256], sizes = [8, 128], strides = [1, 1]} : vector<8x384xf32> to vector<8x128xf32>
      %81 = arith.addf %80, %13 : vector<8x128xf32>
      %82 = arith.mulf %70, %81 : vector<8x128xf32>
      %83 = arith.addf %79, %82 : vector<8x128xf32>
      %84 = math.tanh %83 : vector<8x128xf32>
      %85 = arith.subf %57, %84 : vector<8x128xf32>
      %86 = arith.mulf %78, %85 : vector<8x128xf32>
      %87 = arith.addf %84, %86 : vector<8x128xf32>
      %c6_i32_31 = arith.constant 6 : i32
      %88 = arith.muli %arg0, %c6_i32_31 : i32
      %89 = arith.addi %88, %c1_i32_25 : i32
      %c8_i32_32 = arith.constant 8 : i32
      %90 = arith.cmpi slt, %89, %c8_i32_32 : i32
      %91 = arith.select %90, %87, %57 : vector<8x128xf32>
      %c2_i32 = arith.constant 2 : i32
      %c8_i32_33 = arith.constant 8 : i32
      %92 = arith.muli %c2_i32, %c8_i32_33 : i32
      %93 = tpu.assume_multiple %92, 8 : i32
      %94 = arith.index_cast %93 : i32 to index
      %c0_34 = arith.constant 0 : index
      %95 = vector.load %arg10[%94, %c0_34] : memref<48x384xf32, #tpu.memory_space<vmem>>, vector<8x384xf32>
      %cst_35 = arith.constant dense<0.000000e+00> : vector<8x384xf32>
      %96 = tpu.matmul %91, %10, %cst_35 {dimension_numbers = #tpu.dot_dimension_numbers<[1], [0], [0], [1], [0, 0, 1, 1], [], []>} : vector<8x128xf32>, vector<128x384xf32>, vector<8x384xf32> -> vector<8x384xf32>
      %97 = vector.extract_strided_slice %95 {offsets = [0, 0], sizes = [8, 128], strides = [1, 1]} : vector<8x384xf32> to vector<8x128xf32>
      %98 = vector.extract_strided_slice %96 {offsets = [0, 0], sizes = [8, 128], strides = [1, 1]} : vector<8x384xf32> to vector<8x128xf32>
      %99 = arith.addf %97, %98 : vector<8x128xf32>
      %100 = arith.negf %99 : vector<8x128xf32>
      %101 = math.exp %100 : vector<8x128xf32>
      %cst_36 = arith.constant 1.000000e+00 : f32
      %102 = vector.broadcast %cst_36 : f32 to vector<8x128xf32>
      %103 = arith.addf %102, %101 : vector<8x128xf32>
      %104 = arith.divf %102, %103 : vector<8x128xf32>
      %105 = vector.extract_strided_slice %95 {offsets = [0, 128], sizes = [8, 128], strides = [1, 1]} : vector<8x384xf32> to vector<8x128xf32>
      %106 = vector.extract_strided_slice %96 {offsets = [0, 128], sizes = [8, 128], strides = [1, 1]} : vector<8x384xf32> to vector<8x128xf32>
      %107 = arith.addf %105, %106 : vector<8x128xf32>
      %108 = arith.negf %107 : vector<8x128xf32>
      %109 = math.exp %108 : vector<8x128xf32>
      %cst_37 = arith.constant 1.000000e+00 : f32
      %110 = vector.broadcast %cst_37 : f32 to vector<8x128xf32>
      %111 = arith.addf %110, %109 : vector<8x128xf32>
      %112 = arith.divf %110, %111 : vector<8x128xf32>
      %113 = vector.extract_strided_slice %95 {offsets = [0, 256], sizes = [8, 128], strides = [1, 1]} : vector<8x384xf32> to vector<8x128xf32>
      %114 = vector.extract_strided_slice %96 {offsets = [0, 256], sizes = [8, 128], strides = [1, 1]} : vector<8x384xf32> to vector<8x128xf32>
      %115 = arith.addf %114, %13 : vector<8x128xf32>
      %116 = arith.mulf %104, %115 : vector<8x128xf32>
      %117 = arith.addf %113, %116 : vector<8x128xf32>
      %118 = math.tanh %117 : vector<8x128xf32>
      %119 = arith.subf %91, %118 : vector<8x128xf32>
      %120 = arith.mulf %112, %119 : vector<8x128xf32>
      %121 = arith.addf %118, %120 : vector<8x128xf32>
      %c6_i32_38 = arith.constant 6 : i32
      %122 = arith.muli %arg0, %c6_i32_38 : i32
      %123 = arith.addi %122, %c2_i32 : i32
      %c8_i32_39 = arith.constant 8 : i32
      %124 = arith.cmpi slt, %123, %c8_i32_39 : i32
      %125 = arith.select %124, %121, %91 : vector<8x128xf32>
      %c3_i32 = arith.constant 3 : i32
      %c8_i32_40 = arith.constant 8 : i32
      %126 = arith.muli %c3_i32, %c8_i32_40 : i32
      %127 = tpu.assume_multiple %126, 8 : i32
      %128 = arith.index_cast %127 : i32 to index
      %c0_41 = arith.constant 0 : index
      %129 = vector.load %arg10[%128, %c0_41] : memref<48x384xf32, #tpu.memory_space<vmem>>, vector<8x384xf32>
      %cst_42 = arith.constant dense<0.000000e+00> : vector<8x384xf32>
      %130 = tpu.matmul %125, %10, %cst_42 {dimension_numbers = #tpu.dot_dimension_numbers<[1], [0], [0], [1], [0, 0, 1, 1], [], []>} : vector<8x128xf32>, vector<128x384xf32>, vector<8x384xf32> -> vector<8x384xf32>
      %131 = vector.extract_strided_slice %129 {offsets = [0, 0], sizes = [8, 128], strides = [1, 1]} : vector<8x384xf32> to vector<8x128xf32>
      %132 = vector.extract_strided_slice %130 {offsets = [0, 0], sizes = [8, 128], strides = [1, 1]} : vector<8x384xf32> to vector<8x128xf32>
      %133 = arith.addf %131, %132 : vector<8x128xf32>
      %134 = arith.negf %133 : vector<8x128xf32>
      %135 = math.exp %134 : vector<8x128xf32>
      %cst_43 = arith.constant 1.000000e+00 : f32
      %136 = vector.broadcast %cst_43 : f32 to vector<8x128xf32>
      %137 = arith.addf %136, %135 : vector<8x128xf32>
      %138 = arith.divf %136, %137 : vector<8x128xf32>
      %139 = vector.extract_strided_slice %129 {offsets = [0, 128], sizes = [8, 128], strides = [1, 1]} : vector<8x384xf32> to vector<8x128xf32>
      %140 = vector.extract_strided_slice %130 {offsets = [0, 128], sizes = [8, 128], strides = [1, 1]} : vector<8x384xf32> to vector<8x128xf32>
      %141 = arith.addf %139, %140 : vector<8x128xf32>
      %142 = arith.negf %141 : vector<8x128xf32>
      %143 = math.exp %142 : vector<8x128xf32>
      %cst_44 = arith.constant 1.000000e+00 : f32
      %144 = vector.broadcast %cst_44 : f32 to vector<8x128xf32>
      %145 = arith.addf %144, %143 : vector<8x128xf32>
      %146 = arith.divf %144, %145 : vector<8x128xf32>
      %147 = vector.extract_strided_slice %129 {offsets = [0, 256], sizes = [8, 128], strides = [1, 1]} : vector<8x384xf32> to vector<8x128xf32>
      %148 = vector.extract_strided_slice %130 {offsets = [0, 256], sizes = [8, 128], strides = [1, 1]} : vector<8x384xf32> to vector<8x128xf32>
      %149 = arith.addf %148, %13 : vector<8x128xf32>
      %150 = arith.mulf %138, %149 : vector<8x128xf32>
      %151 = arith.addf %147, %150 : vector<8x128xf32>
      %152 = math.tanh %151 : vector<8x128xf32>
      %153 = arith.subf %125, %152 : vector<8x128xf32>
      %154 = arith.mulf %146, %153 : vector<8x128xf32>
      %155 = arith.addf %152, %154 : vector<8x128xf32>
      %c6_i32_45 = arith.constant 6 : i32
      %156 = arith.muli %arg0, %c6_i32_45 : i32
      %157 = arith.addi %156, %c3_i32 : i32
      %c8_i32_46 = arith.constant 8 : i32
      %158 = arith.cmpi slt, %157, %c8_i32_46 : i32
      %159 = arith.select %158, %155, %125 : vector<8x128xf32>
      %c4_i32 = arith.constant 4 : i32
      %c8_i32_47 = arith.constant 8 : i32
      %160 = arith.muli %c4_i32, %c8_i32_47 : i32
      %161 = tpu.assume_multiple %160, 8 : i32
      %162 = arith.index_cast %161 : i32 to index
      %c0_48 = arith.constant 0 : index
      %163 = vector.load %arg10[%162, %c0_48] : memref<48x384xf32, #tpu.memory_space<vmem>>, vector<8x384xf32>
      %cst_49 = arith.constant dense<0.000000e+00> : vector<8x384xf32>
      %164 = tpu.matmul %159, %10, %cst_49 {dimension_numbers = #tpu.dot_dimension_numbers<[1], [0], [0], [1], [0, 0, 1, 1], [], []>} : vector<8x128xf32>, vector<128x384xf32>, vector<8x384xf32> -> vector<8x384xf32>
      %165 = vector.extract_strided_slice %163 {offsets = [0, 0], sizes = [8, 128], strides = [1, 1]} : vector<8x384xf32> to vector<8x128xf32>
      %166 = vector.extract_strided_slice %164 {offsets = [0, 0], sizes = [8, 128], strides = [1, 1]} : vector<8x384xf32> to vector<8x128xf32>
      %167 = arith.addf %165, %166 : vector<8x128xf32>
      %168 = arith.negf %167 : vector<8x128xf32>
      %169 = math.exp %168 : vector<8x128xf32>
      %cst_50 = arith.constant 1.000000e+00 : f32
      %170 = vector.broadcast %cst_50 : f32 to vector<8x128xf32>
      %171 = arith.addf %170, %169 : vector<8x128xf32>
      %172 = arith.divf %170, %171 : vector<8x128xf32>
      %173 = vector.extract_strided_slice %163 {offsets = [0, 128], sizes = [8, 128], strides = [1, 1]} : vector<8x384xf32> to vector<8x128xf32>
      %174 = vector.extract_strided_slice %164 {offsets = [0, 128], sizes = [8, 128], strides = [1, 1]} : vector<8x384xf32> to vector<8x128xf32>
      %175 = arith.addf %173, %174 : vector<8x128xf32>
      %176 = arith.negf %175 : vector<8x128xf32>
      %177 = math.exp %176 : vector<8x128xf32>
      %cst_51 = arith.constant 1.000000e+00 : f32
      %178 = vector.broadcast %cst_51 : f32 to vector<8x128xf32>
      %179 = arith.addf %178, %177 : vector<8x128xf32>
      %180 = arith.divf %178, %179 : vector<8x128xf32>
      %181 = vector.extract_strided_slice %163 {offsets = [0, 256], sizes = [8, 128], strides = [1, 1]} : vector<8x384xf32> to vector<8x128xf32>
      %182 = vector.extract_strided_slice %164 {offsets = [0, 256], sizes = [8, 128], strides = [1, 1]} : vector<8x384xf32> to vector<8x128xf32>
      %183 = arith.addf %182, %13 : vector<8x128xf32>
      %184 = arith.mulf %172, %183 : vector<8x128xf32>
      %185 = arith.addf %181, %184 : vector<8x128xf32>
      %186 = math.tanh %185 : vector<8x128xf32>
      %187 = arith.subf %159, %186 : vector<8x128xf32>
      %188 = arith.mulf %180, %187 : vector<8x128xf32>
      %189 = arith.addf %186, %188 : vector<8x128xf32>
      %c6_i32_52 = arith.constant 6 : i32
      %190 = arith.muli %arg0, %c6_i32_52 : i32
      %191 = arith.addi %190, %c4_i32 : i32
      %c8_i32_53 = arith.constant 8 : i32
      %192 = arith.cmpi slt, %191, %c8_i32_53 : i32
      %193 = arith.select %192, %189, %159 : vector<8x128xf32>
      %c5_i32 = arith.constant 5 : i32
      %c8_i32_54 = arith.constant 8 : i32
      %194 = arith.muli %c5_i32, %c8_i32_54 : i32
      %195 = tpu.assume_multiple %194, 8 : i32
      %196 = arith.index_cast %195 : i32 to index
      %c0_55 = arith.constant 0 : index
      %197 = vector.load %arg10[%196, %c0_55] : memref<48x384xf32, #tpu.memory_space<vmem>>, vector<8x384xf32>
      %cst_56 = arith.constant dense<0.000000e+00> : vector<8x384xf32>
      %198 = tpu.matmul %193, %10, %cst_56 {dimension_numbers = #tpu.dot_dimension_numbers<[1], [0], [0], [1], [0, 0, 1, 1], [], []>} : vector<8x128xf32>, vector<128x384xf32>, vector<8x384xf32> -> vector<8x384xf32>
      %199 = vector.extract_strided_slice %197 {offsets = [0, 0], sizes = [8, 128], strides = [1, 1]} : vector<8x384xf32> to vector<8x128xf32>
      %200 = vector.extract_strided_slice %198 {offsets = [0, 0], sizes = [8, 128], strides = [1, 1]} : vector<8x384xf32> to vector<8x128xf32>
      %201 = arith.addf %199, %200 : vector<8x128xf32>
      %202 = arith.negf %201 : vector<8x128xf32>
      %203 = math.exp %202 : vector<8x128xf32>
      %cst_57 = arith.constant 1.000000e+00 : f32
      %204 = vector.broadcast %cst_57 : f32 to vector<8x128xf32>
      %205 = arith.addf %204, %203 : vector<8x128xf32>
      %206 = arith.divf %204, %205 : vector<8x128xf32>
      %207 = vector.extract_strided_slice %197 {offsets = [0, 128], sizes = [8, 128], strides = [1, 1]} : vector<8x384xf32> to vector<8x128xf32>
      %208 = vector.extract_strided_slice %198 {offsets = [0, 128], sizes = [8, 128], strides = [1, 1]} : vector<8x384xf32> to vector<8x128xf32>
      %209 = arith.addf %207, %208 : vector<8x128xf32>
      %210 = arith.negf %209 : vector<8x128xf32>
      %211 = math.exp %210 : vector<8x128xf32>
      %cst_58 = arith.constant 1.000000e+00 : f32
      %212 = vector.broadcast %cst_58 : f32 to vector<8x128xf32>
      %213 = arith.addf %212, %211 : vector<8x128xf32>
      %214 = arith.divf %212, %213 : vector<8x128xf32>
      %215 = vector.extract_strided_slice %197 {offsets = [0, 256], sizes = [8, 128], strides = [1, 1]} : vector<8x384xf32> to vector<8x128xf32>
      %216 = vector.extract_strided_slice %198 {offsets = [0, 256], sizes = [8, 128], strides = [1, 1]} : vector<8x384xf32> to vector<8x128xf32>
      %217 = arith.addf %216, %13 : vector<8x128xf32>
      %218 = arith.mulf %206, %217 : vector<8x128xf32>
      %219 = arith.addf %215, %218 : vector<8x128xf32>
      %220 = math.tanh %219 : vector<8x128xf32>
      %221 = arith.subf %193, %220 : vector<8x128xf32>
      %222 = arith.mulf %214, %221 : vector<8x128xf32>
      %223 = arith.addf %220, %222 : vector<8x128xf32>
      %c6_i32_59 = arith.constant 6 : i32
      %224 = arith.muli %arg0, %c6_i32_59 : i32
      %225 = arith.addi %224, %c5_i32 : i32
      %c8_i32_60 = arith.constant 8 : i32
      %226 = arith.cmpi slt, %225, %c8_i32_60 : i32
      %227 = arith.select %226, %223, %193 : vector<8x128xf32>
      %c6_i32_61 = arith.constant 6 : i32
      %c0_62 = arith.constant 0 : index
      %c0_63 = arith.constant 0 : index
      %228 = vector.load %arg9[%c0_62, %c0_63] : memref<8x128xf32, #tpu.memory_space<vmem>>, vector<8x128xf32>
      tpu.vector_store %arg9[%c0_62, %c0_63], %227 {strides = array<i32>} : memref<8x128xf32, #tpu.memory_space<vmem>>, vector<8x128xf32>,
    } else {
    }
    %c1_i32_15 = arith.constant 1 : i32
    %20 = arith.cmpi eq, %arg0, %c1_i32_15 : i32
    %21 = arith.extui %20 : i1 to i32
    %c0_i32_16 = arith.constant 0 : i32
    %22 = arith.cmpi ne, %21, %c0_i32_16 : i32
    scf.if %22 {
      %c0_17 = arith.constant 0 : index
      %c0_18 = arith.constant 0 : index
      %23 = vector.load %arg9[%c0_17, %c0_18] : memref<8x128xf32, #tpu.memory_space<vmem>>, vector<8x128xf32>
      %c0_19 = arith.constant 0 : index
      %c0_20 = arith.constant 0 : index
      %24 = vector.load %arg6[%c0_19, %c0_20] : memref<128x128xf32, #tpu.memory_space<vmem>>, vector<128x128xf32>
      %cst_21 = arith.constant dense<0.000000e+00> : vector<8x128xf32>
      %25 = tpu.matmul %23, %24, %cst_21 {dimension_numbers = #tpu.dot_dimension_numbers<[1], [0], [0], [1], [0, 0, 1, 1], [], []>} : vector<8x128xf32>, vector<128x128xf32>, vector<8x128xf32> -> vector<8x128xf32>
      %c0_22 = arith.constant 0 : index
      %c0_23 = arith.constant 0 : index
      %26 = vector.load %arg7[%c0_22, %c0_23] : memref<1x128xf32, #tpu.memory_space<vmem>>, vector<1x128xf32>
      %27 = vector.broadcast %26 : vector<1x128xf32> to vector<8x128xf32>
      %28 = arith.addf %25, %27 : vector<8x128xf32>
      %29 = arith.negf %28 : vector<8x128xf32>
      %30 = math.exp %29 : vector<8x128xf32>
      %cst_24 = arith.constant 1.000000e+00 : f32
      %31 = vector.broadcast %cst_24 : f32 to vector<8x128xf32>
      %32 = arith.addf %31, %30 : vector<8x128xf32>
      %33 = arith.divf %31, %32 : vector<8x128xf32>
      %c0_25 = arith.constant 0 : index
      %c0_26 = arith.constant 0 : index
      %34 = vector.load %arg8[%c0_25, %c0_26] : memref<8x128xf32, #tpu.memory_space<vmem>>, vector<8x128xf32>
      tpu.vector_store %arg8[%c0_25, %c0_26], %33 {strides = array<i32>} : memref<8x128xf32, #tpu.memory_space<vmem>>, vector<8x128xf32>,
    } else {
    }
    return
  }
  func.func @transform_0(%arg0: i32) -> (i32, i32) {
    %c0_i32 = arith.constant 0 : i32
    %c0_i32_0 = arith.constant 0 : i32
    return %arg0, %c0_i32 : i32, i32
  }
  func.func @transform_1(%arg0: i32) -> (i32, i32) {
    %c0_i32 = arith.constant 0 : i32
    %c0_i32_0 = arith.constant 0 : i32
    %c0_i32_1 = arith.constant 0 : i32
    return %c0_i32, %c0_i32_0 : i32, i32
  }
  func.func @transform_2(%arg0: i32) -> (i32, i32) {
    %c0_i32 = arith.constant 0 : i32
    %c0_i32_0 = arith.constant 0 : i32
    %c0_i32_1 = arith.constant 0 : i32
    return %c0_i32, %c0_i32_0 : i32, i32
  }
  func.func @transform_3(%arg0: i32) -> (i32, i32) {
    %c0_i32 = arith.constant 0 : i32
    %c0_i32_0 = arith.constant 0 : i32
    %c0_i32_1 = arith.constant 0 : i32
    return %c0_i32, %c0_i32_0 : i32, i32
  }
  func.func @transform_4(%arg0: i32) -> (i32, i32) {
    %c0_i32 = arith.constant 0 : i32
    %c0_i32_0 = arith.constant 0 : i32
    %c0_i32_1 = arith.constant 0 : i32
    return %c0_i32, %c0_i32_0 : i32, i32
  }
  func.func @transform_5(%arg0: i32) -> (i32, i32) {
    %c0_i32 = arith.constant 0 : i32
    %c0_i32_0 = arith.constant 0 : i32
    %c0_i32_1 = arith.constant 0 : i32
    return %c0_i32, %c0_i32_0 : i32, i32
  }
  func.func @transform_6(%arg0: i32) -> (i32, i32) {
    %c0_i32 = arith.constant 0 : i32
    %c0_i32_0 = arith.constant 0 : i32
    %c0_i32_1 = arith.constant 0 : i32
    return %c0_i32, %c0_i32_0 : i32, i32
  }
  func.func @transform_7(%arg0: i32) -> (i32, i32) {
    %c0_i32 = arith.constant 0 : i32
    %c0_i32_0 = arith.constant 0 : i32
    %c0_i32_1 = arith.constant 0 : i32
    return %c0_i32, %c0_i32_0 : i32, i32
  }
}

</mosaic_0001>

<bundles_post_ra>
// kernel: tpu_custom_call.1
= control target key start
LH: loop header
LB: loop body
LE: loop exit
PB: predicated region body
PF: predicated region fallthrough
CT: control target
= control target key end

     0   :  { %12 = vsyncpa [#allocation5], 0  ;;  %s5063_s0 = inlined_call_operand.vmem [shape: f32[96,16], index: 0, kind: input, shape index: {}]   ;;  %s5064_s1 = inlined_call_operand.vmem [shape: f32[16,384], index: 1, kind: input, shape index: {}]   ;;  %s5065_s2 = inlined_call_operand.hbm [shape: f32[128,384], index: 2, kind: input, shape index: {}]   ;;  %s5066_s3 = inlined_call_operand.vmem [shape: f32[1,384], index: 3, kind: input, shape index: {}]   ;;  %s5067_s4 = inlined_call_operand.vmem [shape: f32[1,128], index: 4, kind: input, shape index: {}]   ;;  %s5068_s5 = inlined_call_operand.hbm [shape: f32[128,128], index: 5, kind: input, shape index: {}]   ;;  %s5069_s6 = inlined_call_operand.vmem [shape: f32[1,128], index: 6, kind: input, shape index: {}]   ;;  %s5070_s7 = inlined_call_operand.hbm [shape: f32[8,128], index: 7, kind: output, shape index: {}]  }
   0x1   :  { %13 = vsyncpa [#allocation8], 0 }
   0x2   :  { %14 = vsyncpa [#allocation6], 0  ;;  %s3937_s24 = smov 0  }
   0x3 LB: > { %s3884_s25 = smov [#allocation4]   ;;  %s3943_s27 = sadd.s32 4294967295, %s3882_s24   ;;  %s3882_s24 = sphi %s3937_s24, %s20_s24  }
   0x4   : > { %s213_s26 = sshll.u32 %s3884_s25, 4  ;;  %p2863_p0 = scmp.ge.s32.totalorder %s3882_s24, 1  ;;  %s214_s26 = int_to_ptr.vmem [resolvable:$true] %s213_s26 }
   0x5   : > { %p198_p1 = scmp.lt.s32.totalorder %s3882_s24, 3  ;;  %p3637_p4 = scmp.eq.s32.totalorder %s3943_s27, 0 }
   0x6   : > { %s3885_s29 = smov [#allocation7]   ;;  %s3799_s9 = scalar_lea.vmem %s214_s26, 6144 }
   0x7   : > { %p3948_p3 = pnand %p2863_p0, %p198_p1  ;;  %s232_s30 = sshll.u32 %s3885_s29, 4  ;;  %s233_s30 = int_to_ptr.vmem [resolvable:$true] %s232_s30 }
   0x8   : > { %p3800_p8 = scmp.ne.s32.totalorder %s214_s26, %s3799_s9  ;;  %p3807_p11 = scmp.lt.s32.totalorder %s214_s26, %s214_s26 }
   0x9   : > { %p3630_p5 = pneg %p3948_p3  ;;  %p3808_p12 = scmp.lt.s32.totalorder %s3799_s9, %s3799_s9 }
   0xb   : > { %p3957_p6 = pnand %p3637_p4, %p3630_p5  ;;  %p3809_p13 = por %p3808_p12, %p3807_p11 }
   0xd   : > { %p3790_p7 = pneg %p3957_p6 }
   0xf   : > { %p3802_p9 = pnand %p3800_p8, %p3790_p7 }
  0x11   : > { %p3803_p10 = pneg %p3802_p9 }
  0x13   : > { %p3810_p0 = pnand %p3809_p13, %p3803_p10 }
  0x15   : > { %3813 = shalt.err (!%p3810_p0)
}
  0x16   : > { %s3886_s10 = smov 384   ;;  %s3887_s11 = smov 24  }
  0x17   : > { %3633 = dma.hbm_to_vmem [thread:$0]  (!%p3957_p6), %s5065_s2, 6144, %s214_s26, [#allocation5], %s3886_s10, %s3886_s10, %s3887_s11  }
  0x18   : > { %s3825_s14 = scalar_lea.vmem %s233_s30, 2048  ;;  %p3833_p9 = scmp.lt.s32.totalorder %s233_s30, %s233_s30 }
  0x19   : > { %p3826_p1 = scmp.ne.s32.totalorder %s233_s30, %s3825_s14  ;;  %p3834_p2 = scmp.lt.s32.totalorder %s3825_s14, %s3825_s14 }
  0x1b   : > { %p3828_p5 = pnand %p3826_p1, %p3790_p7  ;;  %p3835_p11 = por %p3834_p2, %p3833_p9 }
  0x1d   : > { %p3829_p8 = pneg %p3828_p5 }
  0x1f   : > { %p3836_p10 = pnand %p3835_p11, %p3829_p8 }
  0x21   : > { %3839 = shalt.err (!%p3836_p10)
}
  0x22   : > { %s3888_s15 = smov 128   ;;  %s3889_s16 = smov 8  }
  0x23   : > { %3636 = dma.hbm_to_vmem [thread:$0]  (!%p3957_p6), %s5068_s5, 2048, %s233_s30, [#allocation8], %s3888_s15, %s3888_s15, %s3889_s16  }
  0x24   : > { %260 = sbr.rel (%p3948_p3) target bundleno = 3607 (0xe17), region = 48 }
  0x29   : > { %3869 = dma.done.wait (%p3637_p4), [#allocation5], 6144  }
  0x2a   : > { %3871 = vsyncadd (%p3637_p4), [#allocation5], 4294961152 }
  0x2b   : > { %3873 = dma.done.wait (%p3637_p4), [#allocation8], 2048  }
  0x2c   : > { %3875 = vsyncadd (%p3637_p4), [#allocation8], 4294965248  ;;  %s3990_s19 = smul.u32 6, %s3943_s27  ;;  %p5102_p3 = scmp.ne.s32.totalorder %s3943_s27, 0 }
  0x2e   : > { %p292_p2 = scmp.lt.s32.totalorder %s3990_s19, 11 }
  0x2f   : > { %300 = sbr.rel (%p5102_p3) target bundleno = 54 (0x36), region = 60 }
  0x30   : > { %s293_s20 = scalar_select %p292_p2, %s3990_s19, 11 }
  0x32   : > { %s2870_s21 = sshll.u32 %s293_s20, 3 }
  0x33   : > { %s3997_s25 = scalar_lea.vmem %s5063_s0, %s2870_s21 }
  0x34   : > { %v3890_v0 = vmov 0.0  }
  0x35   : > { %301 = vst [vmem:[#allocation2] sm:$0xff] %v3890_v0 }
  0x36 PF: > { %v312_v1 = vld [vmem:[%s5064_s1 + $0x20] sm:$0xff]  ;;  %v311_v2 = vld [vmem:[%s5064_s1 + $0x18] sm:$0xff]  ;;  %v309_v3 = vld [vmem:[%s5064_s1 + $0x8] sm:$0xff]  ;;  %vm331_vm0 = vcmask 130048   ;;  %v3891_v6 = vmov 0.0   ;;  %v316_v63 = vlaneseq  ;;  %p2885_p4 = scmp.eq.s32.totalorder %s3943_s27, 1 }
  0x37   : > { %378 = vmatprep.subr.mxu0 %v312_v1  ;;  %3614 = vmatprep.subr.mxu1 %v312_v1  ;;  %v308_v4 = vld [vmem:[%s5064_s1] sm:$0xff]  ;;  %v313_v7 = vld [vmem:[%s5064_s1 + $0x28] sm:$0xff]  ;;  %v310_v10 = vld [vmem:[%s5064_s1 + $0x10] sm:$0xff] }
  0x38   : > { %379 = vmatpush1.msra.mxu0 %v311_v2  ;;  %3616 = vmatpush1.msra.mxu1 %v311_v2  ;;  %v302_v5 = vld [vmem:[%s3997_s25] sm:$0xff]  ;;  %v307_v8 = vld [vmem:[%s3997_s25 + $0x28] sm:$0xff]  ;;  %v304_v11 = vld [vmem:[%s3997_s25 + $0x10] sm:$0xff]  ;;  %v317_v0 = vshrl.u32 %v316_v63, 7 }
  0x39   : > { %380 = vmatprep.subr.mxu0 %v309_v3  ;;  %414 = vmatprep.mubr.f32.mxu0 %v3891_v6  ;;  %v303_v9 = vld [vmem:[%s3997_s25 + $0x8] sm:$0xff]  ;;  %v305_v12 = vld [vmem:[%s3997_s25 + $0x18] sm:$0xff]  ;;  %v306_v13 = vld [vmem:[%s3997_s25 + $0x20] sm:$0xff] }
  0x3a   : > { %381 = vmatpush1.msra.mxu0 %v308_v4  ;;  %3615 = vmatprep.subr.mxu1 %v309_v3  ;;  %v4037_v14 = vld [vmem:[#allocation4] sm:$0xff]  ;;  %v4039_v15 = vld [vmem:[#allocation4 + $0x8] sm:$0xff]  ;;  %v4041_v16 = vld [vmem:[#allocation4 + $0x10] sm:$0xff]  ;;  %v318_v1 = vsub.s32 0, %v317_v0  ;;  %v322_v3 = vsub.s32 1, %v317_v0 }
  0x3b   : > { %2872 = vmatmul.mubr.msk.f32.vlgmr.msra.gmra.mxu0 %vm331_vm0, %v302_v5  ;;  %3617 = vmatpush1.msra.mxu1 %v308_v4  ;;  %5103 = vst [vmem:[#allocation13_spill] sm:$0xff] %v4037_v14  ;;  %5104 = vst [vmem:[#allocation14_spill] sm:$0xff] %v4039_v15  ;;  %v4043_v17 = vld [vmem:[#allocation4 + $0x18] sm:$0xff]  ;;  %v4045_v18 = vld [vmem:[#allocation4 + $0x20] sm:$0xff] }
  0x3c   : > { %444 = vmatprep.mubr.f32.mxu1 %v3891_v6  ;;  %3146 = vmatprep.subr.mxu1 %v313_v7  ;;  %5105 = vst [vmem:[#allocation15_spill] sm:$0xff] %v4041_v16  ;;  %5106 = vst [vmem:[#allocation16_spill] sm:$0xff] %v4043_v17  ;;  %v4047_v19 = vld [vmem:[#allocation4 + $0x28] sm:$0xff]  ;;  %v4049_v20 = vld [vmem:[#allocation4 + $0x30] sm:$0xff] }
  0x3d   : > { %2877 = vmatmul.mubr.msk.f32.vlgmr.msra.gmra.mxu1 %vm331_vm0, %v307_v8  ;;  %420 = vmatprep.mubr.f32.mxu0 %v3891_v6  ;;  %5107 = vst [vmem:[#allocation17_spill] sm:$0xff] %v4047_v19  ;;  %v4051_v21 = vld [vmem:[#allocation4 + $0x38] sm:$0xff]  ;;  %v4053_v22 = vld [vmem:[#allocation4 + $0x40] sm:$0xff]  ;;  %v4055_v23 = vld [vmem:[#allocation4 + $0x48] sm:$0xff] }
  0x3e   : > { %3147 = vmatpush3.msra.mxu1 %v313_v7  ;;  %3150 = vmatprep.mubr.msk.f32.mxu1 %vm331_vm0, %v302_v5  ;;  %v4057_v24 = vld [vmem:[#allocation4 + $0x50] sm:$0xff]  ;;  %v4059_v25 = vld [vmem:[#allocation4 + $0x58] sm:$0xff]  ;;  %v4061_v26 = vld [vmem:[#allocation4 + $0x60] sm:$0xff] }
  0x3f   : > { %2873 = vmatmul.mubr.msk.f32.gmra.mxu0 %vm331_vm0, %v303_v9  ;;  %3148 = vmatprep.subr.mxu1 %v310_v10  ;;  %v4063_v27 = vld [vmem:[#allocation4 + $0x68] sm:$0xff]  ;;  %v4065_v28 = vld [vmem:[#allocation4 + $0x70] sm:$0xff]  ;;  %v4067_v29 = vld [vmem:[#allocation4 + $0x78] sm:$0xff] }
  0x40   : > { %3149 = vmatpush3.msra.mxu1 %v310_v10  ;;  %426 = vmatprep.mubr.f32.mxu0 %v3891_v6  ;;  %v4069_v30 = vld [vmem:[#allocation4 + $0x80] sm:$0xff]  ;;  %v4071_v31 = vld [vmem:[#allocation4 + $0x88] sm:$0xff]  ;;  %v4073_v32 = vld [vmem:[#allocation4 + $0x90] sm:$0xff] }
  0x41   : > { %3151 = vmatmul.mubr.msk.f32.vlgmr.msra.gmra.mxu1 %vm331_vm0, %v303_v9  ;;  %v4075_v33 = vld [vmem:[#allocation4 + $0x98] sm:$0xff]  ;;  %v4077_v34 = vld [vmem:[#allocation4 + $0xa0] sm:$0xff]  ;;  %v4079_v35 = vld [vmem:[#allocation4 + $0xa8] sm:$0xff] }
  0x42   : > { %3153 = vmatprep.mubr.msk.f32.mxu1 %vm331_vm0, %v304_v11  ;;  %v4081_v36 = vld [vmem:[#allocation4 + $0xb0] sm:$0xff]  ;;  %v4083_v37 = vld [vmem:[#allocation4 + $0xb8] sm:$0xff]  ;;  %v4085_v38 = vld [vmem:[#allocation4 + $0xc0] sm:$0xff] }
  0x43   : > { %2874 = vmatmul.mubr.msk.f32.gmra.mxu0 %vm331_vm0, %v304_v11  ;;  %v4087_v39 = vld [vmem:[#allocation4 + $0xc8] sm:$0xff]  ;;  %v4089_v40 = vld [vmem:[#allocation4 + $0xd0] sm:$0xff]  ;;  %v4091_v41 = vld [vmem:[#allocation4 + $0xd8] sm:$0xff] }
  0x44   : > { %432 = vmatprep.mubr.f32.mxu0 %v3891_v6  ;;  %v4093_v42 = vld [vmem:[#allocation4 + $0xe0] sm:$0xff]  ;;  %v4095_v43 = vld [vmem:[#allocation4 + $0xe8] sm:$0xff]  ;;  %v4097_v44 = vld [vmem:[#allocation4 + $0xf0] sm:$0xff] }
  0x45   : > { %3154 = vmatmul.mubr.msk.f32.gmra.mxu1 %vm331_vm0, %v305_v12  ;;  %v4099_v45 = vld [vmem:[#allocation4 + $0xf8] sm:$0xff]  ;;  %v4101_v46 = vld [vmem:[#allocation4 + $0x100] sm:$0xff]  ;;  %v4103_v47 = vld [vmem:[#allocation4 + $0x108] sm:$0xff] }
  0x46   : > { %3156 = vmatprep.mubr.msk.f32.mxu1 %vm331_vm0, %v306_v13  ;;  %v4105_v48 = vld [vmem:[#allocation4 + $0x110] sm:$0xff]  ;;  %v4107_v49 = vld [vmem:[#allocation4 + $0x118] sm:$0xff]  ;;  %v4109_v50 = vld [vmem:[#allocation4 + $0x120] sm:$0xff] }
  0x47   : > { %2875 = vmatmul.mubr.msk.f32.gmra.mxu0 %vm331_vm0, %v305_v12  ;;  %v4111_v51 = vld [vmem:[#allocation4 + $0x128] sm:$0xff]  ;;  %v4113_v52 = vld [vmem:[#allocation4 + $0x130] sm:$0xff]  ;;  %v4115_v53 = vld [vmem:[#allocation4 + $0x138] sm:$0xff] }
  0x48   : > { %438 = vmatprep.mubr.f32.mxu0 %v3891_v6  ;;  %v4117_v54 = vld [vmem:[#allocation4 + $0x140] sm:$0xff]  ;;  %v4119_v55 = vld [vmem:[#allocation4 + $0x148] sm:$0xff]  ;;  %v4121_v56 = vld [vmem:[#allocation4 + $0x150] sm:$0xff]  ;;  %v326_v6 = vsub.s32 2, %v317_v0 }
  0x49   : > { %3157 = vmatmul.mubr.msk.f32.gmra.mxu1 %vm331_vm0, %v307_v8  ;;  %v4123_v57 = vld [vmem:[#allocation4 + $0x158] sm:$0xff]  ;;  %v4125_v58 = vld [vmem:[#allocation4 + $0x160] sm:$0xff]  ;;  %v4127_v59 = vld [vmem:[#allocation4 + $0x168] sm:$0xff] }
  0x4a   : > { %v4129_v60 = vld [vmem:[#allocation4 + $0x170] sm:$0xff]  ;;  %v4131_v61 = vld [vmem:[#allocation4 + $0x178] sm:$0xff]  ;;  %v4136_v62 = vld [vmem:[%s5067_s4] ss:$0 sm:$0xff] }
  0x4b   : > { %2876 = vmatmul.mubr.msk.f32.gmra.mxu0 %vm331_vm0, %v306_v13  ;;  %5108 = vst [vmem:[#allocation18_spill] sm:$0xff] %v4129_v60  ;;  %5109 = vst [vmem:[#allocation19_spill] sm:$0xff] %v4136_v62  ;;  %v314_v2 = vld [vmem:[%s5066_s3] sm:$0x7] }
  0x4c   : > { %v319_v4 = vrot.slane %v314_v2, %v318_v1  ;;  %v323_v5 = vrot.slane %v314_v2, %v322_v3  ;;  %v327_v13 = vrot.slane %v314_v2, %v326_v6 }
  0xfb   : > { %v416_v7 = vpop.f32.mrf.mxu0 }
  0xfc   : > { %v417_v8 = vadd.f32 %v416_v7, %v319_v4 }
  0xfd   : > { %v418_v9 = vpop.f32.mrf.mxu0  ;;  %v446_v10 = vpop.f32.mrf.mxu1 }
  0xfe   : > { %546 = vst [vmem:[#allocation3] sm:$0xff] %v417_v8  ;;  %v419_v11 = vadd.f32 %v418_v9, %v323_v5  ;;  %v447_v12 = vadd.f32 %v446_v10, %v319_v4 }
  0xff   : > { %v422_v62 = vpop.f32.mrf.mxu0  ;;  %v448_v16 = vpop.f32.mrf.mxu1 }
 0x100   : > { %547 = vst [vmem:[#allocation3 + $0x38] sm:$0xff] %v419_v11  ;;  %561 = vst [vmem:[#allocation3 + $0x18] sm:$0xff] %v447_v12  ;;  %v423_v63 = vadd.f32 %v422_v62, %v319_v4  ;;  %v449_v19 = vadd.f32 %v448_v16, %v323_v5 }
 0x101   : > { %v424_v14 = vpop.f32.mrf.mxu0  ;;  %v3152_v15 = vpop.f32.mrf.mxu1 }
 0x102   : > { %549 = vst [vmem:[#allocation3 + $0x58] sm:$0xff] %v423_v63  ;;  %562 = vst [vmem:[#allocation3 + $0x68] sm:$0xff] %v449_v19  ;;  %v425_v1 = vadd.f32 %v424_v14, %v323_v5  ;;  %v523_v0 = vadd.f32 %v3152_v15, %v327_v13 }
 0x103   : > { %v428_v3 = vpop.f32.mrf.mxu0  ;;  %v517_v7 = vpop.f32.mrf.mxu1 }
 0x104   : > { %550 = vst [vmem:[#allocation3 + $0x20] sm:$0xff] %v425_v1  ;;  %551 = vst [vmem:[#allocation3 + $0x8] sm:$0xff] %v523_v0  ;;  %v429_v8 = vadd.f32 %v428_v3, %v319_v4  ;;  %v518_v9 = vadd.f32 %v517_v7, %v327_v13 }
 0x105   : > { %v430_v10 = vpop.f32.mrf.mxu0  ;;  %v3155_v2 = vpop.f32.mrf.mxu1 }
 0x106   : > { %552 = vst [vmem:[#allocation3 + $0x70] sm:$0xff] %v429_v8  ;;  %548 = vst [vmem:[#allocation3 + $0x78] sm:$0xff] %v518_v9  ;;  %v431_v6 = vadd.f32 %v430_v10, %v323_v5  ;;  %v533_v11 = vadd.f32 %v3155_v2, %v327_v13 }
 0x107   : > { %v434_v62 = vpop.f32.mrf.mxu0  ;;  %v527_v16 = vpop.f32.mrf.mxu1 }
 0x108   : > { %553 = vst [vmem:[#allocation3 + $0x80] sm:$0xff] %v431_v6  ;;  %557 = vst [vmem:[#allocation3 + $0x28] sm:$0xff] %v533_v11  ;;  %v435_v12 = vadd.f32 %v434_v62, %v319_v4  ;;  %v528_v19 = vadd.f32 %v527_v16, %v327_v13 }
 0x109   : > { %v436_v14 = vpop.f32.mrf.mxu0  ;;  %v3158_v15 = vpop.f32.mrf.mxu1 }
 0x10a   : > { %555 = vst [vmem:[#allocation3 + $0x40] sm:$0xff] %v435_v12  ;;  %554 = vst [vmem:[#allocation3 + $0x88] sm:$0xff] %v528_v19  ;;  %v437_v63 = vadd.f32 %v436_v14, %v323_v5  ;;  %v543_v1 = vadd.f32 %v3158_v15, %v327_v13 }
 0x10b   : > { %v440_v0 = vpop.f32.mrf.mxu0  ;;  %v537_v3 = vpop.f32.mrf.mxu1 }
 0x10c   : > { %556 = vst [vmem:[#allocation3 + $0x50] sm:$0xff] %v437_v63  ;;  %563 = vst [vmem:[#allocation3 + $0x60] sm:$0xff] %v543_v1  ;;  %v441_v7 = vadd.f32 %v440_v0, %v319_v4  ;;  %v538_v8 = vadd.f32 %v537_v3, %v327_v13  ;;  %622 = sbr.rel (%p2885_p4) target bundleno = 1812 (0x714), region = 64 }
 0x10d   : > { %v442_v9 = vpop.f32.mrf.mxu0 }
 0x10e   : > { %558 = vst [vmem:[#allocation3 + $0x10] sm:$0xff] %v441_v7  ;;  %560 = vst [vmem:[#allocation3 + $0x30] sm:$0xff] %v538_v8  ;;  %v443_v10 = vadd.f32 %v442_v9, %v323_v5 }
 0x110   : > { %559 = vst [vmem:[#allocation3 + $0x48] sm:$0xff] %v443_v10 }
 0x111   : > { %630 = vmatprep.subr.mxu0 %v4129_v60  ;;  %v5085_v2 = vmov 0.0   ;;  %v4202_v4 = vld [vmem:[#allocation2] sm:$0xff]  ;;  %v5110_v5 = vld [vmem:[#allocation14_spill] sm:$0xff]  ;;  %v5113_v11 = vld [vmem:[#allocation15_spill] sm:$0xff]  ;;  %vm3893_vm1 = vmmov 0  }
 0x112   : > { %631 = vmatpush1.msra.mxu0 %v4127_v59  ;;  %3159 = vmatprep.subr.mxu1 %v5085_v2  ;;  %v5111_v13 = vld [vmem:[#allocation13_spill] sm:$0xff]  ;;  %v627_v62 = vld [vmem:[#allocation3] sm:$0xff]  ;;  %v5114_v9 = vld [vmem:[#allocation19_spill] sm:$0xff] }
 0x113   : > { %632 = vmatprep.subr.mxu0 %v4123_v57  ;;  %694 = vmatprep.mubr.f32.mxu0 %v5085_v2  ;;  %v5112_v6 = vld [vmem:[#allocation17_spill] sm:$0xff] }
 0x114   : > { %633 = vmatpush1.msra.mxu0 %v4121_v56  ;;  %3160 = vmatpush3.msra.mxu1 %v4131_v61  ;;  %v628_v63 = vld [vmem:[#allocation3 + $0x38] sm:$0xff] }
 0x115   : > { %634 = vmatprep.subr.mxu0 %v4117_v54  ;;  %3161 = vmatprep.subr.mxu1 %v5085_v2 }
 0x116   : > { %635 = vmatpush1.msra.mxu0 %v4115_v53  ;;  %3162 = vmatpush3.msra.mxu1 %v4125_v58 }
 0x117   : > { %636 = vmatprep.subr.mxu0 %v4111_v51  ;;  %3163 = vmatprep.subr.mxu1 %v5085_v2 }
 0x118   : > { %637 = vmatpush1.msra.mxu0 %v4109_v50  ;;  %3164 = vmatpush3.msra.mxu1 %v4119_v55 }
 0x119   : > { %638 = vmatprep.subr.mxu0 %v4105_v48  ;;  %3165 = vmatprep.subr.mxu1 %v5085_v2 }
 0x11a   : > { %639 = vmatpush1.msra.mxu0 %v4103_v47  ;;  %3166 = vmatpush3.msra.mxu1 %v4113_v52 }
 0x11b   : > { %640 = vmatprep.subr.mxu0 %v4099_v45  ;;  %3167 = vmatprep.subr.mxu1 %v5085_v2 }
 0x11c   : > { %641 = vmatpush1.msra.mxu0 %v4097_v44  ;;  %3168 = vmatpush3.msra.mxu1 %v4107_v49 }
 0x11d   : > { %642 = vmatprep.subr.mxu0 %v4093_v42  ;;  %3169 = vmatprep.subr.mxu1 %v5085_v2 }
 0x11e   : > { %643 = vmatpush1.msra.mxu0 %v4091_v41  ;;  %3170 = vmatpush3.msra.mxu1 %v4101_v46 }
 0x11f   : > { %644 = vmatprep.subr.mxu0 %v4087_v39  ;;  %3171 = vmatprep.subr.mxu1 %v5085_v2 }
 0x120   : > { %645 = vmatpush1.msra.mxu0 %v4085_v38  ;;  %3172 = vmatpush3.msra.mxu1 %v4095_v43 }
 0x121   : > { %646 = vmatprep.subr.mxu0 %v4081_v36  ;;  %3173 = vmatprep.subr.mxu1 %v5085_v2 }
 0x122   : > { %647 = vmatpush1.msra.mxu0 %v4079_v35  ;;  %3174 = vmatpush3.msra.mxu1 %v4089_v40 }
 0x123   : > { %648 = vmatprep.subr.mxu0 %v4075_v33  ;;  %3175 = vmatprep.subr.mxu1 %v5085_v2 }
 0x124   : > { %649 = vmatpush1.msra.mxu0 %v4073_v32  ;;  %3176 = vmatpush3.msra.mxu1 %v4083_v37 }
 0x125   : > { %650 = vmatprep.subr.mxu0 %v4069_v30  ;;  %3177 = vmatprep.subr.mxu1 %v5085_v2 }
 0x126   : > { %651 = vmatpush1.msra.mxu0 %v4067_v29  ;;  %3178 = vmatpush3.msra.mxu1 %v4077_v34 }
 0x127   : > { %652 = vmatprep.subr.mxu0 %v4063_v27  ;;  %3179 = vmatprep.subr.mxu1 %v5085_v2 }
 0x128   : > { %653 = vmatpush1.msra.mxu0 %v4061_v26  ;;  %3180 = vmatpush3.msra.mxu1 %v4071_v31 }
 0x129   : > { %654 = vmatprep.subr.mxu0 %v4057_v24  ;;  %3181 = vmatprep.subr.mxu1 %v5085_v2 }
 0x12a   : > { %655 = vmatpush1.msra.mxu0 %v4055_v23  ;;  %3182 = vmatpush3.msra.mxu1 %v4065_v28 }
 0x12b   : > { %656 = vmatprep.subr.mxu0 %v4051_v21  ;;  %3183 = vmatprep.subr.mxu1 %v5085_v2 }
 0x12c   : > { %657 = vmatpush1.msra.mxu0 %v4049_v20  ;;  %3184 = vmatpush3.msra.mxu1 %v4059_v25 }
 0x12d   : > { %658 = vmatprep.subr.mxu0 %v4045_v18  ;;  %3185 = vmatprep.subr.mxu1 %v5085_v2 }
 0x12e   : > { %659 = vmatpush1.msra.mxu0 %v4043_v17  ;;  %3186 = vmatpush3.msra.mxu1 %v4053_v22 }
 0x12f   : > { %660 = vmatprep.subr.mxu0 %v5110_v5  ;;  %3187 = vmatprep.subr.mxu1 %v5085_v2 }
 0x130   : > { %661 = vmatpush1.msra.mxu0 %v5111_v13  ;;  %3188 = vmatpush3.msra.mxu1 %v5112_v6 }
 0x131   : > { %695 = vmatmul.mubr.f32.vlgmr.msra.gmra.mxu0 %v4202_v4  ;;  %3189 = vmatprep.subr.mxu1 %v5085_v2 }
 0x132   : > { %3190 = vmatpush3.msra.mxu1 %v5113_v11  ;;  %3191 = vmatprep.mubr.msk.f32.mxu1 %vm3893_vm1, %v5085_v2 }
 0x133   : > { %3192 = vmatmul.mubr.f32.vlgmr.msra.gmra.mxu1 %v4202_v4  ;;  %798 = vmatprep.subr.mxu0 %v4129_v60 }
 0x134   : > { %3194 = vmatprep.subr.mxu1 %v5085_v2  ;;  %799 = vmatpush1.msra.mxu0 %v4127_v59 }
 0x135   : > { %3195 = vmatpush3.msra.mxu1 %v4131_v61  ;;  %800 = vmatprep.subr.mxu0 %v4123_v57 }
 0x136   : > { %3196 = vmatprep.subr.mxu1 %v5085_v2  ;;  %801 = vmatpush1.msra.mxu0 %v4121_v56 }
 0x137   : > { %3197 = vmatpush3.msra.mxu1 %v4125_v58  ;;  %802 = vmatprep.subr.mxu0 %v4117_v54 }
 0x138   : > { %3198 = vmatprep.subr.mxu1 %v5085_v2  ;;  %803 = vmatpush1.msra.mxu0 %v4115_v53 }
 0x139   : > { %3199 = vmatpush3.msra.mxu1 %v4119_v55  ;;  %804 = vmatprep.subr.mxu0 %v4111_v51 }
 0x13a   : > { %3200 = vmatprep.subr.mxu1 %v5085_v2  ;;  %805 = vmatpush1.msra.mxu0 %v4109_v50 }
 0x13b   : > { %3201 = vmatpush3.msra.mxu1 %v4113_v52  ;;  %806 = vmatprep.subr.mxu0 %v4105_v48 }
 0x13c   : > { %3202 = vmatprep.subr.mxu1 %v5085_v2  ;;  %807 = vmatpush1.msra.mxu0 %v4103_v47 }
 0x13d   : > { %3203 = vmatpush3.msra.mxu1 %v4107_v49  ;;  %808 = vmatprep.subr.mxu0 %v4099_v45 }
 0x13e   : > { %3204 = vmatprep.subr.mxu1 %v5085_v2  ;;  %809 = vmatpush1.msra.mxu0 %v4097_v44 }
 0x13f   : > { %3205 = vmatpush3.msra.mxu1 %v4101_v46  ;;  %810 = vmatprep.subr.mxu0 %v4093_v42 }
 0x140   : > { %3206 = vmatprep.subr.mxu1 %v5085_v2  ;;  %811 = vmatpush1.msra.mxu0 %v4091_v41 }
 0x141   : > { %3207 = vmatpush3.msra.mxu1 %v4095_v43  ;;  %812 = vmatprep.subr.mxu0 %v4087_v39 }
 0x142   : > { %3208 = vmatprep.subr.mxu1 %v5085_v2  ;;  %813 = vmatpush1.msra.mxu0 %v4085_v38 }
 0x143   : > { %3209 = vmatpush3.msra.mxu1 %v4089_v40  ;;  %814 = vmatprep.subr.mxu0 %v4081_v36 }
 0x144   : > { %3210 = vmatprep.subr.mxu1 %v5085_v2  ;;  %815 = vmatpush1.msra.mxu0 %v4079_v35 }
 0x145   : > { %3211 = vmatpush3.msra.mxu1 %v4083_v37  ;;  %816 = vmatprep.subr.mxu0 %v4075_v33 }
 0x146   : > { %3212 = vmatprep.subr.mxu1 %v5085_v2  ;;  %817 = vmatpush1.msra.mxu0 %v4073_v32 }
 0x147   : > { %3213 = vmatpush3.msra.mxu1 %v4077_v34  ;;  %818 = vmatprep.subr.mxu0 %v4069_v30 }
 0x148   : > { %3214 = vmatprep.subr.mxu1 %v5085_v2  ;;  %819 = vmatpush1.msra.mxu0 %v4067_v29 }
 0x149   : > { %3215 = vmatpush3.msra.mxu1 %v4071_v31  ;;  %820 = vmatprep.subr.mxu0 %v4063_v27 }
 0x14a   : > { %3216 = vmatprep.subr.mxu1 %v5085_v2  ;;  %821 = vmatpush1.msra.mxu0 %v4061_v26 }
 0x14b   : > { %3217 = vmatpush3.msra.mxu1 %v4065_v28  ;;  %822 = vmatprep.subr.mxu0 %v4057_v24 }
 0x14c   : > { %3218 = vmatprep.subr.mxu1 %v5085_v2  ;;  %823 = vmatpush1.msra.mxu0 %v4055_v23 }
 0x14d   : > { %3219 = vmatpush3.msra.mxu1 %v4059_v25  ;;  %824 = vmatprep.subr.mxu0 %v4051_v21 }
 0x14e   : > { %3220 = vmatprep.subr.mxu1 %v5085_v2  ;;  %825 = vmatpush1.msra.mxu0 %v4049_v20 }
 0x14f   : > { %3221 = vmatpush3.msra.mxu1 %v4053_v22  ;;  %826 = vmatprep.subr.mxu0 %v4045_v18 }
 0x150   : > { %3222 = vmatprep.subr.mxu1 %v5085_v2  ;;  %827 = vmatpush1.msra.mxu0 %v4043_v17 }
 0x151   : > { %3223 = vmatpush3.msra.mxu1 %v5112_v6  ;;  %828 = vmatprep.subr.mxu0 %v5110_v5 }
 0x152   : > { %3224 = vmatprep.subr.mxu1 %v5085_v2  ;;  %829 = vmatpush1.msra.mxu0 %v5111_v13 }
 0x153   : > { %862 = vmatprep.mubr.f32.mxu0 %v5085_v2  ;;  %3225 = vmatpush3.msra.mxu1 %v5113_v11 }
 0x154   : > { %3226 = vmatprep.mubr.msk.f32.mxu1 %vm3893_vm1, %v5085_v2  ;;  %966 = vmatprep.subr.mxu0 %v4129_v60 }
 0x155   : > { %3229 = vmatprep.subr.mxu1 %v5085_v2  ;;  %v629_v2 = vld [vmem:[#allocation3 + $0x78] sm:$0xff] }
 0x1f1   : > { %v696_v16 = vpop.f32.mrf.mxu0 }
 0x1f2   : > { %v771_v12 = vadd.f32 %v696_v16, %v627_v62 }
 0x1f3   : > { %v767_v19 = vpop.f32.mrf.mxu1  ;;  %v698_v1 = vpop.f32.mrf.mxu0 }
 0x1f4   : > { %v2886_v14 = vmul.f32 -1.442695, %v771_v12  ;;  %v778_v0 = vadd.f32 %v698_v1, %v628_v63  ;;  %v785_v10 = vadd.f32 %v5114_v9, %v767_v19 }
 0x1f5   : > { %v3193_v15 = vpop.f32.mrf.mxu1 }
 0x1f6   : > { %3664 = vpow2.f32 %v2886_v14  ;;  %v2887_v3 = vmul.f32 -1.442695, %v778_v0 }
 0x1f8   : > { %3666 = vpow2.f32 %v2887_v3 }
 0x203   : > { %v3665_v7 = vpop.eup %3664 }
 0x204   : > { %v775_v8 = vadd.f32 1.0, %v3665_v7 }
 0x205   : > { %v3667_v60 = vpop.eup %3666 }
 0x206   : > { %3668 = vrcp.f32 %v775_v8  ;;  %v782_v5 = vadd.f32 1.0, %v3667_v60  ;;  %v5115_v60 = vmov 0.0   ;;  %v796_v8 = vld [vmem:[#allocation3 + $0x20] sm:$0xff] }
 0x213   : > { %v3669_v11 = vpop.eup %3668 }
 0x214   : > { %v786_v13 = vmul.f32 %v3669_v11, %v785_v10  ;;  %v795_v11 = vld [vmem:[#allocation3 + $0x58] sm:$0xff] }
 0x216   : > { %v787_v62 = vadd.f32 %v786_v13, %v629_v2  ;;  %v5116_v2 = vld [vmem:[#allocation14_spill] sm:$0xff] }
 0x217   : > { %v5119_v13 = vld [vmem:[#allocation18_spill] sm:$0xff] }
 0x218   : > { %3670 = vtanh.f32 %v787_v62 }
 0x219   : > { %3672 = vrcp.f32 %v782_v5  ;;  %v5118_v5 = vld [vmem:[#allocation15_spill] sm:$0xff] }
 0x225   : > { %v3671_v16 = vpop.eup %3670 }
 0x226   : > { %v789_v12 = vsub.f32 %v4202_v4, %v3671_v16  ;;  %v3673_v14 = vpop.eup %3672  ;;  %v5117_v4 = vld [vmem:[#allocation13_spill] sm:$0xff] }
 0x228   : > { %v790_v15 = vmul.f32 %v3673_v14, %v789_v12 }
 0x22a   : > { %v4286_v63 = vadd.f32 %v3671_v16, %v790_v15 }
 0x22c   : > { %863 = vmatmul.mubr.f32.vlgmr.msra.gmra.mxu0 %v4286_v63  ;;  %3227 = vmatmul.mubr.f32.vlgmr.msra.gmra.mxu1 %v4286_v63 }
 0x22d   : > { %967 = vmatpush1.msra.mxu0 %v4127_v59  ;;  %3230 = vmatpush3.msra.mxu1 %v4131_v61 }
 0x22e   : > { %968 = vmatprep.subr.mxu0 %v4123_v57  ;;  %3231 = vmatprep.subr.mxu1 %v5115_v60 }
 0x22f   : > { %969 = vmatpush1.msra.mxu0 %v4121_v56  ;;  %3232 = vmatpush3.msra.mxu1 %v4125_v58 }
 0x230   : > { %970 = vmatprep.subr.mxu0 %v4117_v54  ;;  %3233 = vmatprep.subr.mxu1 %v5115_v60 }
 0x231   : > { %971 = vmatpush1.msra.mxu0 %v4115_v53  ;;  %3234 = vmatpush3.msra.mxu1 %v4119_v55 }
 0x232   : > { %972 = vmatprep.subr.mxu0 %v4111_v51  ;;  %3235 = vmatprep.subr.mxu1 %v5115_v60 }
 0x233   : > { %973 = vmatpush1.msra.mxu0 %v4109_v50  ;;  %3236 = vmatpush3.msra.mxu1 %v4113_v52 }
 0x234   : > { %974 = vmatprep.subr.mxu0 %v4105_v48  ;;  %3237 = vmatprep.subr.mxu1 %v5115_v60 }
 0x235   : > { %975 = vmatpush1.msra.mxu0 %v4103_v47  ;;  %3238 = vmatpush3.msra.mxu1 %v4107_v49 }
 0x236   : > { %976 = vmatprep.subr.mxu0 %v4099_v45  ;;  %3239 = vmatprep.subr.mxu1 %v5115_v60 }
 0x237   : > { %977 = vmatpush1.msra.mxu0 %v4097_v44  ;;  %3240 = vmatpush3.msra.mxu1 %v4101_v46 }
 0x238   : > { %978 = vmatprep.subr.mxu0 %v4093_v42  ;;  %3241 = vmatprep.subr.mxu1 %v5115_v60 }
 0x239   : > { %979 = vmatpush1.msra.mxu0 %v4091_v41  ;;  %3242 = vmatpush3.msra.mxu1 %v4095_v43 }
 0x23a   : > { %980 = vmatprep.subr.mxu0 %v4087_v39  ;;  %3243 = vmatprep.subr.mxu1 %v5115_v60 }
 0x23b   : > { %981 = vmatpush1.msra.mxu0 %v4085_v38  ;;  %3244 = vmatpush3.msra.mxu1 %v4089_v40 }
 0x23c   : > { %982 = vmatprep.subr.mxu0 %v4081_v36  ;;  %3245 = vmatprep.subr.mxu1 %v5115_v60 }
 0x23d   : > { %983 = vmatpush1.msra.mxu0 %v4079_v35  ;;  %3246 = vmatpush3.msra.mxu1 %v4083_v37 }
 0x23e   : > { %984 = vmatprep.subr.mxu0 %v4075_v33  ;;  %3247 = vmatprep.subr.mxu1 %v5115_v60 }
 0x23f   : > { %985 = vmatpush1.msra.mxu0 %v4073_v32  ;;  %3248 = vmatpush3.msra.mxu1 %v4077_v34 }
 0x240   : > { %986 = vmatprep.subr.mxu0 %v4069_v30  ;;  %3249 = vmatprep.subr.mxu1 %v5115_v60 }
 0x241   : > { %987 = vmatpush1.msra.mxu0 %v4067_v29  ;;  %3250 = vmatpush3.msra.mxu1 %v4071_v31 }
 0x242   : > { %988 = vmatprep.subr.mxu0 %v4063_v27  ;;  %3251 = vmatprep.subr.mxu1 %v5115_v60 }
 0x243   : > { %989 = vmatpush1.msra.mxu0 %v4061_v26  ;;  %3252 = vmatpush3.msra.mxu1 %v4065_v28 }
 0x244   : > { %990 = vmatprep.subr.mxu0 %v4057_v24  ;;  %3253 = vmatprep.subr.mxu1 %v5115_v60 }
 0x245   : > { %991 = vmatpush1.msra.mxu0 %v4055_v23  ;;  %3254 = vmatpush3.msra.mxu1 %v4059_v25 }
 0x246   : > { %992 = vmatprep.subr.mxu0 %v4051_v21  ;;  %3255 = vmatprep.subr.mxu1 %v5115_v60 }
 0x247   : > { %993 = vmatpush1.msra.mxu0 %v4049_v20  ;;  %3256 = vmatpush3.msra.mxu1 %v4053_v22 }
 0x248   : > { %994 = vmatprep.subr.mxu0 %v4045_v18  ;;  %3257 = vmatprep.subr.mxu1 %v5115_v60 }
 0x249   : > { %995 = vmatpush1.msra.mxu0 %v4043_v17  ;;  %3258 = vmatpush3.msra.mxu1 %v5112_v6 }
 0x24a   : > { %996 = vmatprep.subr.mxu0 %v5116_v2  ;;  %3259 = vmatprep.subr.mxu1 %v5115_v60 }
 0x24b   : > { %997 = vmatpush1.msra.mxu0 %v5117_v4  ;;  %1030 = vmatprep.mubr.f32.mxu0 %v5115_v60  ;;  %v797_v4 = vld [vmem:[#allocation3 + $0x8] sm:$0xff] }
 0x24c   : > { %3260 = vmatpush3.msra.mxu1 %v5118_v5  ;;  %3261 = vmatprep.mubr.msk.f32.mxu1 %vm3893_vm1, %v5115_v60 }
 0x24d   : > { %1134 = vmatprep.subr.mxu0 %v5119_v13  ;;  %3264 = vmatprep.subr.mxu1 %v5115_v60 }
 0x2ec   : > { %v864_v19 = vpop.f32.mrf.mxu0  ;;  %v935_v1 = vpop.f32.mrf.mxu1 }
 0x2ed   : > { %v939_v0 = vadd.f32 %v864_v19, %v795_v11  ;;  %v953_v13 = vadd.f32 %v5114_v9, %v935_v1 }
 0x2ee   : > { %v3228_v3 = vpop.f32.mrf.mxu1  ;;  %v866_v10 = vpop.f32.mrf.mxu0 }
 0x2ef   : > { %v2888_v7 = vmul.f32 -1.442695, %v939_v0  ;;  %v946_v62 = vadd.f32 %v866_v10, %v796_v8 }
 0x2f1   : > { %3674 = vpow2.f32 %v2888_v7  ;;  %v2889_v16 = vmul.f32 -1.442695, %v946_v62 }
 0x2f3   : > { %3676 = vpow2.f32 %v2889_v16 }
 0x2fe   : > { %v3675_v12 = vpop.eup %3674 }
 0x2ff   : > { %v943_v14 = vadd.f32 1.0, %v3675_v12  ;;  %v964_v12 = vld [vmem:[#allocation3 + $0x80] sm:$0xff] }
 0x300   : > { %v3677_v15 = vpop.eup %3676 }
 0x301   : > { %3678 = vrcp.f32 %v943_v14  ;;  %v950_v17 = vadd.f32 1.0, %v3677_v15 }
 0x30e   : > { %v3679_v5 = vpop.eup %3678 }
 0x30f   : > { %v954_v2 = vmul.f32 %v3679_v5, %v953_v13  ;;  %v5125_v5 = vld [vmem:[#allocation18_spill] sm:$0xff]  ;;  %v963_v13 = vld [vmem:[#allocation3 + $0x70] sm:$0xff] }
 0x311   : > { %v955_v6 = vadd.f32 %v954_v2, %v797_v4  ;;  %v5123_v2 = vld [vmem:[#allocation13_spill] sm:$0xff]  ;;  %v5124_v4 = vld [vmem:[#allocation15_spill] sm:$0xff] }
 0x313   : > { %3680 = vtanh.f32 %v955_v6  ;;  %v5121_v6 = vld [vmem:[#allocation17_spill] sm:$0xff] }
 0x314   : > { %3682 = vrcp.f32 %v950_v17  ;;  %v5120_v17 = vld [vmem:[#allocation16_spill] sm:$0xff] }
 0x320   : > { %v3681_v11 = vpop.eup %3680 }
 0x321   : > { %v957_v19 = vsub.f32 %v4286_v63, %v3681_v11  ;;  %v3683_v0 = vpop.eup %3682  ;;  %v5122_v63 = vld [vmem:[#allocation14_spill] sm:$0xff] }
 0x323   : > { %v958_v3 = vmul.f32 %v3683_v0, %v957_v19 }
 0x325   : > { %v4359_v7 = vadd.f32 %v3681_v11, %v958_v3 }
 0x327   : > { %1031 = vmatmul.mubr.f32.vlgmr.msra.gmra.mxu0 %v4359_v7  ;;  %3262 = vmatmul.mubr.f32.vlgmr.msra.gmra.mxu1 %v4359_v7 }
 0x328   : > { %1135 = vmatpush1.msra.mxu0 %v4127_v59  ;;  %3265 = vmatpush3.msra.mxu1 %v4131_v61 }
 0x329   : > { %1136 = vmatprep.subr.mxu0 %v4123_v57  ;;  %3266 = vmatprep.subr.mxu1 %v5115_v60 }
 0x32a   : > { %1137 = vmatpush1.msra.mxu0 %v4121_v56  ;;  %3267 = vmatpush3.msra.mxu1 %v4125_v58 }
 0x32b   : > { %1138 = vmatprep.subr.mxu0 %v4117_v54  ;;  %3268 = vmatprep.subr.mxu1 %v5115_v60 }
 0x32c   : > { %1139 = vmatpush1.msra.mxu0 %v4115_v53  ;;  %3269 = vmatpush3.msra.mxu1 %v4119_v55 }
 0x32d   : > { %1140 = vmatprep.subr.mxu0 %v4111_v51  ;;  %3270 = vmatprep.subr.mxu1 %v5115_v60 }
 0x32e   : > { %1141 = vmatpush1.msra.mxu0 %v4109_v50  ;;  %3271 = vmatpush3.msra.mxu1 %v4113_v52 }
 0x32f   : > { %1142 = vmatprep.subr.mxu0 %v4105_v48  ;;  %3272 = vmatprep.subr.mxu1 %v5115_v60 }
 0x330   : > { %1143 = vmatpush1.msra.mxu0 %v4103_v47  ;;  %3273 = vmatpush3.msra.mxu1 %v4107_v49 }
 0x331   : > { %1144 = vmatprep.subr.mxu0 %v4099_v45  ;;  %3274 = vmatprep.subr.mxu1 %v5115_v60 }
 0x332   : > { %1145 = vmatpush1.msra.mxu0 %v4097_v44  ;;  %3275 = vmatpush3.msra.mxu1 %v4101_v46 }
 0x333   : > { %1146 = vmatprep.subr.mxu0 %v4093_v42  ;;  %3276 = vmatprep.subr.mxu1 %v5115_v60 }
 0x334   : > { %1147 = vmatpush1.msra.mxu0 %v4091_v41  ;;  %3277 = vmatpush3.msra.mxu1 %v4095_v43 }
 0x335   : > { %1148 = vmatprep.subr.mxu0 %v4087_v39  ;;  %3278 = vmatprep.subr.mxu1 %v5115_v60 }
 0x336   : > { %1149 = vmatpush1.msra.mxu0 %v4085_v38  ;;  %3279 = vmatpush3.msra.mxu1 %v4089_v40 }
 0x337   : > { %1150 = vmatprep.subr.mxu0 %v4081_v36  ;;  %3280 = vmatprep.subr.mxu1 %v5115_v60 }
 0x338   : > { %1151 = vmatpush1.msra.mxu0 %v4079_v35  ;;  %3281 = vmatpush3.msra.mxu1 %v4083_v37 }
 0x339   : > { %1152 = vmatprep.subr.mxu0 %v4075_v33  ;;  %3282 = vmatprep.subr.mxu1 %v5115_v60 }
 0x33a   : > { %1153 = vmatpush1.msra.mxu0 %v4073_v32  ;;  %3283 = vmatpush3.msra.mxu1 %v4077_v34 }
 0x33b   : > { %1154 = vmatprep.subr.mxu0 %v4069_v30  ;;  %3284 = vmatprep.subr.mxu1 %v5115_v60 }
 0x33c   : > { %1155 = vmatpush1.msra.mxu0 %v4067_v29  ;;  %3285 = vmatpush3.msra.mxu1 %v4071_v31 }
 0x33d   : > { %1156 = vmatprep.subr.mxu0 %v4063_v27  ;;  %3286 = vmatprep.subr.mxu1 %v5115_v60 }
 0x33e   : > { %1157 = vmatpush1.msra.mxu0 %v4061_v26  ;;  %3287 = vmatpush3.msra.mxu1 %v4065_v28 }
 0x33f   : > { %1158 = vmatprep.subr.mxu0 %v4057_v24  ;;  %3288 = vmatprep.subr.mxu1 %v5115_v60 }
 0x340   : > { %1159 = vmatpush1.msra.mxu0 %v4055_v23  ;;  %3289 = vmatpush3.msra.mxu1 %v4059_v25 }
 0x341   : > { %1160 = vmatprep.subr.mxu0 %v4051_v21  ;;  %3290 = vmatprep.subr.mxu1 %v5115_v60 }
 0x342   : > { %1161 = vmatpush1.msra.mxu0 %v4049_v20  ;;  %3291 = vmatpush3.msra.mxu1 %v4053_v22 }
 0x343   : > { %1162 = vmatprep.subr.mxu0 %v4045_v18  ;;  %3292 = vmatprep.subr.mxu1 %v5115_v60 }
 0x344   : > { %1163 = vmatpush1.msra.mxu0 %v5120_v17  ;;  %3293 = vmatpush3.msra.mxu1 %v5121_v6 }
 0x345   : > { %1164 = vmatprep.subr.mxu0 %v5122_v63  ;;  %3294 = vmatprep.subr.mxu1 %v5115_v60 }
 0x346   : > { %1165 = vmatpush1.msra.mxu0 %v5123_v2  ;;  %1198 = vmatprep.mubr.f32.mxu0 %v5115_v60  ;;  %v965_v2 = vld [vmem:[#allocation3 + $0x88] sm:$0xff] }
 0x347   : > { %3295 = vmatpush3.msra.mxu1 %v5124_v4  ;;  %3296 = vmatprep.mubr.msk.f32.mxu1 %vm3893_vm1, %v5115_v60 }
 0x348   : > { %1302 = vmatprep.subr.mxu0 %v5125_v5  ;;  %3299 = vmatprep.subr.mxu1 %v5115_v60 }
 0x3e7   : > { %v1032_v1 = vpop.f32.mrf.mxu0  ;;  %v1103_v8 = vpop.f32.mrf.mxu1 }
 0x3e8   : > { %v1107_v10 = vadd.f32 %v1032_v1, %v963_v13  ;;  %v1121_v5 = vadd.f32 %v5114_v9, %v1103_v8 }
 0x3e9   : > { %v3263_v62 = vpop.f32.mrf.mxu1  ;;  %v1034_v14 = vpop.f32.mrf.mxu0 }
 0x3ea   : > { %v2890_v16 = vmul.f32 -1.442695, %v1107_v10  ;;  %v1114_v15 = vadd.f32 %v1034_v14, %v964_v12 }
 0x3ec   : > { %3684 = vpow2.f32 %v2890_v16  ;;  %v2891_v11 = vmul.f32 -1.442695, %v1114_v15 }
 0x3ee   : > { %3686 = vpow2.f32 %v2891_v11 }
 0x3f9   : > { %v3685_v19 = vpop.eup %3684 }
 0x3fa   : > { %v1111_v0 = vadd.f32 1.0, %v3685_v19  ;;  %v1132_v19 = vld [vmem:[#allocation3 + $0x50] sm:$0xff] }
 0x3fb   : > { %v3687_v3 = vpop.eup %3686 }
 0x3fc   : > { %3688 = vrcp.f32 %v1111_v0  ;;  %v1118_v17 = vadd.f32 1.0, %v3687_v3 }
 0x409   : > { %v3689_v4 = vpop.eup %3688 }
 0x40a   : > { %v1122_v63 = vmul.f32 %v3689_v4, %v1121_v5  ;;  %v5131_v4 = vld [vmem:[#allocation18_spill] sm:$0xff] }
 0x40b   : > { %v1131_v5 = vld [vmem:[#allocation3 + $0x40] sm:$0xff] }
 0x40c   : > { %v1123_v6 = vadd.f32 %v1122_v63, %v965_v2  ;;  %v5129_v63 = vld [vmem:[#allocation13_spill] sm:$0xff]  ;;  %v5130_v2 = vld [vmem:[#allocation15_spill] sm:$0xff] }
 0x40e   : > { %3690 = vtanh.f32 %v1123_v6  ;;  %v5128_v6 = vld [vmem:[#allocation14_spill] sm:$0xff] }
 0x40f   : > { %3692 = vrcp.f32 %v1118_v17  ;;  %v5127_v17 = vld [vmem:[#allocation17_spill] sm:$0xff] }
 0x41b   : > { %v3691_v13 = vpop.eup %3690 }
 0x41c   : > { %v1125_v1 = vsub.f32 %v4359_v7, %v3691_v13  ;;  %v3693_v10 = vpop.eup %3692  ;;  %v5126_v7 = vld [vmem:[#allocation16_spill] sm:$0xff] }
 0x41e   : > { %v1126_v62 = vmul.f32 %v3693_v10, %v1125_v1 }
 0x420   : > { %v4432_v16 = vadd.f32 %v3691_v13, %v1126_v62 }
 0x422   : > { %1199 = vmatmul.mubr.f32.vlgmr.msra.gmra.mxu0 %v4432_v16  ;;  %3297 = vmatmul.mubr.f32.vlgmr.msra.gmra.mxu1 %v4432_v16 }
 0x423   : > { %1303 = vmatpush1.msra.mxu0 %v4127_v59  ;;  %3300 = vmatpush3.msra.mxu1 %v4131_v61 }
 0x424   : > { %1304 = vmatprep.subr.mxu0 %v4123_v57  ;;  %3301 = vmatprep.subr.mxu1 %v5115_v60 }
 0x425   : > { %1305 = vmatpush1.msra.mxu0 %v4121_v56  ;;  %3302 = vmatpush3.msra.mxu1 %v4125_v58 }
 0x426   : > { %1306 = vmatprep.subr.mxu0 %v4117_v54  ;;  %3303 = vmatprep.subr.mxu1 %v5115_v60 }
 0x427   : > { %1307 = vmatpush1.msra.mxu0 %v4115_v53  ;;  %3304 = vmatpush3.msra.mxu1 %v4119_v55 }
 0x428   : > { %1308 = vmatprep.subr.mxu0 %v4111_v51  ;;  %3305 = vmatprep.subr.mxu1 %v5115_v60 }
 0x429   : > { %1309 = vmatpush1.msra.mxu0 %v4109_v50  ;;  %3306 = vmatpush3.msra.mxu1 %v4113_v52 }
 0x42a   : > { %1310 = vmatprep.subr.mxu0 %v4105_v48  ;;  %3307 = vmatprep.subr.mxu1 %v5115_v60 }
 0x42b   : > { %1311 = vmatpush1.msra.mxu0 %v4103_v47  ;;  %3308 = vmatpush3.msra.mxu1 %v4107_v49 }
 0x42c   : > { %1312 = vmatprep.subr.mxu0 %v4099_v45  ;;  %3309 = vmatprep.subr.mxu1 %v5115_v60 }
 0x42d   : > { %1313 = vmatpush1.msra.mxu0 %v4097_v44  ;;  %3310 = vmatpush3.msra.mxu1 %v4101_v46 }
 0x42e   : > { %1314 = vmatprep.subr.mxu0 %v4093_v42  ;;  %3311 = vmatprep.subr.mxu1 %v5115_v60 }
 0x42f   : > { %1315 = vmatpush1.msra.mxu0 %v4091_v41  ;;  %3312 = vmatpush3.msra.mxu1 %v4095_v43 }
 0x430   : > { %1316 = vmatprep.subr.mxu0 %v4087_v39  ;;  %3313 = vmatprep.subr.mxu1 %v5115_v60 }
 0x431   : > { %1317 = vmatpush1.msra.mxu0 %v4085_v38  ;;  %3314 = vmatpush3.msra.mxu1 %v4089_v40 }
 0x432   : > { %1318 = vmatprep.subr.mxu0 %v4081_v36  ;;  %3315 = vmatprep.subr.mxu1 %v5115_v60 }
 0x433   : > { %1319 = vmatpush1.msra.mxu0 %v4079_v35  ;;  %3316 = vmatpush3.msra.mxu1 %v4083_v37 }
 0x434   : > { %1320 = vmatprep.subr.mxu0 %v4075_v33  ;;  %3317 = vmatprep.subr.mxu1 %v5115_v60 }
 0x435   : > { %1321 = vmatpush1.msra.mxu0 %v4073_v32  ;;  %3318 = vmatpush3.msra.mxu1 %v4077_v34 }
 0x436   : > { %1322 = vmatprep.subr.mxu0 %v4069_v30  ;;  %3319 = vmatprep.subr.mxu1 %v5115_v60 }
 0x437   : > { %1323 = vmatpush1.msra.mxu0 %v4067_v29  ;;  %3320 = vmatpush3.msra.mxu1 %v4071_v31 }
 0x438   : > { %1324 = vmatprep.subr.mxu0 %v4063_v27  ;;  %3321 = vmatprep.subr.mxu1 %v5115_v60 }
 0x439   : > { %1325 = vmatpush1.msra.mxu0 %v4061_v26  ;;  %3322 = vmatpush3.msra.mxu1 %v4065_v28 }
 0x43a   : > { %1326 = vmatprep.subr.mxu0 %v4057_v24  ;;  %3323 = vmatprep.subr.mxu1 %v5115_v60 }
 0x43b   : > { %1327 = vmatpush1.msra.mxu0 %v4055_v23  ;;  %3324 = vmatpush3.msra.mxu1 %v4059_v25 }
 0x43c   : > { %1328 = vmatprep.subr.mxu0 %v4051_v21  ;;  %3325 = vmatprep.subr.mxu1 %v5115_v60 }
 0x43d   : > { %1329 = vmatpush1.msra.mxu0 %v4049_v20  ;;  %3326 = vmatpush3.msra.mxu1 %v4053_v22 }
 0x43e   : > { %1330 = vmatprep.subr.mxu0 %v4045_v18  ;;  %3327 = vmatprep.subr.mxu1 %v5115_v60 }
 0x43f   : > { %1331 = vmatpush1.msra.mxu0 %v5126_v7  ;;  %3328 = vmatpush3.msra.mxu1 %v5127_v17 }
 0x440   : > { %1332 = vmatprep.subr.mxu0 %v5128_v6  ;;  %3329 = vmatprep.subr.mxu1 %v5115_v60 }
 0x441   : > { %1333 = vmatpush1.msra.mxu0 %v5129_v63  ;;  %1366 = vmatprep.mubr.f32.mxu0 %v5115_v60  ;;  %v1133_v63 = vld [vmem:[#allocation3 + $0x28] sm:$0xff] }
 0x442   : > { %3330 = vmatpush3.msra.mxu1 %v5130_v2  ;;  %3331 = vmatprep.mubr.msk.f32.mxu1 %vm3893_vm1, %v5115_v60 }
 0x443   : > { %1470 = vmatprep.subr.mxu0 %v5131_v4  ;;  %3334 = vmatprep.subr.mxu1 %v5115_v60 }
 0x4e2   : > { %v1200_v8 = vpop.f32.mrf.mxu0  ;;  %v1271_v12 = vpop.f32.mrf.mxu1 }
 0x4e3   : > { %v1275_v14 = vadd.f32 %v1200_v8, %v1131_v5  ;;  %v1289_v4 = vadd.f32 %v5114_v9, %v1271_v12 }
 0x4e4   : > { %v3298_v15 = vpop.f32.mrf.mxu1  ;;  %v1202_v0 = vpop.f32.mrf.mxu0 }
 0x4e5   : > { %v2892_v11 = vmul.f32 -1.442695, %v1275_v14  ;;  %v1282_v3 = vadd.f32 %v1202_v0, %v1132_v19 }
 0x4e7   : > { %3694 = vpow2.f32 %v2892_v11  ;;  %v2893_v13 = vmul.f32 -1.442695, %v1282_v3 }
 0x4e9   : > { %3696 = vpow2.f32 %v2893_v13 }
 0x4f4   : > { %v3695_v1 = vpop.eup %3694 }
 0x4f5   : > { %v1279_v10 = vadd.f32 1.0, %v3695_v1  ;;  %v1300_v1 = vld [vmem:[#allocation3 + $0x48] sm:$0xff] }
 0x4f6   : > { %v3697_v62 = vpop.eup %3696 }
 0x4f7   : > { %3698 = vrcp.f32 %v1279_v10  ;;  %v1286_v7 = vadd.f32 1.0, %v3697_v62 }
 0x504   : > { %v3699_v2 = vpop.eup %3698 }
 0x505   : > { %v1290_v6 = vmul.f32 %v3699_v2, %v1289_v4  ;;  %v1299_v2 = vld [vmem:[#allocation3 + $0x10] sm:$0xff] }
 0x507   : > { %v1291_v17 = vadd.f32 %v1290_v6, %v1133_v63  ;;  %v5135_v6 = vld [vmem:[#allocation13_spill] sm:$0xff]  ;;  %v5136_v63 = vld [vmem:[#allocation15_spill] sm:$0xff] }
 0x509   : > { %3700 = vtanh.f32 %v1291_v17  ;;  %v5134_v17 = vld [vmem:[#allocation14_spill] sm:$0xff] }
 0x50a   : > { %3702 = vrcp.f32 %v1286_v7  ;;  %v5133_v7 = vld [vmem:[#allocation17_spill] sm:$0xff] }
 0x516   : > { %v3701_v5 = vpop.eup %3700 }
 0x517   : > { %v1293_v8 = vsub.f32 %v4432_v16, %v3701_v5  ;;  %v3703_v14 = vpop.eup %3702  ;;  %v5132_v16 = vld [vmem:[#allocation16_spill] sm:$0xff] }
 0x519   : > { %v1294_v15 = vmul.f32 %v3703_v14, %v1293_v8 }
 0x51b   : > { %v4505_v11 = vadd.f32 %v3701_v5, %v1294_v15 }
 0x51d   : > { %1367 = vmatmul.mubr.f32.vlgmr.msra.gmra.mxu0 %v4505_v11  ;;  %3332 = vmatmul.mubr.f32.vlgmr.msra.gmra.mxu1 %v4505_v11 }
 0x51e   : > { %1471 = vmatpush1.msra.mxu0 %v4127_v59  ;;  %3335 = vmatpush3.msra.mxu1 %v4131_v61 }
 0x51f   : > { %1472 = vmatprep.subr.mxu0 %v4123_v57  ;;  %3336 = vmatprep.subr.mxu1 %v5115_v60 }
 0x520   : > { %1473 = vmatpush1.msra.mxu0 %v4121_v56  ;;  %3337 = vmatpush3.msra.mxu1 %v4125_v58 }
 0x521   : > { %1474 = vmatprep.subr.mxu0 %v4117_v54  ;;  %3338 = vmatprep.subr.mxu1 %v5115_v60 }
 0x522   : > { %1475 = vmatpush1.msra.mxu0 %v4115_v53  ;;  %3339 = vmatpush3.msra.mxu1 %v4119_v55 }
 0x523   : > { %1476 = vmatprep.subr.mxu0 %v4111_v51  ;;  %3340 = vmatprep.subr.mxu1 %v5115_v60 }
 0x524   : > { %1477 = vmatpush1.msra.mxu0 %v4109_v50  ;;  %3341 = vmatpush3.msra.mxu1 %v4113_v52 }
 0x525   : > { %1478 = vmatprep.subr.mxu0 %v4105_v48  ;;  %3342 = vmatprep.subr.mxu1 %v5115_v60 }
 0x526   : > { %1479 = vmatpush1.msra.mxu0 %v4103_v47  ;;  %3343 = vmatpush3.msra.mxu1 %v4107_v49 }
 0x527   : > { %1480 = vmatprep.subr.mxu0 %v4099_v45  ;;  %3344 = vmatprep.subr.mxu1 %v5115_v60 }
 0x528   : > { %1481 = vmatpush1.msra.mxu0 %v4097_v44  ;;  %3345 = vmatpush3.msra.mxu1 %v4101_v46 }
 0x529   : > { %1482 = vmatprep.subr.mxu0 %v4093_v42  ;;  %3346 = vmatprep.subr.mxu1 %v5115_v60 }
 0x52a   : > { %1483 = vmatpush1.msra.mxu0 %v4091_v41  ;;  %3347 = vmatpush3.msra.mxu1 %v4095_v43 }
 0x52b   : > { %1484 = vmatprep.subr.mxu0 %v4087_v39  ;;  %3348 = vmatprep.subr.mxu1 %v5115_v60 }
 0x52c   : > { %1485 = vmatpush1.msra.mxu0 %v4085_v38  ;;  %3349 = vmatpush3.msra.mxu1 %v4089_v40 }
 0x52d   : > { %1486 = vmatprep.subr.mxu0 %v4081_v36  ;;  %3350 = vmatprep.subr.mxu1 %v5115_v60 }
 0x52e   : > { %1487 = vmatpush1.msra.mxu0 %v4079_v35  ;;  %3351 = vmatpush3.msra.mxu1 %v4083_v37 }
 0x52f   : > { %1488 = vmatprep.subr.mxu0 %v4075_v33  ;;  %3352 = vmatprep.subr.mxu1 %v5115_v60 }
 0x530   : > { %1489 = vmatpush1.msra.mxu0 %v4073_v32  ;;  %3353 = vmatpush3.msra.mxu1 %v4077_v34 }
 0x531   : > { %1490 = vmatprep.subr.mxu0 %v4069_v30  ;;  %3354 = vmatprep.subr.mxu1 %v5115_v60 }
 0x532   : > { %1491 = vmatpush1.msra.mxu0 %v4067_v29  ;;  %3355 = vmatpush3.msra.mxu1 %v4071_v31 }
 0x533   : > { %1492 = vmatprep.subr.mxu0 %v4063_v27  ;;  %3356 = vmatprep.subr.mxu1 %v5115_v60 }
 0x534   : > { %1493 = vmatpush1.msra.mxu0 %v4061_v26  ;;  %3357 = vmatpush3.msra.mxu1 %v4065_v28 }
 0x535   : > { %1494 = vmatprep.subr.mxu0 %v4057_v24  ;;  %3358 = vmatprep.subr.mxu1 %v5115_v60 }
 0x536   : > { %1495 = vmatpush1.msra.mxu0 %v4055_v23  ;;  %3359 = vmatpush3.msra.mxu1 %v4059_v25 }
 0x537   : > { %1496 = vmatprep.subr.mxu0 %v4051_v21  ;;  %3360 = vmatprep.subr.mxu1 %v5115_v60 }
 0x538   : > { %1497 = vmatpush1.msra.mxu0 %v4049_v20  ;;  %3361 = vmatpush3.msra.mxu1 %v4053_v22 }
 0x539   : > { %1498 = vmatprep.subr.mxu0 %v4045_v18  ;;  %3362 = vmatprep.subr.mxu1 %v5115_v60 }
 0x53a   : > { %1499 = vmatpush1.msra.mxu0 %v5132_v16  ;;  %3363 = vmatpush3.msra.mxu1 %v5133_v7 }
 0x53b   : > { %1500 = vmatprep.subr.mxu0 %v5134_v17  ;;  %3364 = vmatprep.subr.mxu1 %v5115_v60 }
 0x53c   : > { %1501 = vmatpush1.msra.mxu0 %v5135_v6  ;;  %1534 = vmatprep.mubr.f32.mxu0 %v5115_v60 }
 0x53d   : > { %3365 = vmatpush3.msra.mxu1 %v5136_v63  ;;  %3366 = vmatprep.mubr.msk.f32.mxu1 %vm3893_vm1, %v5115_v60  ;;  %v1301_v60 = vld [vmem:[#allocation3 + $0x30] sm:$0xff] }
 0x5dd   : > { %v1368_v12 = vpop.f32.mrf.mxu0  ;;  %v1439_v19 = vpop.f32.mrf.mxu1 }
 0x5de   : > { %v1443_v0 = vadd.f32 %v1368_v12, %v1299_v2  ;;  %v1457_v15 = vadd.f32 %v5114_v9, %v1439_v19 }
 0x5df   : > { %v3333_v3 = vpop.f32.mrf.mxu1  ;;  %v1370_v10 = vpop.f32.mrf.mxu0 }
 0x5e0   : > { %v2894_v13 = vmul.f32 -1.442695, %v1443_v0  ;;  %v1450_v62 = vadd.f32 %v1370_v10, %v1300_v1 }
 0x5e2   : > { %3704 = vpow2.f32 %v2894_v13  ;;  %v2895_v4 = vmul.f32 -1.442695, %v1450_v62  ;;  %v1467_v13 = vld [vmem:[#allocation3 + $0x18] sm:$0xff] }
 0x5e4   : > { %3706 = vpow2.f32 %v2895_v4 }
 0x5ef   : > { %v3705_v5 = vpop.eup %3704 }
 0x5f0   : > { %v1447_v8 = vadd.f32 1.0, %v3705_v5  ;;  %v1468_v5 = vld [vmem:[#allocation3 + $0x68] sm:$0xff] }
 0x5f1   : > { %v3707_v14 = vpop.eup %3706 }
 0x5f2   : > { %3708 = vrcp.f32 %v1447_v8  ;;  %v1454_v6 = vadd.f32 1.0, %v3707_v14 }
 0x5ff   : > { %v3709_v16 = vpop.eup %3708 }
 0x600   : > { %v1458_v7 = vmul.f32 %v3709_v16, %v1457_v15 }
 0x602   : > { %v1459_v17 = vadd.f32 %v1458_v7, %v1301_v60 }
 0x604   : > { %3710 = vtanh.f32 %v1459_v17 }
 0x605   : > { %3712 = vrcp.f32 %v1454_v6  ;;  %v1469_v6 = vld [vmem:[#allocation3 + $0x60] sm:$0xff] }
 0x611   : > { %v3711_v63 = vpop.eup %3710 }
 0x612   : > { %v1461_v2 = vsub.f32 %v4505_v11, %v3711_v63  ;;  %v3713_v12 = vpop.eup %3712 }
 0x614   : > { %v1462_v0 = vmul.f32 %v3713_v12, %v1461_v2 }
 0x616   : > { %v1463_v3 = vadd.f32 %v3711_v63, %v1462_v0 }
 0x618   : > { %1535 = vmatmul.mubr.f32.vlgmr.msra.gmra.mxu0 %v1463_v3  ;;  %3367 = vmatmul.mubr.f32.vlgmr.msra.gmra.mxu1 %v1463_v3 }
 0x6d8   : > { %v1536_v1 = vpop.f32.mrf.mxu0  ;;  %v1607_v10 = vpop.f32.mrf.mxu1 }
 0x6d9   : > { %v1611_v62 = vadd.f32 %v1536_v1, %v1467_v13  ;;  %v1625_v7 = vadd.f32 %v5114_v9, %v1607_v10 }
 0x6da   : > { %v3368_v19 = vpop.f32.mrf.mxu1  ;;  %v1538_v8 = vpop.f32.mrf.mxu0 }
 0x6db   : > { %v2896_v4 = vmul.f32 -1.442695, %v1611_v62  ;;  %v1618_v14 = vadd.f32 %v1538_v8, %v1468_v5 }
 0x6dd   : > { %3714 = vpow2.f32 %v2896_v4  ;;  %v2897_v15 = vmul.f32 -1.442695, %v1618_v14 }
 0x6df   : > { %3716 = vpow2.f32 %v2897_v15 }
 0x6ea   : > { %v3715_v16 = vpop.eup %3714 }
 0x6eb   : > { %v1615_v60 = vadd.f32 1.0, %v3715_v16 }
 0x6ec   : > { %v3717_v11 = vpop.eup %3716 }
 0x6ed   : > { %3718 = vrcp.f32 %v1615_v60  ;;  %v1622_v12 = vadd.f32 1.0, %v3717_v11 }
 0x6fa   : > { %v3719_v17 = vpop.eup %3718 }
 0x6fb   : > { %v1626_v63 = vmul.f32 %v3719_v17, %v1625_v7 }
 0x6fd   : > { %v1627_v2 = vadd.f32 %v1626_v63, %v1469_v6 }
 0x6ff   : > { %3720 = vtanh.f32 %v1627_v2 }
 0x700   : > { %3722 = vrcp.f32 %v1622_v12 }
 0x70c   : > { %v3721_v0 = vpop.eup %3720 }
 0x70d   : > { %v1629_v13 = vsub.f32 %v1463_v3, %v3721_v0  ;;  %v3723_v1 = vpop.eup %3722 }
 0x70f   : > { %v1630_v62 = vmul.f32 %v3723_v1, %v1629_v13 }
 0x711   : > { %v1631_v19 = vadd.f32 %v3721_v0, %v1630_v62 }
 0x713   : > { %1632 = vst [vmem:[#allocation2] sm:$0xff] %v1631_v19 }
 0x714 PF: > { %p2898_p6 = scmp.ne.s32.totalorder %s3943_s27, 1 }
 0x715   : > { %p1807_p7 = scmp.lt.s32.totalorder (!%p2898_p6), %s3990_s19, 8  ;;  %s1980_s22 = sadd.s32 (!%p2898_p6), 1, %s3990_s19 }
 0x716   : > { %1636 = sbr.rel (%p2898_p6) target bundleno = 3592 (0xe08), region = 68  ;;  %p1981_p12 = scmp.lt.s32.totalorder (!%p2898_p6), %s1980_s22, 8 }
 0x717   : > { %s2154_s25 = sadd.s32 (!%p2898_p6), 2, %s3990_s19  ;;  %s2328_s28 = sadd.s32 (!%p2898_p6), 3, %s3990_s19 }
 0x718   : > { %p2155_p13 = scmp.lt.s32.totalorder (!%p2898_p6), %s2154_s25, 8  ;;  %p2329_p0 = scmp.lt.s32.totalorder (!%p2898_p6), %s2328_s28, 8 }
 0x719   : > { %s2502_s30 = sadd.s32 (!%p2898_p6), 4, %s3990_s19  ;;  %s2676_s9 = sadd.s32 (!%p2898_p6), 5, %s3990_s19 }
 0x71a   : > { %p2503_p1 = scmp.lt.s32.totalorder (!%p2898_p6), %s2502_s30, 8  ;;  %p2677_p5 = scmp.lt.s32.totalorder (!%p2898_p6), %s2676_s9, 8 }
 0x71b   : > { %v5137_v4 = vld [vmem:[#allocation18_spill] sm:$0xff]  ;;  %v5094_v9 = vmov 0.0   ;;  %v5138_v3 = vld [vmem:[#allocation16_spill] sm:$0xff]  ;;  %v4636_v10 = vld [vmem:[#allocation2] sm:$0xff]  ;;  %vm3895_vm2 = vmmov 0  }
 0x71c   : > { %1644 = vmatprep.subr.mxu0 %v5137_v4  ;;  %3369 = vmatprep.subr.mxu1 %v5094_v9  ;;  %v5139_v5 = vld [vmem:[#allocation14_spill] sm:$0xff]  ;;  %v5140_v8 = vld [vmem:[#allocation13_spill] sm:$0xff]  ;;  %v5142_v15 = vld [vmem:[#allocation15_spill] sm:$0xff]  ;;  %s1808_s21 = scalar_select %p1807_p7, 1, 0 }
 0x71d   : > { %1645 = vmatpush1.msra.mxu0 %v4127_v59  ;;  %1708 = vmatprep.mubr.f32.mxu0 %v5094_v9  ;;  %v5141_v14 = vld [vmem:[#allocation17_spill] sm:$0xff]  ;;  %v1641_v16 = vld [vmem:[#allocation3] sm:$0xff]  ;;  %v5143_v62 = vld [vmem:[#allocation19_spill] sm:$0xff]  ;;  %s1982_s23 = scalar_select %p1981_p12, 1, 0 }
 0x71e   : > { %1646 = vmatprep.subr.mxu0 %v4123_v57  ;;  %3370 = vmatpush3.msra.mxu1 %v4131_v61  ;;  %v1642_v63 = vld [vmem:[#allocation3 + $0x38] sm:$0xff]  ;;  %s2156_s26 = scalar_select %p2155_p13, 1, 0 }
 0x71f   : > { %1647 = vmatpush1.msra.mxu0 %v4121_v56  ;;  %3371 = vmatprep.subr.mxu1 %v5094_v9  ;;  %s2330_s29 = scalar_select %p2329_p0, 1, 0 }
 0x720   : > { %1648 = vmatprep.subr.mxu0 %v4117_v54  ;;  %3372 = vmatpush3.msra.mxu1 %v4125_v58  ;;  %s2504_s8 = scalar_select %p2503_p1, 1, 0 }
 0x721   : > { %1649 = vmatpush1.msra.mxu0 %v4115_v53  ;;  %3373 = vmatprep.subr.mxu1 %v5094_v9  ;;  %s2678_s10 = scalar_select %p2677_p5, 1, 0 }
 0x722   : > { %1650 = vmatprep.subr.mxu0 %v4111_v51  ;;  %3374 = vmatpush3.msra.mxu1 %v4119_v55 }
 0x723   : > { %1651 = vmatpush1.msra.mxu0 %v4109_v50  ;;  %3375 = vmatprep.subr.mxu1 %v5094_v9 }
 0x724   : > { %1652 = vmatprep.subr.mxu0 %v4105_v48  ;;  %3376 = vmatpush3.msra.mxu1 %v4113_v52 }
 0x725   : > { %1653 = vmatpush1.msra.mxu0 %v4103_v47  ;;  %3377 = vmatprep.subr.mxu1 %v5094_v9 }
 0x726   : > { %1654 = vmatprep.subr.mxu0 %v4099_v45  ;;  %3378 = vmatpush3.msra.mxu1 %v4107_v49 }
 0x727   : > { %1655 = vmatpush1.msra.mxu0 %v4097_v44  ;;  %3379 = vmatprep.subr.mxu1 %v5094_v9 }
 0x728   : > { %1656 = vmatprep.subr.mxu0 %v4093_v42  ;;  %3380 = vmatpush3.msra.mxu1 %v4101_v46 }
 0x729   : > { %1657 = vmatpush1.msra.mxu0 %v4091_v41  ;;  %3381 = vmatprep.subr.mxu1 %v5094_v9 }
 0x72a   : > { %1658 = vmatprep.subr.mxu0 %v4087_v39  ;;  %3382 = vmatpush3.msra.mxu1 %v4095_v43 }
 0x72b   : > { %1659 = vmatpush1.msra.mxu0 %v4085_v38  ;;  %3383 = vmatprep.subr.mxu1 %v5094_v9 }
 0x72c   : > { %1660 = vmatprep.subr.mxu0 %v4081_v36  ;;  %3384 = vmatpush3.msra.mxu1 %v4089_v40 }
 0x72d   : > { %1661 = vmatpush1.msra.mxu0 %v4079_v35  ;;  %3385 = vmatprep.subr.mxu1 %v5094_v9 }
 0x72e   : > { %1662 = vmatprep.subr.mxu0 %v4075_v33  ;;  %3386 = vmatpush3.msra.mxu1 %v4083_v37 }
 0x72f   : > { %1663 = vmatpush1.msra.mxu0 %v4073_v32  ;;  %3387 = vmatprep.subr.mxu1 %v5094_v9 }
 0x730   : > { %1664 = vmatprep.subr.mxu0 %v4069_v30  ;;  %3388 = vmatpush3.msra.mxu1 %v4077_v34 }
 0x731   : > { %1665 = vmatpush1.msra.mxu0 %v4067_v29  ;;  %3389 = vmatprep.subr.mxu1 %v5094_v9 }
 0x732   : > { %1666 = vmatprep.subr.mxu0 %v4063_v27  ;;  %3390 = vmatpush3.msra.mxu1 %v4071_v31 }
 0x733   : > { %1667 = vmatpush1.msra.mxu0 %v4061_v26  ;;  %3391 = vmatprep.subr.mxu1 %v5094_v9 }
 0x734   : > { %1668 = vmatprep.subr.mxu0 %v4057_v24  ;;  %3392 = vmatpush3.msra.mxu1 %v4065_v28 }
 0x735   : > { %1669 = vmatpush1.msra.mxu0 %v4055_v23  ;;  %3393 = vmatprep.subr.mxu1 %v5094_v9 }
 0x736   : > { %1670 = vmatprep.subr.mxu0 %v4051_v21  ;;  %3394 = vmatpush3.msra.mxu1 %v4059_v25 }
 0x737   : > { %1671 = vmatpush1.msra.mxu0 %v4049_v20  ;;  %3395 = vmatprep.subr.mxu1 %v5094_v9 }
 0x738   : > { %1672 = vmatprep.subr.mxu0 %v4045_v18  ;;  %3396 = vmatpush3.msra.mxu1 %v4053_v22 }
 0x739   : > { %1673 = vmatpush1.msra.mxu0 %v5138_v3  ;;  %3397 = vmatprep.subr.mxu1 %v5094_v9 }
 0x73a   : > { %1674 = vmatprep.subr.mxu0 %v5139_v5  ;;  %3398 = vmatpush3.msra.mxu1 %v5141_v14 }
 0x73b   : > { %1675 = vmatpush1.msra.mxu0 %v5140_v8  ;;  %3399 = vmatprep.subr.mxu1 %v5094_v9 }
 0x73c   : > { %1709 = vmatmul.mubr.f32.vlgmr.msra.gmra.mxu0 %v4636_v10  ;;  %3400 = vmatpush3.msra.mxu1 %v5142_v15 }
 0x73d   : > { %3401 = vmatprep.mubr.msk.f32.mxu1 %vm3895_vm2, %v5094_v9  ;;  %1818 = vmatprep.subr.mxu0 %v5137_v4 }
 0x73e   : > { %3402 = vmatmul.mubr.f32.vlgmr.msra.gmra.mxu1 %v4636_v10  ;;  %3404 = vmatprep.subr.mxu1 %v5094_v9 }
 0x73f   : > { %1819 = vmatpush1.msra.mxu0 %v4127_v59  ;;  %3405 = vmatpush3.msra.mxu1 %v4131_v61 }
 0x740   : > { %1820 = vmatprep.subr.mxu0 %v4123_v57  ;;  %3406 = vmatprep.subr.mxu1 %v5094_v9 }
 0x741   : > { %1821 = vmatpush1.msra.mxu0 %v4121_v56  ;;  %3407 = vmatpush3.msra.mxu1 %v4125_v58 }
 0x742   : > { %1822 = vmatprep.subr.mxu0 %v4117_v54  ;;  %3408 = vmatprep.subr.mxu1 %v5094_v9 }
 0x743   : > { %1823 = vmatpush1.msra.mxu0 %v4115_v53  ;;  %3409 = vmatpush3.msra.mxu1 %v4119_v55 }
 0x744   : > { %1824 = vmatprep.subr.mxu0 %v4111_v51  ;;  %3410 = vmatprep.subr.mxu1 %v5094_v9 }
 0x745   : > { %1825 = vmatpush1.msra.mxu0 %v4109_v50  ;;  %3411 = vmatpush3.msra.mxu1 %v4113_v52 }
 0x746   : > { %1826 = vmatprep.subr.mxu0 %v4105_v48  ;;  %3412 = vmatprep.subr.mxu1 %v5094_v9 }
 0x747   : > { %1827 = vmatpush1.msra.mxu0 %v4103_v47  ;;  %3413 = vmatpush3.msra.mxu1 %v4107_v49 }
 0x748   : > { %1828 = vmatprep.subr.mxu0 %v4099_v45  ;;  %3414 = vmatprep.subr.mxu1 %v5094_v9 }
 0x749   : > { %1829 = vmatpush1.msra.mxu0 %v4097_v44  ;;  %3415 = vmatpush3.msra.mxu1 %v4101_v46 }
 0x74a   : > { %1830 = vmatprep.subr.mxu0 %v4093_v42  ;;  %3416 = vmatprep.subr.mxu1 %v5094_v9 }
 0x74b   : > { %1831 = vmatpush1.msra.mxu0 %v4091_v41  ;;  %3417 = vmatpush3.msra.mxu1 %v4095_v43 }
 0x74c   : > { %1832 = vmatprep.subr.mxu0 %v4087_v39  ;;  %3418 = vmatprep.subr.mxu1 %v5094_v9 }
 0x74d   : > { %1833 = vmatpush1.msra.mxu0 %v4085_v38  ;;  %3419 = vmatpush3.msra.mxu1 %v4089_v40 }
 0x74e   : > { %1834 = vmatprep.subr.mxu0 %v4081_v36  ;;  %3420 = vmatprep.subr.mxu1 %v5094_v9 }
 0x74f   : > { %1835 = vmatpush1.msra.mxu0 %v4079_v35  ;;  %3421 = vmatpush3.msra.mxu1 %v4083_v37 }
 0x750   : > { %1836 = vmatprep.subr.mxu0 %v4075_v33  ;;  %3422 = vmatprep.subr.mxu1 %v5094_v9 }
 0x751   : > { %1837 = vmatpush1.msra.mxu0 %v4073_v32  ;;  %3423 = vmatpush3.msra.mxu1 %v4077_v34 }
 0x752   : > { %1838 = vmatprep.subr.mxu0 %v4069_v30  ;;  %3424 = vmatprep.subr.mxu1 %v5094_v9 }
 0x753   : > { %1839 = vmatpush1.msra.mxu0 %v4067_v29  ;;  %3425 = vmatpush3.msra.mxu1 %v4071_v31 }
 0x754   : > { %1840 = vmatprep.subr.mxu0 %v4063_v27  ;;  %3426 = vmatprep.subr.mxu1 %v5094_v9 }
 0x755   : > { %1841 = vmatpush1.msra.mxu0 %v4061_v26  ;;  %3427 = vmatpush3.msra.mxu1 %v4065_v28 }
 0x756   : > { %1842 = vmatprep.subr.mxu0 %v4057_v24  ;;  %3428 = vmatprep.subr.mxu1 %v5094_v9 }
 0x757   : > { %1843 = vmatpush1.msra.mxu0 %v4055_v23  ;;  %3429 = vmatpush3.msra.mxu1 %v4059_v25 }
 0x758   : > { %1844 = vmatprep.subr.mxu0 %v4051_v21  ;;  %3430 = vmatprep.subr.mxu1 %v5094_v9 }
 0x759   : > { %1845 = vmatpush1.msra.mxu0 %v4049_v20  ;;  %3431 = vmatpush3.msra.mxu1 %v4053_v22 }
 0x75a   : > { %1846 = vmatprep.subr.mxu0 %v4045_v18  ;;  %3432 = vmatprep.subr.mxu1 %v5094_v9 }
 0x75b   : > { %1847 = vmatpush1.msra.mxu0 %v5138_v3  ;;  %3433 = vmatpush3.msra.mxu1 %v5141_v14 }
 0x75c   : > { %1848 = vmatprep.subr.mxu0 %v5139_v5  ;;  %3434 = vmatprep.subr.mxu1 %v5094_v9 }
 0x75d   : > { %1849 = vmatpush1.msra.mxu0 %v5140_v8  ;;  %1882 = vmatprep.mubr.f32.mxu0 %v5094_v9 }
 0x75e   : > { %3435 = vmatpush3.msra.mxu1 %v5142_v15  ;;  %3436 = vmatprep.mubr.msk.f32.mxu1 %vm3895_vm2, %v5094_v9  ;;  %v1643_v15 = vld [vmem:[#allocation3 + $0x78] sm:$0xff] }
 0x75f   : > { %1992 = vmatprep.subr.mxu0 %v5137_v4  ;;  %3439 = vmatprep.subr.mxu1 %v5094_v9 }
 0x7fc   : > { %v1710_v60 = vpop.f32.mrf.mxu0 }
 0x7fd   : > { %v1785_v11 = vadd.f32 %v1710_v60, %v1641_v16 }
 0x7fe   : > { %v1781_v7 = vpop.f32.mrf.mxu1  ;;  %v1712_v2 = vpop.f32.mrf.mxu0 }
 0x7ff   : > { %v2899_v17 = vmul.f32 -1.442695, %v1785_v11  ;;  %v1792_v12 = vadd.f32 %v1712_v2, %v1642_v63  ;;  %v1799_v19 = vadd.f32 %v5143_v62, %v1781_v7 }
 0x800   : > { %v3403_v6 = vpop.f32.mrf.mxu1 }
 0x801   : > { %3724 = vpow2.f32 %v2899_v17  ;;  %v2900_v0 = vmul.f32 -1.442695, %v1792_v12  ;;  %v1809_v6 = vstv %s1808_s21 }
 0x802   : > { %vm1810_vm3 = vcmp.eq.s32.totalorder %v1809_v6, 1 }
 0x803   : > { %3726 = vpow2.f32 %v2900_v0 }
 0x80e   : > { %v3725_v13 = vpop.eup %3724 }
 0x80f   : > { %v1789_v1 = vadd.f32 1.0, %v3725_v13 }
 0x810   : > { %v3727_v4 = vpop.eup %3726 }
 0x811   : > { %3728 = vrcp.f32 %v1789_v1  ;;  %v1796_v16 = vadd.f32 1.0, %v3727_v4  ;;  %v5144_v4 = vmov 0.0  }
 0x81e   : > { %v3729_v9 = vpop.eup %3728 }
 0x81f   : > { %v1800_v8 = vmul.f32 %v3729_v9, %v1799_v19  ;;  %v5145_v9 = vld [vmem:[#allocation13_spill] sm:$0xff] }
 0x821   : > { %v1801_v60 = vadd.f32 %v1800_v8, %v1643_v15  ;;  %v5147_v8 = vld [vmem:[#allocation18_spill] sm:$0xff]  ;;  %v1815_v15 = vld [vmem:[#allocation3 + $0x58] sm:$0xff] }
 0x823   : > { %3730 = vtanh.f32 %v1801_v60  ;;  %v1816_v60 = vld [vmem:[#allocation3 + $0x20] sm:$0xff] }
 0x824   : > { %3732 = vrcp.f32 %v1796_v16 }
 0x830   : > { %v3731_v11 = vpop.eup %3730 }
 0x831   : > { %v1803_v17 = vsub.f32 %v4636_v10, %v3731_v11  ;;  %v3733_v63 = vpop.eup %3732 }
 0x833   : > { %v1804_v2 = vmul.f32 %v3733_v63, %v1803_v17 }
 0x835   : > { %v1805_v12 = vadd.f32 %v3731_v11, %v1804_v2 }
 0x837   : > { %v4722_v7 = vsel %vm1810_vm3, %v1805_v12, %v4636_v10  ;;  %v5146_v10 = vld [vmem:[#allocation15_spill] sm:$0xff] }
 0x838   : > { %1883 = vmatmul.mubr.f32.vlgmr.msra.gmra.mxu0 %v4722_v7  ;;  %3437 = vmatmul.mubr.f32.vlgmr.msra.gmra.mxu1 %v4722_v7 }
 0x839   : > { %1993 = vmatpush1.msra.mxu0 %v4127_v59  ;;  %3440 = vmatpush3.msra.mxu1 %v4131_v61 }
 0x83a   : > { %1994 = vmatprep.subr.mxu0 %v4123_v57  ;;  %3441 = vmatprep.subr.mxu1 %v5144_v4 }
 0x83b   : > { %1995 = vmatpush1.msra.mxu0 %v4121_v56  ;;  %3442 = vmatpush3.msra.mxu1 %v4125_v58 }
 0x83c   : > { %1996 = vmatprep.subr.mxu0 %v4117_v54  ;;  %3443 = vmatprep.subr.mxu1 %v5144_v4 }
 0x83d   : > { %1997 = vmatpush1.msra.mxu0 %v4115_v53  ;;  %3444 = vmatpush3.msra.mxu1 %v4119_v55 }
 0x83e   : > { %1998 = vmatprep.subr.mxu0 %v4111_v51  ;;  %3445 = vmatprep.subr.mxu1 %v5144_v4 }
 0x83f   : > { %1999 = vmatpush1.msra.mxu0 %v4109_v50  ;;  %3446 = vmatpush3.msra.mxu1 %v4113_v52 }
 0x840   : > { %2000 = vmatprep.subr.mxu0 %v4105_v48  ;;  %3447 = vmatprep.subr.mxu1 %v5144_v4 }
 0x841   : > { %2001 = vmatpush1.msra.mxu0 %v4103_v47  ;;  %3448 = vmatpush3.msra.mxu1 %v4107_v49 }
 0x842   : > { %2002 = vmatprep.subr.mxu0 %v4099_v45  ;;  %3449 = vmatprep.subr.mxu1 %v5144_v4 }
 0x843   : > { %2003 = vmatpush1.msra.mxu0 %v4097_v44  ;;  %3450 = vmatpush3.msra.mxu1 %v4101_v46 }
 0x844   : > { %2004 = vmatprep.subr.mxu0 %v4093_v42  ;;  %3451 = vmatprep.subr.mxu1 %v5144_v4 }
 0x845   : > { %2005 = vmatpush1.msra.mxu0 %v4091_v41  ;;  %3452 = vmatpush3.msra.mxu1 %v4095_v43 }
 0x846   : > { %2006 = vmatprep.subr.mxu0 %v4087_v39  ;;  %3453 = vmatprep.subr.mxu1 %v5144_v4 }
 0x847   : > { %2007 = vmatpush1.msra.mxu0 %v4085_v38  ;;  %3454 = vmatpush3.msra.mxu1 %v4089_v40 }
 0x848   : > { %2008 = vmatprep.subr.mxu0 %v4081_v36  ;;  %3455 = vmatprep.subr.mxu1 %v5144_v4 }
 0x849   : > { %2009 = vmatpush1.msra.mxu0 %v4079_v35  ;;  %3456 = vmatpush3.msra.mxu1 %v4083_v37 }
 0x84a   : > { %2010 = vmatprep.subr.mxu0 %v4075_v33  ;;  %3457 = vmatprep.subr.mxu1 %v5144_v4 }
 0x84b   : > { %2011 = vmatpush1.msra.mxu0 %v4073_v32  ;;  %3458 = vmatpush3.msra.mxu1 %v4077_v34 }
 0x84c   : > { %2012 = vmatprep.subr.mxu0 %v4069_v30  ;;  %3459 = vmatprep.subr.mxu1 %v5144_v4 }
 0x84d   : > { %2013 = vmatpush1.msra.mxu0 %v4067_v29  ;;  %3460 = vmatpush3.msra.mxu1 %v4071_v31 }
 0x84e   : > { %2014 = vmatprep.subr.mxu0 %v4063_v27  ;;  %3461 = vmatprep.subr.mxu1 %v5144_v4 }
 0x84f   : > { %2015 = vmatpush1.msra.mxu0 %v4061_v26  ;;  %3462 = vmatpush3.msra.mxu1 %v4065_v28 }
 0x850   : > { %2016 = vmatprep.subr.mxu0 %v4057_v24  ;;  %3463 = vmatprep.subr.mxu1 %v5144_v4 }
 0x851   : > { %2017 = vmatpush1.msra.mxu0 %v4055_v23  ;;  %3464 = vmatpush3.msra.mxu1 %v4059_v25 }
 0x852   : > { %2018 = vmatprep.subr.mxu0 %v4051_v21  ;;  %3465 = vmatprep.subr.mxu1 %v5144_v4 }
 0x853   : > { %2019 = vmatpush1.msra.mxu0 %v4049_v20  ;;  %3466 = vmatpush3.msra.mxu1 %v4053_v22 }
 0x854   : > { %2020 = vmatprep.subr.mxu0 %v4045_v18  ;;  %3467 = vmatprep.subr.mxu1 %v5144_v4 }
 0x855   : > { %2021 = vmatpush1.msra.mxu0 %v5138_v3  ;;  %3468 = vmatpush3.msra.mxu1 %v5141_v14 }
 0x856   : > { %2022 = vmatprep.subr.mxu0 %v5139_v5  ;;  %3469 = vmatprep.subr.mxu1 %v5144_v4 }
 0x857   : > { %2023 = vmatpush1.msra.mxu0 %v5145_v9  ;;  %2056 = vmatprep.mubr.f32.mxu0 %v5144_v4  ;;  %v1817_v9 = vld [vmem:[#allocation3 + $0x8] sm:$0xff] }
 0x858   : > { %3470 = vmatpush3.msra.mxu1 %v5146_v10  ;;  %3471 = vmatprep.mubr.msk.f32.mxu1 %vm3895_vm2, %v5144_v4 }
 0x859   : > { %2166 = vmatprep.subr.mxu0 %v5147_v8  ;;  %3474 = vmatprep.subr.mxu1 %v5144_v4 }
 0x8f8   : > { %v1884_v0 = vpop.f32.mrf.mxu0  ;;  %v1955_v13 = vpop.f32.mrf.mxu1 }
 0x8f9   : > { %v1959_v1 = vadd.f32 %v1884_v0, %v1815_v15  ;;  %v1973_v8 = vadd.f32 %v5143_v62, %v1955_v13 }
 0x8fa   : > { %v3438_v19 = vpop.f32.mrf.mxu1  ;;  %v1886_v11 = vpop.f32.mrf.mxu0 }
 0x8fb   : > { %v2901_v16 = vmul.f32 -1.442695, %v1959_v1  ;;  %v1966_v17 = vadd.f32 %v1886_v11, %v1816_v60  ;;  %v1983_v19 = vstv %s1982_s23 }
 0x8fc   : > { %vm1984_vm4 = vcmp.eq.s32.totalorder %v1983_v19, 1 }
 0x8fd   : > { %3734 = vpow2.f32 %v2901_v16  ;;  %v2902_v6 = vmul.f32 -1.442695, %v1966_v17 }
 0x8ff   : > { %3736 = vpow2.f32 %v2902_v6 }
 0x90a   : > { %v3735_v63 = vpop.eup %3734 }
 0x90b   : > { %v1963_v2 = vadd.f32 1.0, %v3735_v63 }
 0x90c   : > { %v3737_v12 = vpop.eup %3736 }
 0x90d   : > { %3738 = vrcp.f32 %v1963_v2  ;;  %v1970_v15 = vadd.f32 1.0, %v3737_v12 }
 0x91a   : > { %v3739_v10 = vpop.eup %3738 }
 0x91b   : > { %v1974_v5 = vmul.f32 %v3739_v10, %v1973_v8  ;;  %v5152_v10 = vld [vmem:[#allocation18_spill] sm:$0xff]  ;;  %v1989_v8 = vld [vmem:[#allocation3 + $0x70] sm:$0xff] }
 0x91d   : > { %v1975_v14 = vadd.f32 %v1974_v5, %v1817_v9  ;;  %v5148_v5 = vld [vmem:[#allocation17_spill] sm:$0xff]  ;;  %v5151_v9 = vld [vmem:[#allocation15_spill] sm:$0xff] }
 0x91f   : > { %3740 = vtanh.f32 %v1975_v14  ;;  %v5149_v14 = vld [vmem:[#allocation14_spill] sm:$0xff] }
 0x920   : > { %3742 = vrcp.f32 %v1970_v15  ;;  %v1990_v15 = vld [vmem:[#allocation3 + $0x80] sm:$0xff] }
 0x92c   : > { %v3741_v0 = vpop.eup %3740 }
 0x92d   : > { %v1977_v1 = vsub.f32 %v4722_v7, %v3741_v0  ;;  %v3743_v16 = vpop.eup %3742 }
 0x92f   : > { %v1978_v60 = vmul.f32 %v3743_v16, %v1977_v1 }
 0x931   : > { %v1979_v11 = vadd.f32 %v3741_v0, %v1978_v60 }
 0x933   : > { %v4797_v13 = vsel %vm1984_vm4, %v1979_v11, %v4722_v7  ;;  %v5150_v7 = vld [vmem:[#allocation13_spill] sm:$0xff] }
 0x934   : > { %2057 = vmatmul.mubr.f32.vlgmr.msra.gmra.mxu0 %v4797_v13  ;;  %3472 = vmatmul.mubr.f32.vlgmr.msra.gmra.mxu1 %v4797_v13 }
 0x935   : > { %2167 = vmatpush1.msra.mxu0 %v4127_v59  ;;  %3475 = vmatpush3.msra.mxu1 %v4131_v61 }
 0x936   : > { %2168 = vmatprep.subr.mxu0 %v4123_v57  ;;  %3476 = vmatprep.subr.mxu1 %v5144_v4 }
 0x937   : > { %2169 = vmatpush1.msra.mxu0 %v4121_v56  ;;  %3477 = vmatpush3.msra.mxu1 %v4125_v58 }
 0x938   : > { %2170 = vmatprep.subr.mxu0 %v4117_v54  ;;  %3478 = vmatprep.subr.mxu1 %v5144_v4 }
 0x939   : > { %2171 = vmatpush1.msra.mxu0 %v4115_v53  ;;  %3479 = vmatpush3.msra.mxu1 %v4119_v55 }
 0x93a   : > { %2172 = vmatprep.subr.mxu0 %v4111_v51  ;;  %3480 = vmatprep.subr.mxu1 %v5144_v4 }
 0x93b   : > { %2173 = vmatpush1.msra.mxu0 %v4109_v50  ;;  %3481 = vmatpush3.msra.mxu1 %v4113_v52 }
 0x93c   : > { %2174 = vmatprep.subr.mxu0 %v4105_v48  ;;  %3482 = vmatprep.subr.mxu1 %v5144_v4 }
 0x93d   : > { %2175 = vmatpush1.msra.mxu0 %v4103_v47  ;;  %3483 = vmatpush3.msra.mxu1 %v4107_v49 }
 0x93e   : > { %2176 = vmatprep.subr.mxu0 %v4099_v45  ;;  %3484 = vmatprep.subr.mxu1 %v5144_v4 }
 0x93f   : > { %2177 = vmatpush1.msra.mxu0 %v4097_v44  ;;  %3485 = vmatpush3.msra.mxu1 %v4101_v46 }
 0x940   : > { %2178 = vmatprep.subr.mxu0 %v4093_v42  ;;  %3486 = vmatprep.subr.mxu1 %v5144_v4 }
 0x941   : > { %2179 = vmatpush1.msra.mxu0 %v4091_v41  ;;  %3487 = vmatpush3.msra.mxu1 %v4095_v43 }
 0x942   : > { %2180 = vmatprep.subr.mxu0 %v4087_v39  ;;  %3488 = vmatprep.subr.mxu1 %v5144_v4 }
 0x943   : > { %2181 = vmatpush1.msra.mxu0 %v4085_v38  ;;  %3489 = vmatpush3.msra.mxu1 %v4089_v40 }
 0x944   : > { %2182 = vmatprep.subr.mxu0 %v4081_v36  ;;  %3490 = vmatprep.subr.mxu1 %v5144_v4 }
 0x945   : > { %2183 = vmatpush1.msra.mxu0 %v4079_v35  ;;  %3491 = vmatpush3.msra.mxu1 %v4083_v37 }
 0x946   : > { %2184 = vmatprep.subr.mxu0 %v4075_v33  ;;  %3492 = vmatprep.subr.mxu1 %v5144_v4 }
 0x947   : > { %2185 = vmatpush1.msra.mxu0 %v4073_v32  ;;  %3493 = vmatpush3.msra.mxu1 %v4077_v34 }
 0x948   : > { %2186 = vmatprep.subr.mxu0 %v4069_v30  ;;  %3494 = vmatprep.subr.mxu1 %v5144_v4 }
 0x949   : > { %2187 = vmatpush1.msra.mxu0 %v4067_v29  ;;  %3495 = vmatpush3.msra.mxu1 %v4071_v31 }
 0x94a   : > { %2188 = vmatprep.subr.mxu0 %v4063_v27  ;;  %3496 = vmatprep.subr.mxu1 %v5144_v4 }
 0x94b   : > { %2189 = vmatpush1.msra.mxu0 %v4061_v26  ;;  %3497 = vmatpush3.msra.mxu1 %v4065_v28 }
 0x94c   : > { %2190 = vmatprep.subr.mxu0 %v4057_v24  ;;  %3498 = vmatprep.subr.mxu1 %v5144_v4 }
 0x94d   : > { %2191 = vmatpush1.msra.mxu0 %v4055_v23  ;;  %3499 = vmatpush3.msra.mxu1 %v4059_v25 }
 0x94e   : > { %2192 = vmatprep.subr.mxu0 %v4051_v21  ;;  %3500 = vmatprep.subr.mxu1 %v5144_v4 }
 0x94f   : > { %2193 = vmatpush1.msra.mxu0 %v4049_v20  ;;  %3501 = vmatpush3.msra.mxu1 %v4053_v22 }
 0x950   : > { %2194 = vmatprep.subr.mxu0 %v4045_v18  ;;  %3502 = vmatprep.subr.mxu1 %v5144_v4 }
 0x951   : > { %2195 = vmatpush1.msra.mxu0 %v5138_v3  ;;  %3503 = vmatpush3.msra.mxu1 %v5148_v5 }
 0x952   : > { %2196 = vmatprep.subr.mxu0 %v5149_v14  ;;  %3504 = vmatprep.subr.mxu1 %v5144_v4 }
 0x953   : > { %2197 = vmatpush1.msra.mxu0 %v5150_v7  ;;  %2230 = vmatprep.mubr.f32.mxu0 %v5144_v4  ;;  %v1991_v7 = vld [vmem:[#allocation3 + $0x88] sm:$0xff] }
 0x954   : > { %3505 = vmatpush3.msra.mxu1 %v5151_v9  ;;  %3506 = vmatprep.mubr.msk.f32.mxu1 %vm3895_vm2, %v5144_v4 }
 0x955   : > { %2340 = vmatprep.subr.mxu0 %v5152_v10  ;;  %3509 = vmatprep.subr.mxu1 %v5144_v4 }
 0x9f4   : > { %v2058_v17 = vpop.f32.mrf.mxu0  ;;  %v2129_v6 = vpop.f32.mrf.mxu1 }
 0x9f5   : > { %v2133_v63 = vadd.f32 %v2058_v17, %v1989_v8  ;;  %v2147_v10 = vadd.f32 %v5143_v62, %v2129_v6 }
 0x9f6   : > { %v3473_v2 = vpop.f32.mrf.mxu1  ;;  %v2060_v0 = vpop.f32.mrf.mxu0 }
 0x9f7   : > { %v2903_v12 = vmul.f32 -1.442695, %v2133_v63  ;;  %v2140_v1 = vadd.f32 %v2060_v0, %v1990_v15  ;;  %v2157_v2 = vstv %s2156_s26 }
 0x9f8   : > { %vm2158_vm5 = vcmp.eq.s32.totalorder %v2157_v2, 1 }
 0x9f9   : > { %3744 = vpow2.f32 %v2903_v12  ;;  %v2904_v19 = vmul.f32 -1.442695, %v2140_v1 }
 0x9fb   : > { %3746 = vpow2.f32 %v2904_v19 }
 0xa06   : > { %v3745_v16 = vpop.eup %3744 }
 0xa07   : > { %v2137_v60 = vadd.f32 1.0, %v3745_v16 }
 0xa08   : > { %v3747_v11 = vpop.eup %3746 }
 0xa09   : > { %3748 = vrcp.f32 %v2137_v60  ;;  %v2144_v8 = vadd.f32 1.0, %v3747_v11 }
 0xa16   : > { %v3749_v9 = vpop.eup %3748 }
 0xa17   : > { %v2148_v14 = vmul.f32 %v3749_v9, %v2147_v10  ;;  %v5157_v9 = vld [vmem:[#allocation18_spill] sm:$0xff] }
 0xa18   : > { %v2163_v10 = vld [vmem:[#allocation3 + $0x40] sm:$0xff] }
 0xa19   : > { %v2149_v5 = vadd.f32 %v2148_v14, %v1991_v7  ;;  %v5155_v14 = vld [vmem:[#allocation13_spill] sm:$0xff]  ;;  %v5156_v7 = vld [vmem:[#allocation15_spill] sm:$0xff] }
 0xa1b   : > { %3750 = vtanh.f32 %v2149_v5  ;;  %v5154_v5 = vld [vmem:[#allocation14_spill] sm:$0xff] }
 0xa1c   : > { %3752 = vrcp.f32 %v2144_v8  ;;  %v2164_v8 = vld [vmem:[#allocation3 + $0x50] sm:$0xff] }
 0xa28   : > { %v3751_v17 = vpop.eup %3750 }
 0xa29   : > { %v2151_v63 = vsub.f32 %v4797_v13, %v3751_v17  ;;  %v3753_v12 = vpop.eup %3752 }
 0xa2b   : > { %v2152_v15 = vmul.f32 %v3753_v12, %v2151_v63 }
 0xa2d   : > { %v2153_v0 = vadd.f32 %v3751_v17, %v2152_v15 }
 0xa2f   : > { %v4872_v6 = vsel %vm2158_vm5, %v2153_v0, %v4797_v13  ;;  %v5153_v13 = vld [vmem:[#allocation17_spill] sm:$0xff] }
 0xa30   : > { %2231 = vmatmul.mubr.f32.vlgmr.msra.gmra.mxu0 %v4872_v6  ;;  %3507 = vmatmul.mubr.f32.vlgmr.msra.gmra.mxu1 %v4872_v6 }
 0xa31   : > { %2341 = vmatpush1.msra.mxu0 %v4127_v59  ;;  %3510 = vmatpush3.msra.mxu1 %v4131_v61 }
 0xa32   : > { %2342 = vmatprep.subr.mxu0 %v4123_v57  ;;  %3511 = vmatprep.subr.mxu1 %v5144_v4 }
 0xa33   : > { %2343 = vmatpush1.msra.mxu0 %v4121_v56  ;;  %3512 = vmatpush3.msra.mxu1 %v4125_v58 }
 0xa34   : > { %2344 = vmatprep.subr.mxu0 %v4117_v54  ;;  %3513 = vmatprep.subr.mxu1 %v5144_v4 }
 0xa35   : > { %2345 = vmatpush1.msra.mxu0 %v4115_v53  ;;  %3514 = vmatpush3.msra.mxu1 %v4119_v55 }
 0xa36   : > { %2346 = vmatprep.subr.mxu0 %v4111_v51  ;;  %3515 = vmatprep.subr.mxu1 %v5144_v4 }
 0xa37   : > { %2347 = vmatpush1.msra.mxu0 %v4109_v50  ;;  %3516 = vmatpush3.msra.mxu1 %v4113_v52 }
 0xa38   : > { %2348 = vmatprep.subr.mxu0 %v4105_v48  ;;  %3517 = vmatprep.subr.mxu1 %v5144_v4 }
 0xa39   : > { %2349 = vmatpush1.msra.mxu0 %v4103_v47  ;;  %3518 = vmatpush3.msra.mxu1 %v4107_v49 }
 0xa3a   : > { %2350 = vmatprep.subr.mxu0 %v4099_v45  ;;  %3519 = vmatprep.subr.mxu1 %v5144_v4 }
 0xa3b   : > { %2351 = vmatpush1.msra.mxu0 %v4097_v44  ;;  %3520 = vmatpush3.msra.mxu1 %v4101_v46 }
 0xa3c   : > { %2352 = vmatprep.subr.mxu0 %v4093_v42  ;;  %3521 = vmatprep.subr.mxu1 %v5144_v4 }
 0xa3d   : > { %2353 = vmatpush1.msra.mxu0 %v4091_v41  ;;  %3522 = vmatpush3.msra.mxu1 %v4095_v43 }
 0xa3e   : > { %2354 = vmatprep.subr.mxu0 %v4087_v39  ;;  %3523 = vmatprep.subr.mxu1 %v5144_v4 }
 0xa3f   : > { %2355 = vmatpush1.msra.mxu0 %v4085_v38  ;;  %3524 = vmatpush3.msra.mxu1 %v4089_v40 }
 0xa40   : > { %2356 = vmatprep.subr.mxu0 %v4081_v36  ;;  %3525 = vmatprep.subr.mxu1 %v5144_v4 }
 0xa41   : > { %2357 = vmatpush1.msra.mxu0 %v4079_v35  ;;  %3526 = vmatpush3.msra.mxu1 %v4083_v37 }
 0xa42   : > { %2358 = vmatprep.subr.mxu0 %v4075_v33  ;;  %3527 = vmatprep.subr.mxu1 %v5144_v4 }
 0xa43   : > { %2359 = vmatpush1.msra.mxu0 %v4073_v32  ;;  %3528 = vmatpush3.msra.mxu1 %v4077_v34 }
 0xa44   : > { %2360 = vmatprep.subr.mxu0 %v4069_v30  ;;  %3529 = vmatprep.subr.mxu1 %v5144_v4 }
 0xa45   : > { %2361 = vmatpush1.msra.mxu0 %v4067_v29  ;;  %3530 = vmatpush3.msra.mxu1 %v4071_v31 }
 0xa46   : > { %2362 = vmatprep.subr.mxu0 %v4063_v27  ;;  %3531 = vmatprep.subr.mxu1 %v5144_v4 }
 0xa47   : > { %2363 = vmatpush1.msra.mxu0 %v4061_v26  ;;  %3532 = vmatpush3.msra.mxu1 %v4065_v28 }
 0xa48   : > { %2364 = vmatprep.subr.mxu0 %v4057_v24  ;;  %3533 = vmatprep.subr.mxu1 %v5144_v4 }
 0xa49   : > { %2365 = vmatpush1.msra.mxu0 %v4055_v23  ;;  %3534 = vmatpush3.msra.mxu1 %v4059_v25 }
 0xa4a   : > { %2366 = vmatprep.subr.mxu0 %v4051_v21  ;;  %3535 = vmatprep.subr.mxu1 %v5144_v4 }
 0xa4b   : > { %2367 = vmatpush1.msra.mxu0 %v4049_v20  ;;  %3536 = vmatpush3.msra.mxu1 %v4053_v22 }
 0xa4c   : > { %2368 = vmatprep.subr.mxu0 %v4045_v18  ;;  %3537 = vmatprep.subr.mxu1 %v5144_v4 }
 0xa4d   : > { %2369 = vmatpush1.msra.mxu0 %v5138_v3  ;;  %3538 = vmatpush3.msra.mxu1 %v5153_v13 }
 0xa4e   : > { %2370 = vmatprep.subr.mxu0 %v5154_v5  ;;  %3539 = vmatprep.subr.mxu1 %v5144_v4 }
 0xa4f   : > { %2371 = vmatpush1.msra.mxu0 %v5155_v14  ;;  %2404 = vmatprep.mubr.f32.mxu0 %v5144_v4  ;;  %v2165_v14 = vld [vmem:[#allocation3 + $0x28] sm:$0xff] }
 0xa50   : > { %3540 = vmatpush3.msra.mxu1 %v5156_v7  ;;  %3541 = vmatprep.mubr.msk.f32.mxu1 %vm3895_vm2, %v5144_v4 }
 0xa51   : > { %2514 = vmatprep.subr.mxu0 %v5157_v9  ;;  %3544 = vmatprep.subr.mxu1 %v5144_v4 }
 0xaf0   : > { %v2232_v1 = vpop.f32.mrf.mxu0  ;;  %v2303_v19 = vpop.f32.mrf.mxu1 }
 0xaf1   : > { %v2307_v16 = vadd.f32 %v2232_v1, %v2163_v10  ;;  %v2321_v9 = vadd.f32 %v5143_v62, %v2303_v19 }
 0xaf2   : > { %v3508_v60 = vpop.f32.mrf.mxu1  ;;  %v2234_v17 = vpop.f32.mrf.mxu0 }
 0xaf3   : > { %v2905_v11 = vmul.f32 -1.442695, %v2307_v16  ;;  %v2314_v63 = vadd.f32 %v2234_v17, %v2164_v8  ;;  %v2331_v60 = vstv %s2330_s29 }
 0xaf4   : > { %vm2332_vm6 = vcmp.eq.s32.totalorder %v2331_v60, 1 }
 0xaf5   : > { %3754 = vpow2.f32 %v2905_v11  ;;  %v2906_v2 = vmul.f32 -1.442695, %v2314_v63 }
 0xaf7   : > { %3756 = vpow2.f32 %v2906_v2 }
 0xb02   : > { %v3755_v12 = vpop.eup %3754 }
 0xb03   : > { %v2311_v15 = vadd.f32 1.0, %v3755_v12 }
 0xb04   : > { %v3757_v0 = vpop.eup %3756 }
 0xb05   : > { %3758 = vrcp.f32 %v2311_v15  ;;  %v2318_v10 = vadd.f32 1.0, %v3757_v0  ;;  %v2512_v0 = vld [vmem:[#allocation3 + $0x68] sm:$0xff] }
 0xb12   : > { %v3759_v7 = vpop.eup %3758 }
 0xb13   : > { %v2322_v5 = vmul.f32 %v3759_v7, %v2321_v9 }
 0xb15   : > { %v2323_v13 = vadd.f32 %v2322_v5, %v2165_v14  ;;  %v2684_v5 = vld [vmem:[#allocation7] sm:$0xff]  ;;  %v2511_v14 = vld [vmem:[#allocation3 + $0x18] sm:$0xff] }
 0xb17   : > { %3760 = vtanh.f32 %v2323_v13  ;;  %v2685_v13 = vld [vmem:[#allocation7 + $0x8] sm:$0xff] }
 0xb18   : > { %3762 = vrcp.f32 %v2318_v10 }
 0xb24   : > { %v3761_v1 = vpop.eup %3760 }
 0xb25   : > { %v2325_v16 = vsub.f32 %v4872_v6, %v3761_v1  ;;  %v3763_v11 = vpop.eup %3762 }
 0xb27   : > { %v2326_v8 = vmul.f32 %v3763_v11, %v2325_v16 }
 0xb29   : > { %v2327_v17 = vadd.f32 %v3761_v1, %v2326_v8 }
 0xb2b   : > { %v4947_v19 = vsel %vm2332_vm6, %v2327_v17, %v4872_v6  ;;  %v2686_v6 = vld [vmem:[#allocation7 + $0x10] sm:$0xff] }
 0xb2c   : > { %2405 = vmatmul.mubr.f32.vlgmr.msra.gmra.mxu0 %v4947_v19  ;;  %3542 = vmatmul.mubr.f32.vlgmr.msra.gmra.mxu1 %v4947_v19  ;;  %v2513_v17 = vld [vmem:[#allocation3 + $0x60] sm:$0xff] }
 0xb2d   : > { %2515 = vmatpush1.msra.mxu0 %v4127_v59  ;;  %3545 = vmatpush3.msra.mxu1 %v4131_v61  ;;  %v2689_v59 = vld [vmem:[#allocation7 + $0x28] sm:$0xff]  ;;  %v2688_v61 = vld [vmem:[#allocation7 + $0x20] sm:$0xff] }
 0xb2e   : > { %2516 = vmatprep.subr.mxu0 %v4123_v57  ;;  %3546 = vmatprep.subr.mxu1 %v5144_v4  ;;  %v2691_v57 = vld [vmem:[#allocation7 + $0x38] sm:$0xff] }
 0xb2f   : > { %2517 = vmatpush1.msra.mxu0 %v4121_v56  ;;  %3547 = vmatpush3.msra.mxu1 %v4125_v58  ;;  %v2692_v56 = vld [vmem:[#allocation7 + $0x40] sm:$0xff]  ;;  %v2690_v58 = vld [vmem:[#allocation7 + $0x30] sm:$0xff] }
 0xb30   : > { %2518 = vmatprep.subr.mxu0 %v4117_v54  ;;  %3548 = vmatprep.subr.mxu1 %v5144_v4  ;;  %v2694_v54 = vld [vmem:[#allocation7 + $0x50] sm:$0xff] }
 0xb31   : > { %2519 = vmatpush1.msra.mxu0 %v4115_v53  ;;  %3549 = vmatpush3.msra.mxu1 %v4119_v55  ;;  %v2695_v53 = vld [vmem:[#allocation7 + $0x58] sm:$0xff]  ;;  %v2693_v55 = vld [vmem:[#allocation7 + $0x48] sm:$0xff] }
 0xb32   : > { %2520 = vmatprep.subr.mxu0 %v4111_v51  ;;  %3550 = vmatprep.subr.mxu1 %v5144_v4  ;;  %v2697_v51 = vld [vmem:[#allocation7 + $0x68] sm:$0xff] }
 0xb33   : > { %2521 = vmatpush1.msra.mxu0 %v4109_v50  ;;  %3551 = vmatpush3.msra.mxu1 %v4113_v52  ;;  %v2698_v50 = vld [vmem:[#allocation7 + $0x70] sm:$0xff]  ;;  %v2696_v52 = vld [vmem:[#allocation7 + $0x60] sm:$0xff] }
 0xb34   : > { %2522 = vmatprep.subr.mxu0 %v4105_v48  ;;  %3552 = vmatprep.subr.mxu1 %v5144_v4 }
 0xb35   : > { %2523 = vmatpush1.msra.mxu0 %v4103_v47  ;;  %3553 = vmatpush3.msra.mxu1 %v4107_v49  ;;  %v2699_v49 = vld [vmem:[#allocation7 + $0x78] sm:$0xff] }
 0xb36   : > { %2524 = vmatprep.subr.mxu0 %v4099_v45  ;;  %3554 = vmatprep.subr.mxu1 %v5144_v4 }
 0xb37   : > { %2525 = vmatpush1.msra.mxu0 %v4097_v44  ;;  %3555 = vmatpush3.msra.mxu1 %v4101_v46  ;;  %v2505_v44 = vstv %s2504_s8 }
 0xb38   : > { %2526 = vmatprep.subr.mxu0 %v4093_v42  ;;  %3556 = vmatprep.subr.mxu1 %v5144_v4  ;;  %vm2506_vm7 = vcmp.eq.s32.totalorder %v2505_v44, 1 }
 0xb39   : > { %2527 = vmatpush1.msra.mxu0 %v4091_v41  ;;  %3557 = vmatpush3.msra.mxu1 %v4095_v43 }
 0xb3a   : > { %2528 = vmatprep.subr.mxu0 %v4087_v39  ;;  %3558 = vmatprep.subr.mxu1 %v5144_v4 }
 0xb3b   : > { %2529 = vmatpush1.msra.mxu0 %v4085_v38  ;;  %3559 = vmatpush3.msra.mxu1 %v4089_v40  ;;  %v2339_v38 = vld [vmem:[#allocation3 + $0x30] sm:$0xff] }
 0xb3c   : > { %2530 = vmatprep.subr.mxu0 %v4081_v36  ;;  %3560 = vmatprep.subr.mxu1 %v5144_v4 }
 0xb3d   : > { %2531 = vmatpush1.msra.mxu0 %v4079_v35  ;;  %3561 = vmatpush3.msra.mxu1 %v4083_v37 }
 0xb3e   : > { %2532 = vmatprep.subr.mxu0 %v4075_v33  ;;  %3562 = vmatprep.subr.mxu1 %v5144_v4 }
 0xb3f   : > { %2533 = vmatpush1.msra.mxu0 %v4073_v32  ;;  %3563 = vmatpush3.msra.mxu1 %v4077_v34 }
 0xb40   : > { %2534 = vmatprep.subr.mxu0 %v4069_v30  ;;  %3564 = vmatprep.subr.mxu1 %v5144_v4 }
 0xb41   : > { %2535 = vmatpush1.msra.mxu0 %v4067_v29  ;;  %3565 = vmatpush3.msra.mxu1 %v4071_v31  ;;  %v2338_v29 = vld [vmem:[#allocation3 + $0x48] sm:$0xff] }
 0xb42   : > { %2536 = vmatprep.subr.mxu0 %v4063_v27  ;;  %3566 = vmatprep.subr.mxu1 %v5144_v4 }
 0xb43   : > { %2537 = vmatpush1.msra.mxu0 %v4061_v26  ;;  %3567 = vmatpush3.msra.mxu1 %v4065_v28  ;;  %v5159_v26 = vld [vmem:[#allocation14_spill] sm:$0xff] }
 0xb44   : > { %2538 = vmatprep.subr.mxu0 %v4057_v24  ;;  %3568 = vmatprep.subr.mxu1 %v5144_v4  ;;  %v5158_v24 = vld [vmem:[#allocation17_spill] sm:$0xff] }
 0xb45   : > { %2539 = vmatpush1.msra.mxu0 %v4055_v23  ;;  %3569 = vmatpush3.msra.mxu1 %v4059_v25  ;;  %v5160_v23 = vld [vmem:[#allocation13_spill] sm:$0xff] }
 0xb46   : > { %2540 = vmatprep.subr.mxu0 %v4051_v21  ;;  %3570 = vmatprep.subr.mxu1 %v5144_v4  ;;  %v5161_v21 = vld [vmem:[#allocation15_spill] sm:$0xff] }
 0xb47   : > { %2541 = vmatpush1.msra.mxu0 %v4049_v20  ;;  %3571 = vmatpush3.msra.mxu1 %v4053_v22 }
 0xb48   : > { %2542 = vmatprep.subr.mxu0 %v4045_v18  ;;  %3572 = vmatprep.subr.mxu1 %v5144_v4  ;;  %v2337_v18 = vld [vmem:[#allocation3 + $0x10] sm:$0xff] }
 0xb49   : > { %2543 = vmatpush1.msra.mxu0 %v5138_v3  ;;  %3573 = vmatpush3.msra.mxu1 %v5158_v24  ;;  %v2687_v3 = vld [vmem:[#allocation7 + $0x18] sm:$0xff] }
 0xb4a   : > { %2544 = vmatprep.subr.mxu0 %v5159_v26  ;;  %3574 = vmatprep.subr.mxu1 %v5144_v4 }
 0xb4b   : > { %2545 = vmatpush1.msra.mxu0 %v5160_v23  ;;  %2578 = vmatprep.mubr.f32.mxu0 %v5144_v4 }
 0xb4c   : > { %3575 = vmatpush3.msra.mxu1 %v5161_v21  ;;  %3576 = vmatprep.mubr.msk.f32.mxu1 %vm3895_vm2, %v5144_v4 }
 0xb4d   : > { %3579 = vmatprep.subr.mxu0 %v5144_v4 }
 0xbec   : > { %v2406_v20 = vpop.f32.mrf.mxu0  ;;  %v2477_v22 = vpop.f32.mrf.mxu1 }
 0xbed   : > { %v2481_v25 = vadd.f32 %v2406_v20, %v2337_v18  ;;  %v2495_v36 = vadd.f32 %v5143_v62, %v2477_v22  ;;  %v2679_v18 = vstv %s2678_s10 }
 0xbee   : > { %v3543_v27 = vpop.f32.mrf.mxu1  ;;  %v2408_v30 = vpop.f32.mrf.mxu0  ;;  %vm2680_vm8 = vcmp.eq.s32.totalorder %v2679_v18, 1 }
 0xbef   : > { %v2907_v28 = vmul.f32 -1.442695, %v2481_v25  ;;  %v2488_v31 = vadd.f32 %v2408_v30, %v2338_v29  ;;  %v2911_v27 = vld [vmem:[%s5069_s6] ss:$0 sm:$0xff] }
 0xbf1   : > { %3764 = vpow2.f32 %v2907_v28  ;;  %v2908_v32 = vmul.f32 -1.442695, %v2488_v31 }
 0xbf3   : > { %3766 = vpow2.f32 %v2908_v32 }
 0xbfe   : > { %v3765_v33 = vpop.eup %3764 }
 0xbff   : > { %v2485_v34 = vadd.f32 1.0, %v3765_v33 }
 0xc00   : > { %v3767_v35 = vpop.eup %3766 }
 0xc01   : > { %3768 = vrcp.f32 %v2485_v34  ;;  %v2492_v41 = vadd.f32 1.0, %v3767_v35 }
 0xc0e   : > { %v3769_v37 = vpop.eup %3768 }
 0xc0f   : > { %v2496_v39 = vmul.f32 %v3769_v37, %v2495_v36 }
 0xc11   : > { %v2497_v40 = vadd.f32 %v2496_v39, %v2339_v38 }
 0xc13   : > { %3770 = vtanh.f32 %v2497_v40 }
 0xc14   : > { %3772 = vrcp.f32 %v2492_v41 }
 0xc20   : > { %v3771_v42 = vpop.eup %3770 }
 0xc21   : > { %v2499_v43 = vsub.f32 %v4947_v19, %v3771_v42  ;;  %v3773_v45 = vpop.eup %3772 }
 0xc23   : > { %v2500_v46 = vmul.f32 %v3773_v45, %v2499_v43 }
 0xc25   : > { %v2501_v47 = vadd.f32 %v3771_v42, %v2500_v46 }
 0xc27   : > { %v5021_v48 = vsel %vm2506_vm7, %v2501_v47, %v4947_v19 }
 0xc28   : > { %2579 = vmatmul.mubr.f32.vlgmr.msra.gmra.mxu0 %v5021_v48  ;;  %3577 = vmatmul.mubr.f32.vlgmr.msra.gmra.mxu1 %v5021_v48 }
 0xc29   : > { %3611 = vmatprep.mubr.msk.f32.mxu0 %vm3895_vm2, %v5144_v4  ;;  %3580 = vmatpush3.msra.mxu0 %v2699_v49 }
 0xc2a   : > { %3581 = vmatprep.subr.mxu0 %v5144_v4 }
 0xc2b   : > { %3582 = vmatpush3.msra.mxu0 %v2698_v50 }
 0xc2c   : > { %3583 = vmatprep.subr.mxu0 %v5144_v4 }
 0xc2d   : > { %3584 = vmatpush3.msra.mxu0 %v2697_v51 }
 0xc2e   : > { %3585 = vmatprep.subr.mxu0 %v5144_v4 }
 0xc2f   : > { %3586 = vmatpush3.msra.mxu0 %v2696_v52 }
 0xc30   : > { %3587 = vmatprep.subr.mxu0 %v5144_v4 }
 0xc31   : > { %3588 = vmatpush3.msra.mxu0 %v2695_v53 }
 0xc32   : > { %3589 = vmatprep.subr.mxu0 %v5144_v4 }
 0xc33   : > { %3590 = vmatpush3.msra.mxu0 %v2694_v54 }
 0xc34   : > { %3591 = vmatprep.subr.mxu0 %v5144_v4 }
 0xc35   : > { %3592 = vmatpush3.msra.mxu0 %v2693_v55 }
 0xc36   : > { %3593 = vmatprep.subr.mxu0 %v5144_v4 }
 0xc37   : > { %3594 = vmatpush3.msra.mxu0 %v2692_v56 }
 0xc38   : > { %3595 = vmatprep.subr.mxu0 %v5144_v4 }
 0xc39   : > { %3596 = vmatpush3.msra.mxu0 %v2691_v57 }
 0xc3a   : > { %3597 = vmatprep.subr.mxu0 %v5144_v4 }
 0xc3b   : > { %3598 = vmatpush3.msra.mxu0 %v2690_v58 }
 0xc3c   : > { %3599 = vmatprep.subr.mxu0 %v5144_v4 }
 0xc3d   : > { %3600 = vmatpush3.msra.mxu0 %v2689_v59 }
 0xc3e   : > { %3601 = vmatprep.subr.mxu0 %v5144_v4 }
 0xc3f   : > { %3602 = vmatpush3.msra.mxu0 %v2688_v61 }
 0xc40   : > { %3603 = vmatprep.subr.mxu0 %v5144_v4 }
 0xc41   : > { %3604 = vmatpush3.msra.mxu0 %v2687_v3 }
 0xc42   : > { %3605 = vmatprep.subr.mxu0 %v5144_v4 }
 0xc43   : > { %3606 = vmatpush3.msra.mxu0 %v2686_v6 }
 0xc44   : > { %3607 = vmatprep.subr.mxu0 %v5144_v4 }
 0xc45   : > { %3608 = vmatpush3.msra.mxu0 %v2685_v13 }
 0xc46   : > { %3609 = vmatprep.subr.mxu0 %v5144_v4 }
 0xc47   : > { %3610 = vmatpush3.msra.mxu0 %v2684_v5 }
 0xce8   : > { %v2580_v7 = vpop.f32.mrf.mxu0  ;;  %v2651_v63 = vpop.f32.mrf.mxu1 }
 0xce9   : > { %v2655_v2 = vadd.f32 %v2580_v7, %v2511_v14  ;;  %v2669_v4 = vadd.f32 %v5143_v62, %v2651_v63 }
 0xcea   : > { %v3578_v12 = vpop.f32.mrf.mxu1  ;;  %v2582_v9 = vpop.f32.mrf.mxu0 }
 0xceb   : > { %v2909_v15 = vmul.f32 -1.442695, %v2655_v2  ;;  %v2662_v10 = vadd.f32 %v2582_v9, %v2512_v0 }
 0xced   : > { %3774 = vpow2.f32 %v2909_v15  ;;  %v2910_v1 = vmul.f32 -1.442695, %v2662_v10 }
 0xcef   : > { %3776 = vpow2.f32 %v2910_v1 }
 0xcfa   : > { %v3775_v16 = vpop.eup %3774 }
 0xcfb   : > { %v2659_v60 = vadd.f32 1.0, %v3775_v16 }
 0xcfc   : > { %v3777_v11 = vpop.eup %3776 }
 0xcfd   : > { %3778 = vrcp.f32 %v2659_v60  ;;  %v2666_v26 = vadd.f32 1.0, %v3777_v11 }
 0xd0a   : > { %v3779_v8 = vpop.eup %3778 }
 0xd0b   : > { %v2670_v19 = vmul.f32 %v3779_v8, %v2669_v4 }
 0xd0d   : > { %v2671_v24 = vadd.f32 %v2670_v19, %v2513_v17 }
 0xd0f   : > { %3780 = vtanh.f32 %v2671_v24 }
 0xd10   : > { %3782 = vrcp.f32 %v2666_v26 }
 0xd1c   : > { %v3781_v23 = vpop.eup %3780 }
 0xd1d   : > { %v2673_v21 = vsub.f32 %v5021_v48, %v3781_v23  ;;  %v3783_v20 = vpop.eup %3782 }
 0xd1f   : > { %v2674_v22 = vmul.f32 %v3783_v20, %v2673_v21 }
 0xd21   : > { %v2675_v25 = vadd.f32 %v3781_v23, %v2674_v22 }
 0xd23   : > { %v2681_v62 = vsel %vm2680_vm8, %v2675_v25, %v5021_v48 }
 0xd24   : > { %2682 = vst [vmem:[#allocation2] sm:$0xff] %v2681_v62  ;;  %3612 = vmatmul.mubr.f32.vlgmr.msra.gmra.mxu0 %v2681_v62 }
 0xde4   : > { %v2773_v28 = vpop.f32.mrf.mxu0 }
 0xde5   : > { %v2774_v29 = vadd.f32 %v2911_v27, %v2773_v28 }
 0xde6   : > { %v3613_v30 = vpop.f32.mrf.mxu0 }
 0xde7   : > { %v2912_v31 = vmul.f32 -1.442695, %v2774_v29 }
 0xde9   : > { %3784 = vpow2.f32 %v2912_v31 }
 0xdf6   : > { %v3785_v32 = vpop.eup %3784 }
 0xdf7   : > { %v2780_v33 = vadd.f32 1.0, %v3785_v32 }
 0xdf9   : > { %3786 = vrcp.f32 %v2780_v33 }
 0xe06   : > { %v3787_v34 = vpop.eup %3786 }
 0xe07   : > { %2783 = vst [vmem:[#allocation9] sm:$0xff] %v3787_v34 }
 0xe08 PF: > { %s3896_s19 = smov [#allocation9]  }
 0xe09   : > { %s2791_s13 = sshll.u32 %s3896_s19, 4  ;;  %s2792_s13 = int_to_ptr.vmem [resolvable:$true] %s2791_s13 }
 0xe0a   : > { %s3840_s14 = scalar_lea.vmem %s2792_s13, 128  ;;  %p3847_p10 = scmp.lt.s32.totalorder %s2792_s13, %s2792_s13 }
 0xe0b   : > { %p3841_p8 = scmp.ne.s32.totalorder %s2792_s13, %s3840_s14  ;;  %p3848_p2 = scmp.lt.s32.totalorder %s3840_s14, %s3840_s14 }
 0xe0d   : > { %p3842_p9 = pnand %p3841_p8, %p2885_p4  ;;  %p3849_p3 = por %p3848_p2, %p3847_p10 }
 0xe0f   : > { %p3843_p11 = pneg %p3842_p9 }
 0xe11   : > { %p3850_p6 = pnand %p3849_p3, %p3843_p11 }
 0xe13   : > { %3853 = shalt.err (!%p3850_p6)
}
 0xe14   : > { %3627 = dma.vmem_to_hbm [thread:$0]  (%p2885_p4), %s2792_s13, 128, %s5070_s7, [#allocation6]  }
 0xe15   : > { %3877 = dma.done.wait (%p2885_p4), [#allocation6], 128  }
 0xe16   : > { %3879 = vsyncadd (%p2885_p4), [#allocation6], 4294967168 }
 0xe17 PF: > { %s20_s24 = sadd.s32 1, %s3882_s24  }
 0xe18   : > { %p17_p7 = scmp.ge.s32.totalorder %s20_s24, 4  }
 0xe1a   :  { %19 = sbr.rel (!%p17_p7) target bundleno = 3 (0x3), region = 108 }
 0xe1f   :  { %2804 = vsyncpa [#allocation5], 1 }
 0xe20   :  { %2806 = vsyncpa [#allocation5 + $0x1], 1 }
 0xe21   :  { %2807 = vsyncpa [#allocation8], 1 }
 0xe22   :  { %2808 = vsyncpa [#allocation6], 1 }
 0xe23   :  { %2810 = vsyncpa [#allocation6 + $0x1], 1 }

</bundles_post_ra>
